<compile_context>
chip_gen: v7x
topology: tpu7x:2x2x1
jax: 0.10.0
libtpu: 0.0.40
codegen_flags: <defaults>
</compile_context>

<pallas_src>
import functools
import math

import jax
import jax.numpy as jnp
from jax import lax
from jax.experimental import pallas as pl
from jax.experimental.pallas import tpu as pltpu


def _chip_defaults():
    """Generation-dependent tile / VMEM choices (v5e: 128-wide MXU; v7x: 64 MiB VMEM)."""
    kind = ""
    try:
        kind = jax.devices()[0].device_kind.lower()
    except Exception:
        pass
    if ("v3" in kind) or ("v4" in kind) or ("v5" in kind):
        # 128-wide MXU generations, 128 MiB physical VMEM, single vst slot.
        return dict(tm=128, tn=128, tk=512, qkv_tm=128, vmem=64 * 1024 * 1024)
    if "7" in kind:
        # v7x: 64 MiB physical VMEM per TensorCore -> leave double-buffering headroom.
        return dict(tm=256, tn=256, tk=512, qkv_tm=128, vmem=40 * 1024 * 1024)
    # v6e default (128 MiB physical VMEM, 256-deep MXU).
    return dict(tm=256, tn=256, tk=512, qkv_tm=256, vmem=64 * 1024 * 1024)


_CHIP = _chip_defaults()
TM, TN, TK = _CHIP["tm"], _CHIP["tn"], _CHIP["tk"]
QKV_TM = _CHIP["qkv_tm"]     # smaller row tile for the 3-accumulator QKV kernel on v7x
LN_TM = 1024                 # standalone LayerNorm is HBM-bound: big row tiles
VMEM_LIMIT = _CHIP["vmem"]


def _pick_tile(dim, target, align):
    """Largest multiple of `align` dividing `dim` that is <= target; else the full dim."""
    if dim <= target:
        return dim
    t = (target // align) * align
    while t >= align:
        if dim % t == 0:
            return t
        t -= align
    return dim


def _pick_head_group(num_heads, head_dim):
    """Smallest head group whose lane width (g*D) is a 128 multiple; else all heads."""
    for g in range(1, num_heads + 1):
        if num_heads % g == 0 and (g * head_dim) % 128 == 0:
            return g
    return num_heads


# ----------------------------- tiled linear (bias + activation fused) -----------------------------

def _linear_kernel(x_ref, w_ref, b_ref, o_ref, acc_ref, *, activation):
    @pl.when(pl.program_id(2) == 0)
    def _():
        acc_ref[...] = jnp.zeros_like(acc_ref)

    # bf16 operands straight into the MXU, f32 accumulation.
    acc_ref[...] += jnp.dot(x_ref[...], w_ref[...], preferred_element_type=jnp.float32)

    @pl.when(pl.program_id(2) == pl.num_programs(2) - 1)
    def _():
        y = acc_ref[...] + b_ref[...].astype(jnp.float32)
        if activation == "gelu":   # gelu_new (tanh approximation), as in ALBERT — f32 epilogue
            y = 0.5 * y * (1.0 + jnp.tanh(0.7978845608028654 * (y + 0.044715 * y * y * y)))
        elif activation == "tanh":
            y = jnp.tanh(y)
        o_ref[...] = y.astype(o_ref.dtype)


def linear(x2d, w, b, activation=None):
    """x2d: [M, K], w: [K, N], b: [N] -> [M, N] (tiled, double-buffered, fused epilogue)."""
    M, K = x2d.shape
    N = w.shape[1]
    tm = _pick_tile(M, TM, 8)
    tn = _pick_tile(N, TN, 128)
    tk = _pick_tile(K, TK, 128)
    return pl.pallas_call(
        functools.partial(_linear_kernel, activation=activation),
        out_shape=jax.ShapeDtypeStruct((M, N), x2d.dtype),
        grid=(M // tm, N // tn, K // tk),
        in_specs=[
            pl.BlockSpec((tm, tk), lambda i, j, k: (i, k)),
            pl.BlockSpec((tk, tn), lambda i, j, k: (k, j)),
            pl.BlockSpec((1, tn), lambda i, j, k: (0, j)),
        ],
        out_specs=pl.BlockSpec((tm, tn), lambda i, j, k: (i, j)),
        scratch_shapes=[pltpu.VMEM((tm, tn), jnp.float32)],
        compiler_params=pltpu.CompilerParams(
            dimension_semantics=("parallel", "parallel", "arbitrary"),
            vmem_limit_bytes=VMEM_LIMIT),
    )(x2d, w, b.reshape(1, N))


# ------------------- tiled linear with fused residual-add + LayerNorm epilogue -------------------

def _linear_res_ln_kernel(x_ref, w_ref, b_ref, r_ref, g_ref, beta_ref, o_ref, acc_ref, *, eps):
    @pl.when(pl.program_id(1) == 0)
    def _():
        acc_ref[...] = jnp.zeros_like(acc_ref)

    acc_ref[...] += jnp.dot(x_ref[...], w_ref[...], preferred_element_type=jnp.float32)

    @pl.when(pl.program_id(1) == pl.num_programs(1) - 1)
    def _():
        # full-row (tn = H) epilogue: bias + residual + LayerNorm, all in f32.
        y = acc_ref[...] + b_ref[...].astype(jnp.float32) + r_ref[...].astype(jnp.float32)
        mu = jnp.mean(y, axis=-1, keepdims=True)
        yc = y - mu
        var = jnp.mean(yc * yc, axis=-1, keepdims=True)
        out = yc * lax.rsqrt(var + eps) * g_ref[...].astype(jnp.float32) \
            + beta_ref[...].astype(jnp.float32)
        o_ref[...] = out.astype(o_ref.dtype)


def linear_residual_layernorm(x2d, w, b, residual, gamma, beta, eps=1e-12):
    """LayerNorm(x2d @ w + b + residual): the intermediate projection never touches HBM."""
    M, K = x2d.shape
    H = w.shape[1]
    tm = _pick_tile(M, TM, 8)
    tk = _pick_tile(K, TK, 128)
    vec_spec = pl.BlockSpec((1, H), lambda i, k: (0, 0))
    return pl.pallas_call(
        functools.partial(_linear_res_ln_kernel, eps=eps),
        out_shape=jax.ShapeDtypeStruct((M, H), residual.dtype),
        grid=(M // tm, K // tk),
        in_specs=[
            pl.BlockSpec((tm, tk), lambda i, k: (i, k)),
            pl.BlockSpec((tk, H), lambda i, k: (k, 0)),
            vec_spec,
            pl.BlockSpec((tm, H), lambda i, k: (i, 0)),   # residual (fetched once per row tile)
            vec_spec,                                      # gamma
            vec_spec,                                      # beta
        ],
        out_specs=pl.BlockSpec((tm, H), lambda i, k: (i, 0)),
        scratch_shapes=[pltpu.VMEM((tm, H), jnp.float32)],
        compiler_params=pltpu.CompilerParams(
            dimension_semantics=("parallel", "arbitrary"),
            vmem_limit_bytes=VMEM_LIMIT),
    )(x2d, w, b.reshape(1, H), residual, gamma.reshape(1, H), beta.reshape(1, H))


# ----------------------------- fused Q/K/V projection (1 read of h, 3 outputs) -----------------------------

def _qkv_kernel(x_ref, wq_ref, wk_ref, wv_ref, b_ref,
                q_ref, k_ref, v_ref, accq, acck, accv, *, scale):
    @pl.when(pl.program_id(1) == 0)
    def _():
        accq[...] = jnp.zeros_like(accq)
        acck[...] = jnp.zeros_like(acck)
        accv[...] = jnp.zeros_like(accv)

    x = x_ref[...]
    accq[...] += jnp.dot(x, wq_ref[...], preferred_element_type=jnp.float32)
    acck[...] += jnp.dot(x, wk_ref[...], preferred_element_type=jnp.float32)
    accv[...] += jnp.dot(x, wv_ref[...], preferred_element_type=jnp.float32)

    @pl.when(pl.program_id(1) == pl.num_programs(1) - 1)
    def _():
        # 1/sqrt(D) attention scale folded into Q here (epilogue is VPU-idle anyway).
        q_ref[...] = ((accq[...] + b_ref[0:1, :].astype(jnp.float32)) * scale).astype(q_ref.dtype)
        k_ref[...] = (acck[...] + b_ref[1:2, :].astype(jnp.float32)).astype(k_ref.dtype)
        v_ref[...] = (accv[...] + b_ref[2:3, :].astype(jnp.float32)).astype(v_ref.dtype)


def qkv_projection(x2d, wq, wk, wv, bq, bk, bv, scale):
    """x2d: [M, H] -> (q*scale, k, v) each [M, H]; the activation is streamed from HBM once."""
    M, K = x2d.shape
    H = wq.shape[1]
    tm = _pick_tile(M, QKV_TM, 8)
    tk = _pick_tile(K, TK, 128)
    b3 = jnp.stack([bq, bk, bv], axis=0)                     # [3, H] f32
    out = jax.ShapeDtypeStruct((M, H), x2d.dtype)
    w_spec = pl.BlockSpec((tk, H), lambda i, k: (k, 0))
    o_spec = pl.BlockSpec((tm, H), lambda i, k: (i, 0))
    return pl.pallas_call(
        functools.partial(_qkv_kernel, scale=scale),
        out_shape=(out, out, out),
        grid=(M // tm, K // tk),
        in_specs=[
            pl.BlockSpec((tm, tk), lambda i, k: (i, k)),
            w_spec, w_spec, w_spec,
            pl.BlockSpec((3, H), lambda i, k: (0, 0)),
        ],
        out_specs=(o_spec, o_spec, o_spec),
        scratch_shapes=[pltpu.VMEM((tm, H), jnp.float32)] * 3,
        compiler_params=pltpu.CompilerParams(
            dimension_semantics=("parallel", "arbitrary"),
            vmem_limit_bytes=VMEM_LIMIT),
    )(x2d, wq, wk, wv, b3)


# ----------------------------- LayerNorm (standalone, large row tiles) -----------------------------

def _layernorm_kernel(x_ref, g_ref, b_ref, o_ref, *, eps):
    x = x_ref[...].astype(jnp.float32)
    mu = jnp.mean(x, axis=-1, keepdims=True)
    xc = x - mu
    var = jnp.mean(xc * xc, axis=-1, keepdims=True)
    y = xc * lax.rsqrt(var + eps) * g_ref[...].astype(jnp.float32) + b_ref[...].astype(jnp.float32)
    o_ref[...] = y.astype(o_ref.dtype)


def layernorm(x2d, gamma, beta, eps=1e-12, out_dtype=None):
    """x2d: [M, H] row-tiled LayerNorm (used only where it cannot be fused into a matmul)."""
    M, H = x2d.shape
    out_dtype = out_dtype or x2d.dtype
    tm = _pick_tile(M, LN_TM, 8)       # mem-bound: big tiles amortize per-step overhead
    row_spec = pl.BlockSpec((tm, H), lambda i: (i, 0))
    vec_spec = pl.BlockSpec((1, H), lambda i: (0, 0))
    return pl.pallas_call(
        functools.partial(_layernorm_kernel, eps=eps),
        out_shape=jax.ShapeDtypeStruct((M, H), out_dtype),
        grid=(M // tm,),
        in_specs=[row_spec, vec_spec, vec_spec],
        out_specs=row_spec,
        compiler_params=pltpu.CompilerParams(
            dimension_semantics=("parallel",),
            vmem_limit_bytes=VMEM_LIMIT),
    )(x2d, gamma.reshape(1, H), beta.reshape(1, H))


# ----------------------------- masked-softmax attention (head split via BlockSpec) -----------------------------

def _attention_kernel(mask_ref, q_ref, k_ref, v_ref, o_ref, *, heads_per_block, head_dim):
    mask = mask_ref[...].astype(jnp.float32)                  # [1, S] additive mask
    ctxs = []
    for h in range(heads_per_block):                          # tiny unrolled loop over heads
        lo, hi = h * head_dim, (h + 1) * head_dim
        q = q_ref[:, lo:hi]                                   # [S, D] bf16 (already * 1/sqrt(D))
        k = k_ref[:, lo:hi]
        v = v_ref[:, lo:hi]
        # QK^T without materializing a transpose: contract D of both operands on the MXU.
        s = lax.dot_general(q, k, dimension_numbers=(((1,), (1,)), ((), ())),
                            preferred_element_type=jnp.float32)        # [S, S] f32
        s = s + mask                                          # broadcast over query rows
        s = s - jnp.max(s, axis=-1, keepdims=True)
        p = jnp.exp(s)
        p = p * pl.reciprocal(jnp.sum(p, axis=-1, keepdims=True), approx=True)  # EUP, not VALU
        ctxs.append(jnp.dot(p.astype(v.dtype), v, preferred_element_type=jnp.float32))
    ctx = ctxs[0] if heads_per_block == 1 else jnp.concatenate(ctxs, axis=-1)
    o_ref[...] = ctx.astype(o_ref.dtype)                      # full lane-dense block store


def attention(q2d, k2d, v2d, addmask, *, batch, seq, num_heads, head_dim):
    """q2d/k2d/v2d: [B*S, H] slabs (q pre-scaled); addmask: [B, 1, S]. Returns ctx [B*S, H].

    Head split/merge happens entirely through the BlockSpec index_map: each grid step
    (b, g) sees the lane-dense (S, heads_per_block*D) column slice of the slab and writes
    its context straight back into the [B*S, H] output — no XLA transposes, no [S, D<128]
    masked writebacks to HBM.
    """
    M, H = q2d.shape
    hg = _pick_head_group(num_heads, head_dim)    # >=2 heads/step when D < 128
    n_groups = num_heads // hg
    blk = hg * head_dim
    qkv_spec = pl.BlockSpec((seq, blk), lambda b, g: (b, g))
    return pl.pallas_call(
        functools.partial(_attention_kernel, heads_per_block=hg, head_dim=head_dim),
        out_shape=jax.ShapeDtypeStruct((M, H), q2d.dtype),
        grid=(batch, n_groups),
        in_specs=[
            pl.BlockSpec((None, 1, seq), lambda b, g: (b, 0, 0)),
            qkv_spec, qkv_spec, qkv_spec,
        ],
        out_specs=qkv_spec,
        compiler_params=pltpu.CompilerParams(
            dimension_semantics=("parallel", "parallel"),   # B x head-groups shard across TCs
            vmem_limit_bytes=VMEM_LIMIT),
    )(addmask, q2d, k2d, v2d)


# ----------------------------- ALBERT model (glue) -----------------------------

def init_params(key, cfg, dtype=jnp.bfloat16):
    V = cfg["vocab_size"]; E = cfg["embedding_size"]; H = cfg["hidden_size"]
    I = cfg["intermediate_size"]; P = cfg["max_position_embeddings"]; T = cfg["type_vocab_size"]
    keys = iter(jax.random.split(key, 32))

    def nrm(shape):
        return (0.02 * jax.random.normal(next(keys), shape, jnp.float32)).astype(dtype)

    params = {
        "word_emb": nrm((V, E)),
        "pos_emb": nrm((P, E)),
        "type_emb": nrm((T, E)),
        "emb_ln_g": jnp.ones((E,), jnp.float32),
        "emb_ln_b": jnp.zeros((E,), jnp.float32),
        "emb_map_w": nrm((E, H)),
        "emb_map_b": jnp.zeros((H,), jnp.float32),
        # ALBERT shares one transformer layer's parameters across all layers.
        "layer": {
            "q_w": nrm((H, H)), "q_b": jnp.zeros((H,), jnp.float32),
            "k_w": nrm((H, H)), "k_b": jnp.zeros((H,), jnp.float32),
            "v_w": nrm((H, H)), "v_b": jnp.zeros((H,), jnp.float32),
            "o_w": nrm((H, H)), "o_b": jnp.zeros((H,), jnp.float32),
            "attn_ln_g": jnp.ones((H,), jnp.float32),
            "attn_ln_b": jnp.zeros((H,), jnp.float32),
            "ffn_w": nrm((H, I)), "ffn_b": jnp.zeros((I,), jnp.float32),
            "ffn_o_w": nrm((I, H)), "ffn_o_b": jnp.zeros((H,), jnp.float32),
            "ffn_ln_g": jnp.ones((H,), jnp.float32),
            "ffn_ln_b": jnp.zeros((H,), jnp.float32),
        },
        "pool_w": nrm((H, H)),
        "pool_b": jnp.zeros((H,), jnp.float32),
    }
    return params


def encoder_forward(params, sentences_tokens, attention_mask, segment_embedding, *, cfg):
    """
    sentences_tokens:  [B, S] int32
    attention_mask:    [B, S] (1 = keep, 0 = pad)
    segment_embedding: [B, S] int32 (token_type_ids)
    returns: (last_hidden_state [B, S, H], pooler_output [B, H])
    """
    B, S = sentences_tokens.shape
    E = cfg["embedding_size"]; H = cfg["hidden_size"]
    NH = cfg["num_attention_heads"]; D = H // NH
    scale = 1.0 / math.sqrt(D)

    # --- embeddings (gathers in plain JAX — no clean Pallas equivalent; sum in f32) ---
    pos_ids = jnp.arange(S, dtype=jnp.int32)[None, :]
    emb = (params["word_emb"][sentences_tokens].astype(jnp.float32)
           + params["pos_emb"][pos_ids].astype(jnp.float32)
           + params["type_emb"][segment_embedding].astype(jnp.float32))   # [B, S, E] f32
    emb2d = layernorm(emb.reshape(B * S, E), params["emb_ln_g"], params["emb_ln_b"],
                      out_dtype=jnp.bfloat16)
    h = linear(emb2d, params["emb_map_w"], params["emb_map_b"])            # [B*S, H] bf16

    # HF-style extended attention mask: 0 for keep, large negative for masked.
    addmask = ((1.0 - attention_mask.astype(jnp.float32)) * -1e9).reshape(B, 1, S)

    lp = params["layer"]

    def layer_fn(_, h):
        # self-attention: fused QKV (h streamed once), head split handled by the attention
        # kernel's BlockSpecs — no reshape/transpose round trips through HBM.
        q2d, k2d, v2d = qkv_projection(h, lp["q_w"], lp["k_w"], lp["v_w"],
                                       lp["q_b"], lp["k_b"], lp["v_b"], scale)
        ctx2d = attention(q2d, k2d, v2d, addmask,
                          batch=B, seq=S, num_heads=NH, head_dim=D)        # [B*S, H]
        # output projection + residual + LayerNorm fused (no intermediate HBM tensor)
        h = linear_residual_layernorm(ctx2d, lp["o_w"], lp["o_b"], h,
                                      lp["attn_ln_g"], lp["attn_ln_b"])
        # feed-forward
        ffn = linear(h, lp["ffn_w"], lp["ffn_b"], activation="gelu")
        h = linear_residual_layernorm(ffn, lp["ffn_o_w"], lp["ffn_o_b"], h,
                                      lp["ffn_ln_g"], lp["ffn_ln_b"])
        return h

    # parameter-shared ALBERT layers: single-layer HLO body, weights identical every step.
    h = lax.fori_loop(0, cfg["num_hidden_layers"], layer_fn, h)

    last_hidden_state = h.reshape(B, S, H)

    # pooler: dense + tanh on the [CLS] token. M = B rows massively under-fills the MXU,
    # so this tiny GEMM stays in plain XLA instead of paying pallas_call overhead.
    cls = last_hidden_state[:, 0, :].astype(jnp.float32)                   # [B, H]
    pooler_output = jnp.tanh(jnp.dot(cls, params["pool_w"].astype(jnp.float32))
                             + params["pool_b"]).astype(h.dtype)

    return last_hidden_state, pooler_output


# ----------------------------- main -----------------------------

if __name__ == "__main__":
    cfg = dict(
        vocab_size=64,
        embedding_size=16,
        hidden_size=32,
        num_attention_heads=4,
        intermediate_size=64,
        num_hidden_layers=2,
        max_position_embeddings=16,
        type_vocab_size=2,
    )

    key = jax.random.PRNGKey(0)
    pkey, tkey = jax.random.split(key)
    params = init_params(pkey, cfg)

    B, S = 2, 8
    sentences_tokens = jax.random.randint(tkey, (B, S), 0, cfg["vocab_size"], dtype=jnp.int32)
    attention_mask = jnp.ones((B, S), jnp.int32).at[1, 6:].set(0)         # pad last 2 of batch 1
    segment_embedding = jnp.zeros((B, S), jnp.int32).at[:, 4:].set(1)     # two segments

    fwd = jax.jit(functools.partial(encoder_forward, cfg=cfg))
    last_hidden_state, pooler_output = fwd(params, sentences_tokens,
                                           attention_mask, segment_embedding)
    jax.block_until_ready((last_hidden_state, pooler_output))

    assert last_hidden_state.shape == (B, S, cfg["hidden_size"])
    assert pooler_output.shape == (B, cfg["hidden_size"])
    assert bool(jnp.all(jnp.isfinite(last_hidden_state.astype(jnp.float32))))
    assert bool(jnp.all(jnp.isfinite(pooler_output.astype(jnp.float32))))
    print("KERNEL_OK")
</pallas_src>

<mosaic_0001>
module attributes {stable_mosaic.version = 11 : i64} {
  func.func @_linear_kernel(%arg0: i32, %arg1: i32, %arg2: i32, %arg3: memref<16x16xbf16, #tpu.memory_space<vmem>>, %arg4: memref<16x32xbf16, #tpu.memory_space<vmem>>, %arg5: memref<1x32xf32, #tpu.memory_space<vmem>>, %arg6: memref<16x32xbf16, #tpu.memory_space<vmem>>, %arg7: memref<16x32xf32, #tpu.memory_space<vmem>>) attributes {dimension_semantics = [#tpu.dimension_semantics<parallel>, #tpu.dimension_semantics<parallel>, #tpu.dimension_semantics<arbitrary>], iteration_bounds = array<i64: 1, 1, 1>, scalar_prefetch = 0 : i64, scratch_operands = 1 : i64, tpu.core_type = #tpu.core_type<tc>, window_params = [{transform_indices = @transform_0, window_bounds = array<i64: 16, 16>}, {transform_indices = @transform_1, window_bounds = array<i64: 16, 32>}, {transform_indices = @transform_2, window_bounds = array<i64: 1, 32>}, {transform_indices = @transform_3, window_bounds = array<i64: 16, 32>}]} {
    %c0_i32 = arith.constant 0 : i32
    %0 = arith.cmpi eq, %arg2, %c0_i32 : i32
    %1 = arith.extui %0 : i1 to i32
    %c0_i32_0 = arith.constant 0 : i32
    %2 = arith.cmpi ne, %1, %c0_i32_0 : i32
    scf.if %2 {
      %cst_10 = arith.constant 0.000000e+00 : f32
      %12 = vector.broadcast %cst_10 : f32 to vector<16x32xf32>
      %c0_11 = arith.constant 0 : index
      %c0_12 = arith.constant 0 : index
      %13 = vector.load %arg7[%c0_11, %c0_12] : memref<16x32xf32, #tpu.memory_space<vmem>>, vector<16x32xf32>
      tpu.vector_store %arg7[%c0_11, %c0_12], %12 {strides = array<i32>} : memref<16x32xf32, #tpu.memory_space<vmem>>, vector<16x32xf32>,
    } else {
    }
    %c0 = arith.constant 0 : index
    %c0_1 = arith.constant 0 : index
    %3 = vector.load %arg7[%c0, %c0_1] : memref<16x32xf32, #tpu.memory_space<vmem>>, vector<16x32xf32>
    %c0_2 = arith.constant 0 : index
    %c0_3 = arith.constant 0 : index
    %4 = vector.load %arg3[%c0_2, %c0_3] : memref<16x16xbf16, #tpu.memory_space<vmem>>, vector<16x16xbf16>
    %c0_4 = arith.constant 0 : index
    %c0_5 = arith.constant 0 : index
    %5 = vector.load %arg4[%c0_4, %c0_5] : memref<16x32xbf16, #tpu.memory_space<vmem>>, vector<16x32xbf16>
    %cst = arith.constant dense<0.000000e+00> : vector<16x32xf32>
    %6 = tpu.matmul %4, %5, %cst {dimension_numbers = #tpu.dot_dimension_numbers<[1], [0], [0], [1], [0, 0, 1, 1], [], []>} : vector<16x16xbf16>, vector<16x32xbf16>, vector<16x32xf32> -> vector<16x32xf32>
    %7 = arith.addf %3, %6 : vector<16x32xf32>
    %c0_6 = arith.constant 0 : index
    %c0_7 = arith.constant 0 : index
    %8 = vector.load %arg7[%c0_6, %c0_7] : memref<16x32xf32, #tpu.memory_space<vmem>>, vector<16x32xf32>
    tpu.vector_store %arg7[%c0_6, %c0_7], %7 {strides = array<i32>} : memref<16x32xf32, #tpu.memory_space<vmem>>, vector<16x32xf32>,
    %c0_i32_8 = arith.constant 0 : i32
    %9 = arith.cmpi eq, %arg2, %c0_i32_8 : i32
    %10 = arith.extui %9 : i1 to i32
    %c0_i32_9 = arith.constant 0 : i32
    %11 = arith.cmpi ne, %10, %c0_i32_9 : i32
    scf.if %11 {
      %c0_10 = arith.constant 0 : index
      %c0_11 = arith.constant 0 : index
      %12 = vector.load %arg7[%c0_10, %c0_11] : memref<16x32xf32, #tpu.memory_space<vmem>>, vector<16x32xf32>
      %c0_12 = arith.constant 0 : index
      %c0_13 = arith.constant 0 : index
      %13 = vector.load %arg5[%c0_12, %c0_13] : memref<1x32xf32, #tpu.memory_space<vmem>>, vector<1x32xf32>
      %14 = vector.broadcast %13 : vector<1x32xf32> to vector<16x32xf32>
      %15 = arith.addf %12, %14 : vector<16x32xf32>
      %16 = arith.truncf %15 : vector<16x32xf32> to vector<16x32xbf16>
      %c0_14 = arith.constant 0 : index
      %c0_15 = arith.constant 0 : index
      %17 = vector.load %arg6[%c0_14, %c0_15] : memref<16x32xbf16, #tpu.memory_space<vmem>>, vector<16x32xbf16>
      tpu.vector_store %arg6[%c0_14, %c0_15], %16 {strides = array<i32>} : memref<16x32xbf16, #tpu.memory_space<vmem>>, vector<16x32xbf16>,
    } else {
    }
    return
  }
  func.func @transform_0(%arg0: i32, %arg1: i32, %arg2: i32) -> (i32, i32) {
    %c0_i32 = arith.constant 0 : i32
    return %arg0, %arg2 : i32, i32
  }
  func.func @transform_1(%arg0: i32, %arg1: i32, %arg2: i32) -> (i32, i32) {
    %c0_i32 = arith.constant 0 : i32
    return %arg2, %arg1 : i32, i32
  }
  func.func @transform_2(%arg0: i32, %arg1: i32, %arg2: i32) -> (i32, i32) {
    %c0_i32 = arith.constant 0 : i32
    %c0_i32_0 = arith.constant 0 : i32
    return %c0_i32, %arg1 : i32, i32
  }
  func.func @transform_3(%arg0: i32, %arg1: i32, %arg2: i32) -> (i32, i32) {
    %c0_i32 = arith.constant 0 : i32
    return %arg0, %arg1 : i32, i32
  }
}

module attributes {stable_mosaic.version = 11 : i64} {
  func.func @_layernorm_kernel(%arg0: i32, %arg1: memref<16x16xf32, #tpu.memory_space<vmem>>, %arg2: memref<1x16xf32, #tpu.memory_space<vmem>>, %arg3: memref<1x16xf32, #tpu.memory_space<vmem>>, %arg4: memref<16x16xbf16, #tpu.memory_space<vmem>>) attributes {dimension_semantics = [#tpu.dimension_semantics<parallel>], iteration_bounds = array<i64: 1>, scalar_prefetch = 0 : i64, scratch_operands = 0 : i64, tpu.core_type = #tpu.core_type<tc>, window_params = [{transform_indices = @transform_0, window_bounds = array<i64: 16, 16>}, {pipeline_mode = #tpu.pipeline_mode<synchronous>, transform_indices = @transform_1, window_bounds = array<i64: 1, 16>}, {pipeline_mode = #tpu.pipeline_mode<synchronous>, transform_indices = @transform_2, window_bounds = array<i64: 1, 16>}, {transform_indices = @transform_3, window_bounds = array<i64: 16, 16>}]} {
    %c0 = arith.constant 0 : index
    %c0_0 = arith.constant 0 : index
    %0 = vector.load %arg1[%c0, %c0_0] : memref<16x16xf32, #tpu.memory_space<vmem>>, vector<16x16xf32>
    %cst = arith.constant dense<0.000000e+00> : vector<16xf32>
    %1 = vector.multi_reduction <add>, %0, %cst [1] : vector<16x16xf32> to vector<16xf32>
    %2 = vector.shape_cast %1 : vector<16xf32> to vector<16x1xf32>
    %cst_1 = arith.constant 1.600000e+01 : f32
    %3 = vector.broadcast %cst_1 : f32 to vector<16x1xf32>
    %4 = arith.divf %2, %3 : vector<16x1xf32>
    %5 = vector.broadcast %4 : vector<16x1xf32> to vector<16x16xf32>
    %6 = arith.subf %0, %5 : vector<16x16xf32>
    %7 = arith.mulf %6, %6 : vector<16x16xf32>
    %cst_2 = arith.constant dense<0.000000e+00> : vector<16xf32>
    %8 = vector.multi_reduction <add>, %7, %cst_2 [1] : vector<16x16xf32> to vector<16xf32>
    %9 = vector.shape_cast %8 : vector<16xf32> to vector<16x1xf32>
    %cst_3 = arith.constant 1.600000e+01 : f32
    %10 = vector.broadcast %cst_3 : f32 to vector<16x1xf32>
    %11 = arith.divf %9, %10 : vector<16x1xf32>
    %cst_4 = arith.constant 9.99999996E-13 : f32
    %12 = vector.broadcast %cst_4 : f32 to vector<16x1xf32>
    %13 = arith.addf %11, %12 : vector<16x1xf32>
    %14 = math.rsqrt %13 : vector<16x1xf32>
    %15 = vector.broadcast %14 : vector<16x1xf32> to vector<16x16xf32>
    %16 = arith.mulf %6, %15 : vector<16x16xf32>
    %c0_5 = arith.constant 0 : index
    %c0_6 = arith.constant 0 : index
    %17 = vector.load %arg2[%c0_5, %c0_6] : memref<1x16xf32, #tpu.memory_space<vmem>>, vector<1x16xf32>
    %18 = vector.broadcast %17 : vector<1x16xf32> to vector<16x16xf32>
    %19 = arith.mulf %16, %18 : vector<16x16xf32>
    %c0_7 = arith.constant 0 : index
    %c0_8 = arith.constant 0 : index
    %20 = vector.load %arg3[%c0_7, %c0_8] : memref<1x16xf32, #tpu.memory_space<vmem>>, vector<1x16xf32>
    %21 = vector.broadcast %20 : vector<1x16xf32> to vector<16x16xf32>
    %22 = arith.addf %19, %21 : vector<16x16xf32>
    %23 = arith.truncf %22 : vector<16x16xf32> to vector<16x16xbf16>
    %c0_9 = arith.constant 0 : index
    %c0_10 = arith.constant 0 : index
    %24 = vector.load %arg4[%c0_9, %c0_10] : memref<16x16xbf16, #tpu.memory_space<vmem>>, vector<16x16xbf16>
    tpu.vector_store %arg4[%c0_9, %c0_10], %23 {strides = array<i32>} : memref<16x16xbf16, #tpu.memory_space<vmem>>, vector<16x16xbf16>,
    return
  }
  func.func @transform_0(%arg0: i32) -> (i32, i32) {
    %c0_i32 = arith.constant 0 : i32
    %c0_i32_0 = arith.constant 0 : i32
    return %arg0, %c0_i32 : i32, i32
  }
  func.func @transform_1(%arg0: i32) -> (i32, i32) {
    %c0_i32 = arith.constant 0 : i32
    %c0_i32_0 = arith.constant 0 : i32
    %c0_i32_1 = arith.constant 0 : i32
    return %c0_i32, %c0_i32_0 : i32, i32
  }
  func.func @transform_2(%arg0: i32) -> (i32, i32) {
    %c0_i32 = arith.constant 0 : i32
    %c0_i32_0 = arith.constant 0 : i32
    %c0_i32_1 = arith.constant 0 : i32
    return %c0_i32, %c0_i32_0 : i32, i32
  }
  func.func @transform_3(%arg0: i32) -> (i32, i32) {
    %c0_i32 = arith.constant 0 : i32
    %c0_i32_0 = arith.constant 0 : i32
    return %arg0, %c0_i32 : i32, i32
  }
}

module attributes {stable_mosaic.version = 11 : i64} {
  func.func @_qkv_kernel(%arg0: i32, %arg1: i32, %arg2: memref<16x32xbf16, #tpu.memory_space<vmem>>, %arg3: memref<32x32xbf16, #tpu.memory_space<vmem>>, %arg4: memref<32x32xbf16, #tpu.memory_space<vmem>>, %arg5: memref<32x32xbf16, #tpu.memory_space<vmem>>, %arg6: memref<3x32xf32, #tpu.memory_space<vmem>>, %arg7: memref<16x32xbf16, #tpu.memory_space<vmem>>, %arg8: memref<16x32xbf16, #tpu.memory_space<vmem>>, %arg9: memref<16x32xbf16, #tpu.memory_space<vmem>>, %arg10: memref<16x32xf32, #tpu.memory_space<vmem>>, %arg11: memref<16x32xf32, #tpu.memory_space<vmem>>, %arg12: memref<16x32xf32, #tpu.memory_space<vmem>>) attributes {dimension_semantics = [#tpu.dimension_semantics<parallel>, #tpu.dimension_semantics<arbitrary>], iteration_bounds = array<i64: 1, 1>, scalar_prefetch = 0 : i64, scratch_operands = 3 : i64, tpu.core_type = #tpu.core_type<tc>, window_params = [{transform_indices = @transform_0, window_bounds = array<i64: 16, 32>}, {transform_indices = @transform_1, window_bounds = array<i64: 32, 32>}, {transform_indices = @transform_2, window_bounds = array<i64: 32, 32>}, {transform_indices = @transform_3, window_bounds = array<i64: 32, 32>}, {pipeline_mode = #tpu.pipeline_mode<synchronous>, transform_indices = @transform_4, window_bounds = array<i64: 3, 32>}, {transform_indices = @transform_5, window_bounds = array<i64: 16, 32>}, {transform_indices = @transform_6, window_bounds = array<i64: 16, 32>}, {transform_indices = @transform_7, window_bounds = array<i64: 16, 32>}]} {
    %c0_i32 = arith.constant 0 : i32
    %0 = arith.cmpi eq, %arg1, %c0_i32 : i32
    %1 = arith.extui %0 : i1 to i32
    %c0_i32_0 = arith.constant 0 : i32
    %2 = arith.cmpi ne, %1, %c0_i32_0 : i32
    scf.if %2 {
      %cst_24 = arith.constant 0.000000e+00 : f32
      %22 = vector.broadcast %cst_24 : f32 to vector<16x32xf32>
      %c0_25 = arith.constant 0 : index
      %c0_26 = arith.constant 0 : index
      %23 = vector.load %arg10[%c0_25, %c0_26] : memref<16x32xf32, #tpu.memory_space<vmem>>, vector<16x32xf32>
      tpu.vector_store %arg10[%c0_25, %c0_26], %22 {strides = array<i32>} : memref<16x32xf32, #tpu.memory_space<vmem>>, vector<16x32xf32>,
      %cst_27 = arith.constant 0.000000e+00 : f32
      %24 = vector.broadcast %cst_27 : f32 to vector<16x32xf32>
      %c0_28 = arith.constant 0 : index
      %c0_29 = arith.constant 0 : index
      %25 = vector.load %arg11[%c0_28, %c0_29] : memref<16x32xf32, #tpu.memory_space<vmem>>, vector<16x32xf32>
      tpu.vector_store %arg11[%c0_28, %c0_29], %24 {strides = array<i32>} : memref<16x32xf32, #tpu.memory_space<vmem>>, vector<16x32xf32>,
      %cst_30 = arith.constant 0.000000e+00 : f32
      %26 = vector.broadcast %cst_30 : f32 to vector<16x32xf32>
      %c0_31 = arith.constant 0 : index
      %c0_32 = arith.constant 0 : index
      %27 = vector.load %arg12[%c0_31, %c0_32] : memref<16x32xf32, #tpu.memory_space<vmem>>, vector<16x32xf32>
      tpu.vector_store %arg12[%c0_31, %c0_32], %26 {strides = array<i32>} : memref<16x32xf32, #tpu.memory_space<vmem>>, vector<16x32xf32>,
    } else {
    }
    %c0 = arith.constant 0 : index
    %c0_1 = arith.constant 0 : index
    %3 = vector.load %arg2[%c0, %c0_1] : memref<16x32xbf16, #tpu.memory_space<vmem>>, vector<16x32xbf16>
    %c0_2 = arith.constant 0 : index
    %c0_3 = arith.constant 0 : index
    %4 = vector.load %arg10[%c0_2, %c0_3] : memref<16x32xf32, #tpu.memory_space<vmem>>, vector<16x32xf32>
    %c0_4 = arith.constant 0 : index
    %c0_5 = arith.constant 0 : index
    %5 = vector.load %arg3[%c0_4, %c0_5] : memref<32x32xbf16, #tpu.memory_space<vmem>>, vector<32x32xbf16>
    %cst = arith.constant dense<0.000000e+00> : vector<16x32xf32>
    %6 = tpu.matmul %3, %5, %cst {dimension_numbers = #tpu.dot_dimension_numbers<[1], [0], [0], [1], [0, 0, 1, 1], [], []>} : vector<16x32xbf16>, vector<32x32xbf16>, vector<16x32xf32> -> vector<16x32xf32>
    %7 = arith.addf %4, %6 : vector<16x32xf32>
    %c0_6 = arith.constant 0 : index
    %c0_7 = arith.constant 0 : index
    %8 = vector.load %arg10[%c0_6, %c0_7] : memref<16x32xf32, #tpu.memory_space<vmem>>, vector<16x32xf32>
    tpu.vector_store %arg10[%c0_6, %c0_7], %7 {strides = array<i32>} : memref<16x32xf32, #tpu.memory_space<vmem>>, vector<16x32xf32>,
    %c0_8 = arith.constant 0 : index
    %c0_9 = arith.constant 0 : index
    %9 = vector.load %arg11[%c0_8, %c0_9] : memref<16x32xf32, #tpu.memory_space<vmem>>, vector<16x32xf32>
    %c0_10 = arith.constant 0 : index
    %c0_11 = arith.constant 0 : index
    %10 = vector.load %arg4[%c0_10, %c0_11] : memref<32x32xbf16, #tpu.memory_space<vmem>>, vector<32x32xbf16>
    %cst_12 = arith.constant dense<0.000000e+00> : vector<16x32xf32>
    %11 = tpu.matmul %3, %10, %cst_12 {dimension_numbers = #tpu.dot_dimension_numbers<[1], [0], [0], [1], [0, 0, 1, 1], [], []>} : vector<16x32xbf16>, vector<32x32xbf16>, vector<16x32xf32> -> vector<16x32xf32>
    %12 = arith.addf %9, %11 : vector<16x32xf32>
    %c0_13 = arith.constant 0 : index
    %c0_14 = arith.constant 0 : index
    %13 = vector.load %arg11[%c0_13, %c0_14] : memref<16x32xf32, #tpu.memory_space<vmem>>, vector<16x32xf32>
    tpu.vector_store %arg11[%c0_13, %c0_14], %12 {strides = array<i32>} : memref<16x32xf32, #tpu.memory_space<vmem>>, vector<16x32xf32>,
    %c0_15 = arith.constant 0 : index
    %c0_16 = arith.constant 0 : index
    %14 = vector.load %arg12[%c0_15, %c0_16] : memref<16x32xf32, #tpu.memory_space<vmem>>, vector<16x32xf32>
    %c0_17 = arith.constant 0 : index
    %c0_18 = arith.constant 0 : index
    %15 = vector.load %arg5[%c0_17, %c0_18] : memref<32x32xbf16, #tpu.memory_space<vmem>>, vector<32x32xbf16>
    %cst_19 = arith.constant dense<0.000000e+00> : vector<16x32xf32>
    %16 = tpu.matmul %3, %15, %cst_19 {dimension_numbers = #tpu.dot_dimension_numbers<[1], [0], [0], [1], [0, 0, 1, 1], [], []>} : vector<16x32xbf16>, vector<32x32xbf16>, vector<16x32xf32> -> vector<16x32xf32>
    %17 = arith.addf %14, %16 : vector<16x32xf32>
    %c0_20 = arith.constant 0 : index
    %c0_21 = arith.constant 0 : index
    %18 = vector.load %arg12[%c0_20, %c0_21] : memref<16x32xf32, #tpu.memory_space<vmem>>, vector<16x32xf32>
    tpu.vector_store %arg12[%c0_20, %c0_21], %17 {strides = array<i32>} : memref<16x32xf32, #tpu.memory_space<vmem>>, vector<16x32xf32>,
    %c0_i32_22 = arith.constant 0 : i32
    %19 = arith.cmpi eq, %arg1, %c0_i32_22 : i32
    %20 = arith.extui %19 : i1 to i32
    %c0_i32_23 = arith.constant 0 : i32
    %21 = arith.cmpi ne, %20, %c0_i32_23 : i32
    scf.if %21 {
      %c0_24 = arith.constant 0 : index
      %c0_25 = arith.constant 0 : index
      %22 = vector.load %arg10[%c0_24, %c0_25] : memref<16x32xf32, #tpu.memory_space<vmem>>, vector<16x32xf32>
      %c0_26 = arith.constant 0 : index
      %c0_27 = arith.constant 0 : index
      %23 = vector.load %arg6[%c0_26, %c0_27] : memref<3x32xf32, #tpu.memory_space<vmem>>, vector<1x32xf32>
      %24 = vector.broadcast %23 : vector<1x32xf32> to vector<16x32xf32>
      %25 = arith.addf %22, %24 : vector<16x32xf32>
      %cst_28 = arith.constant 0.353553385 : f32
      %26 = vector.broadcast %cst_28 : f32 to vector<16x32xf32>
      %27 = arith.mulf %25, %26 : vector<16x32xf32>
      %28 = arith.truncf %27 : vector<16x32xf32> to vector<16x32xbf16>
      %c0_29 = arith.constant 0 : index
      %c0_30 = arith.constant 0 : index
      %29 = vector.load %arg7[%c0_29, %c0_30] : memref<16x32xbf16, #tpu.memory_space<vmem>>, vector<16x32xbf16>
      tpu.vector_store %arg7[%c0_29, %c0_30], %28 {strides = array<i32>} : memref<16x32xbf16, #tpu.memory_space<vmem>>, vector<16x32xbf16>,
      %c0_31 = arith.constant 0 : index
      %c0_32 = arith.constant 0 : index
      %30 = vector.load %arg11[%c0_31, %c0_32] : memref<16x32xf32, #tpu.memory_space<vmem>>, vector<16x32xf32>
      %c1 = arith.constant 1 : index
      %c0_33 = arith.constant 0 : index
      %31 = vector.load %arg6[%c1, %c0_33] : memref<3x32xf32, #tpu.memory_space<vmem>>, vector<1x32xf32>
      %32 = vector.broadcast %31 : vector<1x32xf32> to vector<16x32xf32>
      %33 = arith.addf %30, %32 : vector<16x32xf32>
      %34 = arith.truncf %33 : vector<16x32xf32> to vector<16x32xbf16>
      %c0_34 = arith.constant 0 : index
      %c0_35 = arith.constant 0 : index
      %35 = vector.load %arg8[%c0_34, %c0_35] : memref<16x32xbf16, #tpu.memory_space<vmem>>, vector<16x32xbf16>
      tpu.vector_store %arg8[%c0_34, %c0_35], %34 {strides = array<i32>} : memref<16x32xbf16, #tpu.memory_space<vmem>>, vector<16x32xbf16>,
      %c0_36 = arith.constant 0 : index
      %c0_37 = arith.constant 0 : index
      %36 = vector.load %arg12[%c0_36, %c0_37] : memref<16x32xf32, #tpu.memory_space<vmem>>, vector<16x32xf32>
      %c2 = arith.constant 2 : index
      %c0_38 = arith.constant 0 : index
      %37 = vector.load %arg6[%c2, %c0_38] : memref<3x32xf32, #tpu.memory_space<vmem>>, vector<1x32xf32>
      %38 = vector.broadcast %37 : vector<1x32xf32> to vector<16x32xf32>
      %39 = arith.addf %36, %38 : vector<16x32xf32>
      %40 = arith.truncf %39 : vector<16x32xf32> to vector<16x32xbf16>
      %c0_39 = arith.constant 0 : index
      %c0_40 = arith.constant 0 : index
      %41 = vector.load %arg9[%c0_39, %c0_40] : memref<16x32xbf16, #tpu.memory_space<vmem>>, vector<16x32xbf16>
      tpu.vector_store %arg9[%c0_39, %c0_40], %40 {strides = array<i32>} : memref<16x32xbf16, #tpu.memory_space<vmem>>, vector<16x32xbf16>,
    } else {
    }
    return
  }
  func.func @transform_0(%arg0: i32, %arg1: i32) -> (i32, i32) {
    %c0_i32 = arith.constant 0 : i32
    return %arg0, %arg1 : i32, i32
  }
  func.func @transform_1(%arg0: i32, %arg1: i32) -> (i32, i32) {
    %c0_i32 = arith.constant 0 : i32
    %c0_i32_0 = arith.constant 0 : i32
    return %arg1, %c0_i32 : i32, i32
  }
  func.func @transform_2(%arg0: i32, %arg1: i32) -> (i32, i32) {
    %c0_i32 = arith.constant 0 : i32
    %c0_i32_0 = arith.constant 0 : i32
    return %arg1, %c0_i32 : i32, i32
  }
  func.func @transform_3(%arg0: i32, %arg1: i32) -> (i32, i32) {
    %c0_i32 = arith.constant 0 : i32
    %c0_i32_0 = arith.constant 0 : i32
    return %arg1, %c0_i32 : i32, i32
  }
  func.func @transform_4(%arg0: i32, %arg1: i32) -> (i32, i32) {
    %c0_i32 = arith.constant 0 : i32
    %c0_i32_0 = arith.constant 0 : i32
    %c0_i32_1 = arith.constant 0 : i32
    return %c0_i32, %c0_i32_0 : i32, i32
  }
  func.func @transform_5(%arg0: i32, %arg1: i32) -> (i32, i32) {
    %c0_i32 = arith.constant 0 : i32
    %c0_i32_0 = arith.constant 0 : i32
    return %arg0, %c0_i32 : i32, i32
  }
  func.func @transform_6(%arg0: i32, %arg1: i32) -> (i32, i32) {
    %c0_i32 = arith.constant 0 : i32
    %c0_i32_0 = arith.constant 0 : i32
    return %arg0, %c0_i32 : i32, i32
  }
  func.func @transform_7(%arg0: i32, %arg1: i32) -> (i32, i32) {
    %c0_i32 = arith.constant 0 : i32
    %c0_i32_0 = arith.constant 0 : i32
    return %arg0, %c0_i32 : i32, i32
  }
}

module attributes {stable_mosaic.version = 11 : i64} {
  func.func @_attention_kernel(%arg0: i32, %arg1: i32, %arg2: memref<1x1x8xf32, #tpu.memory_space<vmem>>, %arg3: memref<8x32xbf16, #tpu.memory_space<vmem>>, %arg4: memref<8x32xbf16, #tpu.memory_space<vmem>>, %arg5: memref<8x32xbf16, #tpu.memory_space<vmem>>, %arg6: memref<8x32xbf16, #tpu.memory_space<vmem>>) attributes {dimension_semantics = [#tpu.dimension_semantics<parallel>, #tpu.dimension_semantics<parallel>], iteration_bounds = array<i64: 2, 1>, scalar_prefetch = 0 : i64, scratch_operands = 0 : i64, tpu.core_type = #tpu.core_type<tc>, window_params = [{transform_indices = @transform_0, window_bounds = array<i64: 1, 1, 8>}, {transform_indices = @transform_1, window_bounds = array<i64: 8, 32>}, {transform_indices = @transform_2, window_bounds = array<i64: 8, 32>}, {transform_indices = @transform_3, window_bounds = array<i64: 8, 32>}, {transform_indices = @transform_4, window_bounds = array<i64: 8, 32>}]} {
    %c0 = arith.constant 0 : index
    %c0_0 = arith.constant 0 : index
    %c0_1 = arith.constant 0 : index
    %0 = vector.load %arg2[%c0, %c0_0, %c0_1] : memref<1x1x8xf32, #tpu.memory_space<vmem>>, vector<1x1x8xf32>
    %1 = vector.shape_cast %0 : vector<1x1x8xf32> to vector<1x8xf32>
    %c0_2 = arith.constant 0 : index
    %c0_3 = arith.constant 0 : index
    %2 = vector.load %arg3[%c0_2, %c0_3] : memref<8x32xbf16, #tpu.memory_space<vmem>>, vector<8x8xbf16>
    %c0_4 = arith.constant 0 : index
    %c0_5 = arith.constant 0 : index
    %3 = vector.load %arg4[%c0_4, %c0_5] : memref<8x32xbf16, #tpu.memory_space<vmem>>, vector<8x8xbf16>
    %c0_6 = arith.constant 0 : index
    %c0_7 = arith.constant 0 : index
    %4 = vector.load %arg5[%c0_6, %c0_7] : memref<8x32xbf16, #tpu.memory_space<vmem>>, vector<8x8xbf16>
    %cst = arith.constant dense<0.000000e+00> : vector<8x8xf32>
    %5 = tpu.matmul %2, %3, %cst {dimension_numbers = #tpu.dot_dimension_numbers<[1], [1], [0], [0], [0, 0, 1, 0], [], []>} : vector<8x8xbf16>, vector<8x8xbf16>, vector<8x8xf32> -> vector<8x8xf32>
    %6 = vector.broadcast %1 : vector<1x8xf32> to vector<8x8xf32>
    %7 = arith.addf %5, %6 : vector<8x8xf32>
    %cst_8 = arith.constant dense<0xFF800000> : vector<8xf32>
    %8 = vector.multi_reduction <maximumf>, %7, %cst_8 [1] : vector<8x8xf32> to vector<8xf32>
    %9 = vector.shape_cast %8 : vector<8xf32> to vector<8x1xf32>
    %10 = vector.broadcast %9 : vector<8x1xf32> to vector<8x8xf32>
    %11 = arith.subf %7, %10 : vector<8x8xf32>
    %12 = math.exp %11 : vector<8x8xf32>
    %cst_9 = arith.constant dense<0.000000e+00> : vector<8xf32>
    %13 = vector.multi_reduction <add>, %12, %cst_9 [1] : vector<8x8xf32> to vector<8xf32>
    %14 = vector.shape_cast %13 : vector<8xf32> to vector<8x1xf32>
    %15 = tpu.reciprocal %14 {approx = true} : vector<8x1xf32> -> vector<8x1xf32>
    %16 = vector.broadcast %15 : vector<8x1xf32> to vector<8x8xf32>
    %17 = arith.mulf %12, %16 : vector<8x8xf32>
    %18 = arith.truncf %17 : vector<8x8xf32> to vector<8x8xbf16>
    %cst_10 = arith.constant dense<0.000000e+00> : vector<8x8xf32>
    %19 = tpu.matmul %18, %4, %cst_10 {dimension_numbers = #tpu.dot_dimension_numbers<[1], [0], [0], [1], [0, 0, 1, 1], [], []>} : vector<8x8xbf16>, vector<8x8xbf16>, vector<8x8xf32> -> vector<8x8xf32>
    %c0_11 = arith.constant 0 : index
    %c8 = arith.constant 8 : index
    %20 = vector.load %arg3[%c0_11, %c8] : memref<8x32xbf16, #tpu.memory_space<vmem>>, vector<8x8xbf16>
    %c0_12 = arith.constant 0 : index
    %c8_13 = arith.constant 8 : index
    %21 = vector.load %arg4[%c0_12, %c8_13] : memref<8x32xbf16, #tpu.memory_space<vmem>>, vector<8x8xbf16>
    %c0_14 = arith.constant 0 : index
    %c8_15 = arith.constant 8 : index
    %22 = vector.load %arg5[%c0_14, %c8_15] : memref<8x32xbf16, #tpu.memory_space<vmem>>, vector<8x8xbf16>
    %cst_16 = arith.constant dense<0.000000e+00> : vector<8x8xf32>
    %23 = tpu.matmul %20, %21, %cst_16 {dimension_numbers = #tpu.dot_dimension_numbers<[1], [1], [0], [0], [0, 0, 1, 0], [], []>} : vector<8x8xbf16>, vector<8x8xbf16>, vector<8x8xf32> -> vector<8x8xf32>
    %24 = vector.broadcast %1 : vector<1x8xf32> to vector<8x8xf32>
    %25 = arith.addf %23, %24 : vector<8x8xf32>
    %cst_17 = arith.constant dense<0xFF800000> : vector<8xf32>
    %26 = vector.multi_reduction <maximumf>, %25, %cst_17 [1] : vector<8x8xf32> to vector<8xf32>
    %27 = vector.shape_cast %26 : vector<8xf32> to vector<8x1xf32>
    %28 = vector.broadcast %27 : vector<8x1xf32> to vector<8x8xf32>
    %29 = arith.subf %25, %28 : vector<8x8xf32>
    %30 = math.exp %29 : vector<8x8xf32>
    %cst_18 = arith.constant dense<0.000000e+00> : vector<8xf32>
    %31 = vector.multi_reduction <add>, %30, %cst_18 [1] : vector<8x8xf32> to vector<8xf32>
    %32 = vector.shape_cast %31 : vector<8xf32> to vector<8x1xf32>
    %33 = tpu.reciprocal %32 {approx = true} : vector<8x1xf32> -> vector<8x1xf32>
    %34 = vector.broadcast %33 : vector<8x1xf32> to vector<8x8xf32>
    %35 = arith.mulf %30, %34 : vector<8x8xf32>
    %36 = arith.truncf %35 : vector<8x8xf32> to vector<8x8xbf16>
    %cst_19 = arith.constant dense<0.000000e+00> : vector<8x8xf32>
    %37 = tpu.matmul %36, %22, %cst_19 {dimension_numbers = #tpu.dot_dimension_numbers<[1], [0], [0], [1], [0, 0, 1, 1], [], []>} : vector<8x8xbf16>, vector<8x8xbf16>, vector<8x8xf32> -> vector<8x8xf32>
    %c0_20 = arith.constant 0 : index
    %c16 = arith.constant 16 : index
    %38 = vector.load %arg3[%c0_20, %c16] : memref<8x32xbf16, #tpu.memory_space<vmem>>, vector<8x8xbf16>
    %c0_21 = arith.constant 0 : index
    %c16_22 = arith.constant 16 : index
    %39 = vector.load %arg4[%c0_21, %c16_22] : memref<8x32xbf16, #tpu.memory_space<vmem>>, vector<8x8xbf16>
    %c0_23 = arith.constant 0 : index
    %c16_24 = arith.constant 16 : index
    %40 = vector.load %arg5[%c0_23, %c16_24] : memref<8x32xbf16, #tpu.memory_space<vmem>>, vector<8x8xbf16>
    %cst_25 = arith.constant dense<0.000000e+00> : vector<8x8xf32>
    %41 = tpu.matmul %38, %39, %cst_25 {dimension_numbers = #tpu.dot_dimension_numbers<[1], [1], [0], [0], [0, 0, 1, 0], [], []>} : vector<8x8xbf16>, vector<8x8xbf16>, vector<8x8xf32> -> vector<8x8xf32>
    %42 = vector.broadcast %1 : vector<1x8xf32> to vector<8x8xf32>
    %43 = arith.addf %41, %42 : vector<8x8xf32>
    %cst_26 = arith.constant dense<0xFF800000> : vector<8xf32>
    %44 = vector.multi_reduction <maximumf>, %43, %cst_26 [1] : vector<8x8xf32> to vector<8xf32>
    %45 = vector.shape_cast %44 : vector<8xf32> to vector<8x1xf32>
    %46 = vector.broadcast %45 : vector<8x1xf32> to vector<8x8xf32>
    %47 = arith.subf %43, %46 : vector<8x8xf32>
    %48 = math.exp %47 : vector<8x8xf32>
    %cst_27 = arith.constant dense<0.000000e+00> : vector<8xf32>
    %49 = vector.multi_reduction <add>, %48, %cst_27 [1] : vector<8x8xf32> to vector<8xf32>
    %50 = vector.shape_cast %49 : vector<8xf32> to vector<8x1xf32>
    %51 = tpu.reciprocal %50 {approx = true} : vector<8x1xf32> -> vector<8x1xf32>
    %52 = vector.broadcast %51 : vector<8x1xf32> to vector<8x8xf32>
    %53 = arith.mulf %48, %52 : vector<8x8xf32>
    %54 = arith.truncf %53 : vector<8x8xf32> to vector<8x8xbf16>
    %cst_28 = arith.constant dense<0.000000e+00> : vector<8x8xf32>
    %55 = tpu.matmul %54, %40, %cst_28 {dimension_numbers = #tpu.dot_dimension_numbers<[1], [0], [0], [1], [0, 0, 1, 1], [], []>} : vector<8x8xbf16>, vector<8x8xbf16>, vector<8x8xf32> -> vector<8x8xf32>
    %c0_29 = arith.constant 0 : index
    %c24 = arith.constant 24 : index
    %56 = vector.load %arg3[%c0_29, %c24] : memref<8x32xbf16, #tpu.memory_space<vmem>>, vector<8x8xbf16>
    %c0_30 = arith.constant 0 : index
    %c24_31 = arith.constant 24 : index
    %57 = vector.load %arg4[%c0_30, %c24_31] : memref<8x32xbf16, #tpu.memory_space<vmem>>, vector<8x8xbf16>
    %c0_32 = arith.constant 0 : index
    %c24_33 = arith.constant 24 : index
    %58 = vector.load %arg5[%c0_32, %c24_33] : memref<8x32xbf16, #tpu.memory_space<vmem>>, vector<8x8xbf16>
    %cst_34 = arith.constant dense<0.000000e+00> : vector<8x8xf32>
    %59 = tpu.matmul %56, %57, %cst_34 {dimension_numbers = #tpu.dot_dimension_numbers<[1], [1], [0], [0], [0, 0, 1, 0], [], []>} : vector<8x8xbf16>, vector<8x8xbf16>, vector<8x8xf32> -> vector<8x8xf32>
    %60 = vector.broadcast %1 : vector<1x8xf32> to vector<8x8xf32>
    %61 = arith.addf %59, %60 : vector<8x8xf32>
    %cst_35 = arith.constant dense<0xFF800000> : vector<8xf32>
    %62 = vector.multi_reduction <maximumf>, %61, %cst_35 [1] : vector<8x8xf32> to vector<8xf32>
    %63 = vector.shape_cast %62 : vector<8xf32> to vector<8x1xf32>
    %64 = vector.broadcast %63 : vector<8x1xf32> to vector<8x8xf32>
    %65 = arith.subf %61, %64 : vector<8x8xf32>
    %66 = math.exp %65 : vector<8x8xf32>
    %cst_36 = arith.constant dense<0.000000e+00> : vector<8xf32>
    %67 = vector.multi_reduction <add>, %66, %cst_36 [1] : vector<8x8xf32> to vector<8xf32>
    %68 = vector.shape_cast %67 : vector<8xf32> to vector<8x1xf32>
    %69 = tpu.reciprocal %68 {approx = true} : vector<8x1xf32> -> vector<8x1xf32>
    %70 = vector.broadcast %69 : vector<8x1xf32> to vector<8x8xf32>
    %71 = arith.mulf %66, %70 : vector<8x8xf32>
    %72 = arith.truncf %71 : vector<8x8xf32> to vector<8x8xbf16>
    %cst_37 = arith.constant dense<0.000000e+00> : vector<8x8xf32>
    %73 = tpu.matmul %72, %58, %cst_37 {dimension_numbers = #tpu.dot_dimension_numbers<[1], [0], [0], [1], [0, 0, 1, 1], [], []>} : vector<8x8xbf16>, vector<8x8xbf16>, vector<8x8xf32> -> vector<8x8xf32>
    %74 = tpu.concatenate %19, %37, %55, %73 in 1 : vector<8x8xf32>, vector<8x8xf32>, vector<8x8xf32>, vector<8x8xf32> -> vector<8x32xf32>
    %75 = arith.truncf %74 : vector<8x32xf32> to vector<8x32xbf16>
    %c0_38 = arith.constant 0 : index
    %c0_39 = arith.constant 0 : index
    %76 = vector.load %arg6[%c0_38, %c0_39] : memref<8x32xbf16, #tpu.memory_space<vmem>>, vector<8x32xbf16>
    tpu.vector_store %arg6[%c0_38, %c0_39], %75 {strides = array<i32>} : memref<8x32xbf16, #tpu.memory_space<vmem>>, vector<8x32xbf16>,
    return
  }
  func.func @transform_0(%arg0: i32, %arg1: i32) -> (i32, i32, i32) {
    %c0_i32 = arith.constant 0 : i32
    %c0_i32_0 = arith.constant 0 : i32
    %c0_i32_1 = arith.constant 0 : i32
    return %arg0, %c0_i32, %c0_i32_0 : i32, i32, i32
  }
  func.func @transform_1(%arg0: i32, %arg1: i32) -> (i32, i32) {
    %c0_i32 = arith.constant 0 : i32
    return %arg0, %arg1 : i32, i32
  }
  func.func @transform_2(%arg0: i32, %arg1: i32) -> (i32, i32) {
    %c0_i32 = arith.constant 0 : i32
    return %arg0, %arg1 : i32, i32
  }
  func.func @transform_3(%arg0: i32, %arg1: i32) -> (i32, i32) {
    %c0_i32 = arith.constant 0 : i32
    return %arg0, %arg1 : i32, i32
  }
  func.func @transform_4(%arg0: i32, %arg1: i32) -> (i32, i32) {
    %c0_i32 = arith.constant 0 : i32
    return %arg0, %arg1 : i32, i32
  }
}

module attributes {stable_mosaic.version = 11 : i64} {
  func.func @_linear_kernel(%arg0: i32, %arg1: i32, %arg2: i32, %arg3: memref<16x32xbf16, #tpu.memory_space<vmem>>, %arg4: memref<32x64xbf16, #tpu.memory_space<vmem>>, %arg5: memref<1x64xf32, #tpu.memory_space<vmem>>, %arg6: memref<16x64xbf16, #tpu.memory_space<vmem>>, %arg7: memref<16x64xf32, #tpu.memory_space<vmem>>) attributes {dimension_semantics = [#tpu.dimension_semantics<parallel>, #tpu.dimension_semantics<parallel>, #tpu.dimension_semantics<arbitrary>], iteration_bounds = array<i64: 1, 1, 1>, scalar_prefetch = 0 : i64, scratch_operands = 1 : i64, tpu.core_type = #tpu.core_type<tc>, window_params = [{transform_indices = @transform_0, window_bounds = array<i64: 16, 32>}, {transform_indices = @transform_1, window_bounds = array<i64: 32, 64>}, {transform_indices = @transform_2, window_bounds = array<i64: 1, 64>}, {transform_indices = @transform_3, window_bounds = array<i64: 16, 64>}]} {
    %c0_i32 = arith.constant 0 : i32
    %0 = arith.cmpi eq, %arg2, %c0_i32 : i32
    %1 = arith.extui %0 : i1 to i32
    %c0_i32_0 = arith.constant 0 : i32
    %2 = arith.cmpi ne, %1, %c0_i32_0 : i32
    scf.if %2 {
      %cst_10 = arith.constant 0.000000e+00 : f32
      %12 = vector.broadcast %cst_10 : f32 to vector<16x64xf32>
      %c0_11 = arith.constant 0 : index
      %c0_12 = arith.constant 0 : index
      %13 = vector.load %arg7[%c0_11, %c0_12] : memref<16x64xf32, #tpu.memory_space<vmem>>, vector<16x64xf32>
      tpu.vector_store %arg7[%c0_11, %c0_12], %12 {strides = array<i32>} : memref<16x64xf32, #tpu.memory_space<vmem>>, vector<16x64xf32>,
    } else {
    }
    %c0 = arith.constant 0 : index
    %c0_1 = arith.constant 0 : index
    %3 = vector.load %arg7[%c0, %c0_1] : memref<16x64xf32, #tpu.memory_space<vmem>>, vector<16x64xf32>
    %c0_2 = arith.constant 0 : index
    %c0_3 = arith.constant 0 : index
    %4 = vector.load %arg3[%c0_2, %c0_3] : memref<16x32xbf16, #tpu.memory_space<vmem>>, vector<16x32xbf16>
    %c0_4 = arith.constant 0 : index
    %c0_5 = arith.constant 0 : index
    %5 = vector.load %arg4[%c0_4, %c0_5] : memref<32x64xbf16, #tpu.memory_space<vmem>>, vector<32x64xbf16>
    %cst = arith.constant dense<0.000000e+00> : vector<16x64xf32>
    %6 = tpu.matmul %4, %5, %cst {dimension_numbers = #tpu.dot_dimension_numbers<[1], [0], [0], [1], [0, 0, 1, 1], [], []>} : vector<16x32xbf16>, vector<32x64xbf16>, vector<16x64xf32> -> vector<16x64xf32>
    %7 = arith.addf %3, %6 : vector<16x64xf32>
    %c0_6 = arith.constant 0 : index
    %c0_7 = arith.constant 0 : index
    %8 = vector.load %arg7[%c0_6, %c0_7] : memref<16x64xf32, #tpu.memory_space<vmem>>, vector<16x64xf32>
    tpu.vector_store %arg7[%c0_6, %c0_7], %7 {strides = array<i32>} : memref<16x64xf32, #tpu.memory_space<vmem>>, vector<16x64xf32>,
    %c0_i32_8 = arith.constant 0 : i32
    %9 = arith.cmpi eq, %arg2, %c0_i32_8 : i32
    %10 = arith.extui %9 : i1 to i32
    %c0_i32_9 = arith.constant 0 : i32
    %11 = arith.cmpi ne, %10, %c0_i32_9 : i32
    scf.if %11 {
      %c0_10 = arith.constant 0 : index
      %c0_11 = arith.constant 0 : index
      %12 = vector.load %arg7[%c0_10, %c0_11] : memref<16x64xf32, #tpu.memory_space<vmem>>, vector<16x64xf32>
      %c0_12 = arith.constant 0 : index
      %c0_13 = arith.constant 0 : index
      %13 = vector.load %arg5[%c0_12, %c0_13] : memref<1x64xf32, #tpu.memory_space<vmem>>, vector<1x64xf32>
      %14 = vector.broadcast %13 : vector<1x64xf32> to vector<16x64xf32>
      %15 = arith.addf %12, %14 : vector<16x64xf32>
      %cst_14 = arith.constant 5.000000e-01 : f32
      %16 = vector.broadcast %cst_14 : f32 to vector<16x64xf32>
      %17 = arith.mulf %16, %15 : vector<16x64xf32>
      %cst_15 = arith.constant 4.471500e-02 : f32
      %18 = vector.broadcast %cst_15 : f32 to vector<16x64xf32>
      %19 = arith.mulf %18, %15 : vector<16x64xf32>
      %20 = arith.mulf %19, %15 : vector<16x64xf32>
      %21 = arith.mulf %20, %15 : vector<16x64xf32>
      %22 = arith.addf %15, %21 : vector<16x64xf32>
      %cst_16 = arith.constant 0.797884583 : f32
      %23 = vector.broadcast %cst_16 : f32 to vector<16x64xf32>
      %24 = arith.mulf %23, %22 : vector<16x64xf32>
      %25 = math.tanh %24 : vector<16x64xf32>
      %cst_17 = arith.constant 1.000000e+00 : f32
      %26 = vector.broadcast %cst_17 : f32 to vector<16x64xf32>
      %27 = arith.addf %26, %25 : vector<16x64xf32>
      %28 = arith.mulf %17, %27 : vector<16x64xf32>
      %29 = arith.truncf %28 : vector<16x64xf32> to vector<16x64xbf16>
      %c0_18 = arith.constant 0 : index
      %c0_19 = arith.constant 0 : index
      %30 = vector.load %arg6[%c0_18, %c0_19] : memref<16x64xbf16, #tpu.memory_space<vmem>>, vector<16x64xbf16>
      tpu.vector_store %arg6[%c0_18, %c0_19], %29 {strides = array<i32>} : memref<16x64xbf16, #tpu.memory_space<vmem>>, vector<16x64xbf16>,
    } else {
    }
    return
  }
  func.func @transform_0(%arg0: i32, %arg1: i32, %arg2: i32) -> (i32, i32) {
    %c0_i32 = arith.constant 0 : i32
    return %arg0, %arg2 : i32, i32
  }
  func.func @transform_1(%arg0: i32, %arg1: i32, %arg2: i32) -> (i32, i32) {
    %c0_i32 = arith.constant 0 : i32
    return %arg2, %arg1 : i32, i32
  }
  func.func @transform_2(%arg0: i32, %arg1: i32, %arg2: i32) -> (i32, i32) {
    %c0_i32 = arith.constant 0 : i32
    %c0_i32_0 = arith.constant 0 : i32
    return %c0_i32, %arg1 : i32, i32
  }
  func.func @transform_3(%arg0: i32, %arg1: i32, %arg2: i32) -> (i32, i32) {
    %c0_i32 = arith.constant 0 : i32
    return %arg0, %arg1 : i32, i32
  }
}

module attributes {stable_mosaic.version = 11 : i64} {
  func.func @_linear_res_ln_kernel(%arg0: i32, %arg1: i32, %arg2: memref<16x32xbf16, #tpu.memory_space<vmem>>, %arg3: memref<32x32xbf16, #tpu.memory_space<vmem>>, %arg4: memref<1x32xf32, #tpu.memory_space<vmem>>, %arg5: memref<16x32xbf16, #tpu.memory_space<vmem>>, %arg6: memref<1x32xf32, #tpu.memory_space<vmem>>, %arg7: memref<1x32xf32, #tpu.memory_space<vmem>>, %arg8: memref<16x32xbf16, #tpu.memory_space<vmem>>, %arg9: memref<16x32xf32, #tpu.memory_space<vmem>>) attributes {dimension_semantics = [#tpu.dimension_semantics<parallel>, #tpu.dimension_semantics<arbitrary>], iteration_bounds = array<i64: 1, 1>, scalar_prefetch = 0 : i64, scratch_operands = 1 : i64, tpu.core_type = #tpu.core_type<tc>, window_params = [{transform_indices = @transform_0, window_bounds = array<i64: 16, 32>}, {transform_indices = @transform_1, window_bounds = array<i64: 32, 32>}, {pipeline_mode = #tpu.pipeline_mode<synchronous>, transform_indices = @transform_2, window_bounds = array<i64: 1, 32>}, {transform_indices = @transform_3, window_bounds = array<i64: 16, 32>}, {pipeline_mode = #tpu.pipeline_mode<synchronous>, transform_indices = @transform_4, window_bounds = array<i64: 1, 32>}, {pipeline_mode = #tpu.pipeline_mode<synchronous>, transform_indices = @transform_5, window_bounds = array<i64: 1, 32>}, {transform_indices = @transform_6, window_bounds = array<i64: 16, 32>}]} {
    %c0_i32 = arith.constant 0 : i32
    %0 = arith.cmpi eq, %arg1, %c0_i32 : i32
    %1 = arith.extui %0 : i1 to i32
    %c0_i32_0 = arith.constant 0 : i32
    %2 = arith.cmpi ne, %1, %c0_i32_0 : i32
    scf.if %2 {
      %cst_10 = arith.constant 0.000000e+00 : f32
      %12 = vector.broadcast %cst_10 : f32 to vector<16x32xf32>
      %c0_11 = arith.constant 0 : index
      %c0_12 = arith.constant 0 : index
      %13 = vector.load %arg9[%c0_11, %c0_12] : memref<16x32xf32, #tpu.memory_space<vmem>>, vector<16x32xf32>
      tpu.vector_store %arg9[%c0_11, %c0_12], %12 {strides = array<i32>} : memref<16x32xf32, #tpu.memory_space<vmem>>, vector<16x32xf32>,
    } else {
    }
    %c0 = arith.constant 0 : index
    %c0_1 = arith.constant 0 : index
    %3 = vector.load %arg9[%c0, %c0_1] : memref<16x32xf32, #tpu.memory_space<vmem>>, vector<16x32xf32>
    %c0_2 = arith.constant 0 : index
    %c0_3 = arith.constant 0 : index
    %4 = vector.load %arg2[%c0_2, %c0_3] : memref<16x32xbf16, #tpu.memory_space<vmem>>, vector<16x32xbf16>
    %c0_4 = arith.constant 0 : index
    %c0_5 = arith.constant 0 : index
    %5 = vector.load %arg3[%c0_4, %c0_5] : memref<32x32xbf16, #tpu.memory_space<vmem>>, vector<32x32xbf16>
    %cst = arith.constant dense<0.000000e+00> : vector<16x32xf32>
    %6 = tpu.matmul %4, %5, %cst {dimension_numbers = #tpu.dot_dimension_numbers<[1], [0], [0], [1], [0, 0, 1, 1], [], []>} : vector<16x32xbf16>, vector<32x32xbf16>, vector<16x32xf32> -> vector<16x32xf32>
    %7 = arith.addf %3, %6 : vector<16x32xf32>
    %c0_6 = arith.constant 0 : index
    %c0_7 = arith.constant 0 : index
    %8 = vector.load %arg9[%c0_6, %c0_7] : memref<16x32xf32, #tpu.memory_space<vmem>>, vector<16x32xf32>
    tpu.vector_store %arg9[%c0_6, %c0_7], %7 {strides = array<i32>} : memref<16x32xf32, #tpu.memory_space<vmem>>, vector<16x32xf32>,
    %c0_i32_8 = arith.constant 0 : i32
    %9 = arith.cmpi eq, %arg1, %c0_i32_8 : i32
    %10 = arith.extui %9 : i1 to i32
    %c0_i32_9 = arith.constant 0 : i32
    %11 = arith.cmpi ne, %10, %c0_i32_9 : i32
    scf.if %11 {
      %c0_10 = arith.constant 0 : index
      %c0_11 = arith.constant 0 : index
      %12 = vector.load %arg9[%c0_10, %c0_11] : memref<16x32xf32, #tpu.memory_space<vmem>>, vector<16x32xf32>
      %c0_12 = arith.constant 0 : index
      %c0_13 = arith.constant 0 : index
      %13 = vector.load %arg4[%c0_12, %c0_13] : memref<1x32xf32, #tpu.memory_space<vmem>>, vector<1x32xf32>
      %14 = vector.broadcast %13 : vector<1x32xf32> to vector<16x32xf32>
      %15 = arith.addf %12, %14 : vector<16x32xf32>
      %c0_14 = arith.constant 0 : index
      %c0_15 = arith.constant 0 : index
      %16 = vector.load %arg5[%c0_14, %c0_15] : memref<16x32xbf16, #tpu.memory_space<vmem>>, vector<16x32xbf16>
      %17 = arith.extf %16 : vector<16x32xbf16> to vector<16x32xf32>
      %18 = arith.addf %15, %17 : vector<16x32xf32>
      %cst_16 = arith.constant dense<0.000000e+00> : vector<16xf32>
      %19 = vector.multi_reduction <add>, %18, %cst_16 [1] : vector<16x32xf32> to vector<16xf32>
      %20 = vector.shape_cast %19 : vector<16xf32> to vector<16x1xf32>
      %cst_17 = arith.constant 3.200000e+01 : f32
      %21 = vector.broadcast %cst_17 : f32 to vector<16x1xf32>
      %22 = arith.divf %20, %21 : vector<16x1xf32>
      %23 = vector.broadcast %22 : vector<16x1xf32> to vector<16x32xf32>
      %24 = arith.subf %18, %23 : vector<16x32xf32>
      %25 = arith.mulf %24, %24 : vector<16x32xf32>
      %cst_18 = arith.constant dense<0.000000e+00> : vector<16xf32>
      %26 = vector.multi_reduction <add>, %25, %cst_18 [1] : vector<16x32xf32> to vector<16xf32>
      %27 = vector.shape_cast %26 : vector<16xf32> to vector<16x1xf32>
      %cst_19 = arith.constant 3.200000e+01 : f32
      %28 = vector.broadcast %cst_19 : f32 to vector<16x1xf32>
      %29 = arith.divf %27, %28 : vector<16x1xf32>
      %cst_20 = arith.constant 9.99999996E-13 : f32
      %30 = vector.broadcast %cst_20 : f32 to vector<16x1xf32>
      %31 = arith.addf %29, %30 : vector<16x1xf32>
      %32 = math.rsqrt %31 : vector<16x1xf32>
      %33 = vector.broadcast %32 : vector<16x1xf32> to vector<16x32xf32>
      %34 = arith.mulf %24, %33 : vector<16x32xf32>
      %c0_21 = arith.constant 0 : index
      %c0_22 = arith.constant 0 : index
      %35 = vector.load %arg6[%c0_21, %c0_22] : memref<1x32xf32, #tpu.memory_space<vmem>>, vector<1x32xf32>
      %36 = vector.broadcast %35 : vector<1x32xf32> to vector<16x32xf32>
      %37 = arith.mulf %34, %36 : vector<16x32xf32>
      %c0_23 = arith.constant 0 : index
      %c0_24 = arith.constant 0 : index
      %38 = vector.load %arg7[%c0_23, %c0_24] : memref<1x32xf32, #tpu.memory_space<vmem>>, vector<1x32xf32>
      %39 = vector.broadcast %38 : vector<1x32xf32> to vector<16x32xf32>
      %40 = arith.addf %37, %39 : vector<16x32xf32>
      %41 = arith.truncf %40 : vector<16x32xf32> to vector<16x32xbf16>
      %c0_25 = arith.constant 0 : index
      %c0_26 = arith.constant 0 : index
      %42 = vector.load %arg8[%c0_25, %c0_26] : memref<16x32xbf16, #tpu.memory_space<vmem>>, vector<16x32xbf16>
      tpu.vector_store %arg8[%c0_25, %c0_26], %41 {strides = array<i32>} : memref<16x32xbf16, #tpu.memory_space<vmem>>, vector<16x32xbf16>,
    } else {
    }
    return
  }
  func.func @transform_0(%arg0: i32, %arg1: i32) -> (i32, i32) {
    %c0_i32 = arith.constant 0 : i32
    return %arg0, %arg1 : i32, i32
  }
  func.func @transform_1(%arg0: i32, %arg1: i32) -> (i32, i32) {
    %c0_i32 = arith.constant 0 : i32
    %c0_i32_0 = arith.constant 0 : i32
    return %arg1, %c0_i32 : i32, i32
  }
  func.func @transform_2(%arg0: i32, %arg1: i32) -> (i32, i32) {
    %c0_i32 = arith.constant 0 : i32
    %c0_i32_0 = arith.constant 0 : i32
    %c0_i32_1 = arith.constant 0 : i32
    return %c0_i32, %c0_i32_0 : i32, i32
  }
  func.func @transform_3(%arg0: i32, %arg1: i32) -> (i32, i32) {
    %c0_i32 = arith.constant 0 : i32
    %c0_i32_0 = arith.constant 0 : i32
    return %arg0, %c0_i32 : i32, i32
  }
  func.func @transform_4(%arg0: i32, %arg1: i32) -> (i32, i32) {
    %c0_i32 = arith.constant 0 : i32
    %c0_i32_0 = arith.constant 0 : i32
    %c0_i32_1 = arith.constant 0 : i32
    return %c0_i32, %c0_i32_0 : i32, i32
  }
  func.func @transform_5(%arg0: i32, %arg1: i32) -> (i32, i32) {
    %c0_i32 = arith.constant 0 : i32
    %c0_i32_0 = arith.constant 0 : i32
    %c0_i32_1 = arith.constant 0 : i32
    return %c0_i32, %c0_i32_0 : i32, i32
  }
  func.func @transform_6(%arg0: i32, %arg1: i32) -> (i32, i32) {
    %c0_i32 = arith.constant 0 : i32
    %c0_i32_0 = arith.constant 0 : i32
    return %arg0, %c0_i32 : i32, i32
  }
}

module attributes {stable_mosaic.version = 11 : i64} {
  func.func @_linear_res_ln_kernel(%arg0: i32, %arg1: i32, %arg2: memref<16x64xbf16, #tpu.memory_space<vmem>>, %arg3: memref<64x32xbf16, #tpu.memory_space<vmem>>, %arg4: memref<1x32xf32, #tpu.memory_space<vmem>>, %arg5: memref<16x32xbf16, #tpu.memory_space<vmem>>, %arg6: memref<1x32xf32, #tpu.memory_space<vmem>>, %arg7: memref<1x32xf32, #tpu.memory_space<vmem>>, %arg8: memref<16x32xbf16, #tpu.memory_space<vmem>>, %arg9: memref<16x32xf32, #tpu.memory_space<vmem>>) attributes {dimension_semantics = [#tpu.dimension_semantics<parallel>, #tpu.dimension_semantics<arbitrary>], iteration_bounds = array<i64: 1, 1>, scalar_prefetch = 0 : i64, scratch_operands = 1 : i64, tpu.core_type = #tpu.core_type<tc>, window_params = [{transform_indices = @transform_0, window_bounds = array<i64: 16, 64>}, {transform_indices = @transform_1, window_bounds = array<i64: 64, 32>}, {pipeline_mode = #tpu.pipeline_mode<synchronous>, transform_indices = @transform_2, window_bounds = array<i64: 1, 32>}, {transform_indices = @transform_3, window_bounds = array<i64: 16, 32>}, {pipeline_mode = #tpu.pipeline_mode<synchronous>, transform_indices = @transform_4, window_bounds = array<i64: 1, 32>}, {pipeline_mode = #tpu.pipeline_mode<synchronous>, transform_indices = @transform_5, window_bounds = array<i64: 1, 32>}, {transform_indices = @transform_6, window_bounds = array<i64: 16, 32>}]} {
    %c0_i32 = arith.constant 0 : i32
    %0 = arith.cmpi eq, %arg1, %c0_i32 : i32
    %1 = arith.extui %0 : i1 to i32
    %c0_i32_0 = arith.constant 0 : i32
    %2 = arith.cmpi ne, %1, %c0_i32_0 : i32
    scf.if %2 {
      %cst_10 = arith.constant 0.000000e+00 : f32
      %12 = vector.broadcast %cst_10 : f32 to vector<16x32xf32>
      %c0_11 = arith.constant 0 : index
      %c0_12 = arith.constant 0 : index
      %13 = vector.load %arg9[%c0_11, %c0_12] : memref<16x32xf32, #tpu.memory_space<vmem>>, vector<16x32xf32>
      tpu.vector_store %arg9[%c0_11, %c0_12], %12 {strides = array<i32>} : memref<16x32xf32, #tpu.memory_space<vmem>>, vector<16x32xf32>,
    } else {
    }
    %c0 = arith.constant 0 : index
    %c0_1 = arith.constant 0 : index
    %3 = vector.load %arg9[%c0, %c0_1] : memref<16x32xf32, #tpu.memory_space<vmem>>, vector<16x32xf32>
    %c0_2 = arith.constant 0 : index
    %c0_3 = arith.constant 0 : index
    %4 = vector.load %arg2[%c0_2, %c0_3] : memref<16x64xbf16, #tpu.memory_space<vmem>>, vector<16x64xbf16>
    %c0_4 = arith.constant 0 : index
    %c0_5 = arith.constant 0 : index
    %5 = vector.load %arg3[%c0_4, %c0_5] : memref<64x32xbf16, #tpu.memory_space<vmem>>, vector<64x32xbf16>
    %cst = arith.constant dense<0.000000e+00> : vector<16x32xf32>
    %6 = tpu.matmul %4, %5, %cst {dimension_numbers = #tpu.dot_dimension_numbers<[1], [0], [0], [1], [0, 0, 1, 1], [], []>} : vector<16x64xbf16>, vector<64x32xbf16>, vector<16x32xf32> -> vector<16x32xf32>
    %7 = arith.addf %3, %6 : vector<16x32xf32>
    %c0_6 = arith.constant 0 : index
    %c0_7 = arith.constant 0 : index
    %8 = vector.load %arg9[%c0_6, %c0_7] : memref<16x32xf32, #tpu.memory_space<vmem>>, vector<16x32xf32>
    tpu.vector_store %arg9[%c0_6, %c0_7], %7 {strides = array<i32>} : memref<16x32xf32, #tpu.memory_space<vmem>>, vector<16x32xf32>,
    %c0_i32_8 = arith.constant 0 : i32
    %9 = arith.cmpi eq, %arg1, %c0_i32_8 : i32
    %10 = arith.extui %9 : i1 to i32
    %c0_i32_9 = arith.constant 0 : i32
    %11 = arith.cmpi ne, %10, %c0_i32_9 : i32
    scf.if %11 {
      %c0_10 = arith.constant 0 : index
      %c0_11 = arith.constant 0 : index
      %12 = vector.load %arg9[%c0_10, %c0_11] : memref<16x32xf32, #tpu.memory_space<vmem>>, vector<16x32xf32>
      %c0_12 = arith.constant 0 : index
      %c0_13 = arith.constant 0 : index
      %13 = vector.load %arg4[%c0_12, %c0_13] : memref<1x32xf32, #tpu.memory_space<vmem>>, vector<1x32xf32>
      %14 = vector.broadcast %13 : vector<1x32xf32> to vector<16x32xf32>
      %15 = arith.addf %12, %14 : vector<16x32xf32>
      %c0_14 = arith.constant 0 : index
      %c0_15 = arith.constant 0 : index
      %16 = vector.load %arg5[%c0_14, %c0_15] : memref<16x32xbf16, #tpu.memory_space<vmem>>, vector<16x32xbf16>
      %17 = arith.extf %16 : vector<16x32xbf16> to vector<16x32xf32>
      %18 = arith.addf %15, %17 : vector<16x32xf32>
      %cst_16 = arith.constant dense<0.000000e+00> : vector<16xf32>
      %19 = vector.multi_reduction <add>, %18, %cst_16 [1] : vector<16x32xf32> to vector<16xf32>
      %20 = vector.shape_cast %19 : vector<16xf32> to vector<16x1xf32>
      %cst_17 = arith.constant 3.200000e+01 : f32
      %21 = vector.broadcast %cst_17 : f32 to vector<16x1xf32>
      %22 = arith.divf %20, %21 : vector<16x1xf32>
      %23 = vector.broadcast %22 : vector<16x1xf32> to vector<16x32xf32>
      %24 = arith.subf %18, %23 : vector<16x32xf32>
      %25 = arith.mulf %24, %24 : vector<16x32xf32>
      %cst_18 = arith.constant dense<0.000000e+00> : vector<16xf32>
      %26 = vector.multi_reduction <add>, %25, %cst_18 [1] : vector<16x32xf32> to vector<16xf32>
      %27 = vector.shape_cast %26 : vector<16xf32> to vector<16x1xf32>
      %cst_19 = arith.constant 3.200000e+01 : f32
      %28 = vector.broadcast %cst_19 : f32 to vector<16x1xf32>
      %29 = arith.divf %27, %28 : vector<16x1xf32>
      %cst_20 = arith.constant 9.99999996E-13 : f32
      %30 = vector.broadcast %cst_20 : f32 to vector<16x1xf32>
      %31 = arith.addf %29, %30 : vector<16x1xf32>
      %32 = math.rsqrt %31 : vector<16x1xf32>
      %33 = vector.broadcast %32 : vector<16x1xf32> to vector<16x32xf32>
      %34 = arith.mulf %24, %33 : vector<16x32xf32>
      %c0_21 = arith.constant 0 : index
      %c0_22 = arith.constant 0 : index
      %35 = vector.load %arg6[%c0_21, %c0_22] : memref<1x32xf32, #tpu.memory_space<vmem>>, vector<1x32xf32>
      %36 = vector.broadcast %35 : vector<1x32xf32> to vector<16x32xf32>
      %37 = arith.mulf %34, %36 : vector<16x32xf32>
      %c0_23 = arith.constant 0 : index
      %c0_24 = arith.constant 0 : index
      %38 = vector.load %arg7[%c0_23, %c0_24] : memref<1x32xf32, #tpu.memory_space<vmem>>, vector<1x32xf32>
      %39 = vector.broadcast %38 : vector<1x32xf32> to vector<16x32xf32>
      %40 = arith.addf %37, %39 : vector<16x32xf32>
      %41 = arith.truncf %40 : vector<16x32xf32> to vector<16x32xbf16>
      %c0_25 = arith.constant 0 : index
      %c0_26 = arith.constant 0 : index
      %42 = vector.load %arg8[%c0_25, %c0_26] : memref<16x32xbf16, #tpu.memory_space<vmem>>, vector<16x32xbf16>
      tpu.vector_store %arg8[%c0_25, %c0_26], %41 {strides = array<i32>} : memref<16x32xbf16, #tpu.memory_space<vmem>>, vector<16x32xbf16>,
    } else {
    }
    return
  }
  func.func @transform_0(%arg0: i32, %arg1: i32) -> (i32, i32) {
    %c0_i32 = arith.constant 0 : i32
    return %arg0, %arg1 : i32, i32
  }
  func.func @transform_1(%arg0: i32, %arg1: i32) -> (i32, i32) {
    %c0_i32 = arith.constant 0 : i32
    %c0_i32_0 = arith.constant 0 : i32
    return %arg1, %c0_i32 : i32, i32
  }
  func.func @transform_2(%arg0: i32, %arg1: i32) -> (i32, i32) {
    %c0_i32 = arith.constant 0 : i32
    %c0_i32_0 = arith.constant 0 : i32
    %c0_i32_1 = arith.constant 0 : i32
    return %c0_i32, %c0_i32_0 : i32, i32
  }
  func.func @transform_3(%arg0: i32, %arg1: i32) -> (i32, i32) {
    %c0_i32 = arith.constant 0 : i32
    %c0_i32_0 = arith.constant 0 : i32
    return %arg0, %c0_i32 : i32, i32
  }
  func.func @transform_4(%arg0: i32, %arg1: i32) -> (i32, i32) {
    %c0_i32 = arith.constant 0 : i32
    %c0_i32_0 = arith.constant 0 : i32
    %c0_i32_1 = arith.constant 0 : i32
    return %c0_i32, %c0_i32_0 : i32, i32
  }
  func.func @transform_5(%arg0: i32, %arg1: i32) -> (i32, i32) {
    %c0_i32 = arith.constant 0 : i32
    %c0_i32_0 = arith.constant 0 : i32
    %c0_i32_1 = arith.constant 0 : i32
    return %c0_i32, %c0_i32_0 : i32, i32
  }
  func.func @transform_6(%arg0: i32, %arg1: i32) -> (i32, i32) {
    %c0_i32 = arith.constant 0 : i32
    %c0_i32_0 = arith.constant 0 : i32
    return %arg0, %c0_i32 : i32, i32
  }
}

</mosaic_0001>

<bundles_post_ra>
// kernel: encoder_forward.3
= control target key start
LH: loop header
LB: loop body
LE: loop exit
PB: predicated region body
PF: predicated region fallthrough
CT: control target
= control target key end

     0   :  { %8 = vsyncpa [#allocation4], 0  ;;  %s388_s0 = inlined_call_operand.hbm [shape: bf16[16,16], index: 0, kind: input, shape index: {}]   ;;  %s389_s1 = inlined_call_operand.hbm [shape: bf16[16,32], index: 1, kind: input, shape index: {}]   ;;  %s390_s2 = inlined_call_operand.hbm [shape: f32[1,32], index: 2, kind: input, shape index: {}]   ;;  %s391_s3 = inlined_call_operand.hbm [shape: bf16[16,32], index: 3, kind: output, shape index: {}]  }
   0x1   :  { %9 = vsyncpa [#allocation7], 0 }
   0x2   :  { %10 = vsyncpa [#allocation5], 0  ;;  %s292_s12 = smov [#allocation6]   ;;  %s293_s14 = smov [#allocation3]  }
   0x3   :  { %s28_s13 = sshll.u32 %s292_s12, 4  ;;  %s16_s15 = sshll.u32 %s293_s14, 4  ;;  %s29_s13 = int_to_ptr.vmem [resolvable:$true] %s28_s13  ;;  %s320_s15 = int_to_ptr.vmem [resolvable:$true] %s16_s15 }
   0x4   :  { %s198_s18 = scalar_lea.hbm %s389_s1, 128 }
   0x5   :  { %p199_p0 = scmp.ne.s32.totalorder %s389_s1, %s198_s18  ;;  %p202_p1 = scmp.lt.u32.totalorder %s198_s18, %s389_s1 }
   0x7   :  { %p204_p2 = pnand %p202_p1, %p199_p0 }
   0x9   :  { %207 = shalt.err (!%p204_p2)
}
   0xa   :  { %s208_s23 = scalar_lea.vmem %s29_s13, 128  ;;  %p213_p4 = scmp.lt.s32.totalorder %s29_s13, %s29_s13 }
   0xb   :  { %p209_p3 = scmp.ne.s32.totalorder %s29_s13, %s208_s23  ;;  %p214_p5 = scmp.lt.s32.totalorder %s208_s23, %s208_s23 }
   0xd   :  { %p215_p6 = por %p214_p5, %p213_p4 }
   0xf   :  { %p216_p7 = pnand %p215_p6, %p209_p3 }
  0x11   :  { %219 = shalt.err (!%p216_p7)
}
  0x12   :  { %s294_s24 = smov 64   ;;  %s295_s25 = smov 4  }
  0x13   :  { %34 = dma.hbm_to_vmem [thread:$0]  %s389_s1, 128, %s29_s13, [#allocation7], %s294_s24, %s294_s24, %s295_s25  }
  0x14   :  { %s220_s30 = scalar_lea.hbm %s388_s0, 128 }
  0x15   :  { %p221_p8 = scmp.ne.s32.totalorder %s388_s0, %s220_s30  ;;  %p224_p9 = scmp.lt.u32.totalorder %s220_s30, %s388_s0 }
  0x17   :  { %p226_p10 = pnand %p224_p9, %p221_p8 }
  0x19   :  { %229 = shalt.err (!%p226_p10)
}
  0x1a   :  { %s230_s8 = scalar_lea.vmem %s320_s15, 128  ;;  %p235_p12 = scmp.lt.s32.totalorder %s320_s15, %s320_s15 }
  0x1b   :  { %p231_p11 = scmp.ne.s32.totalorder %s320_s15, %s230_s8  ;;  %p236_p13 = scmp.lt.s32.totalorder %s230_s8, %s230_s8 }
  0x1d   :  { %p237_p0 = por %p236_p13, %p235_p12 }
  0x1f   :  { %p238_p1 = pnand %p237_p0, %p231_p11 }
  0x21   :  { %241 = shalt.err (!%p238_p1)
}
  0x22   :  { %22 = dma.hbm_to_vmem [thread:$0]  %s388_s0, 128, %s320_s15, [#allocation4], %s294_s24, %s294_s24, %s295_s25  }
  0x23   :  { %s296_s10 = smov [#allocation8]   ;;  %s242_s14 = scalar_lea.hbm %s390_s2, 16 }
  0x24   :  { %s41_s11 = sshll.u32 %s296_s10, 4  ;;  %p243_p2 = scmp.ne.s32.totalorder %s390_s2, %s242_s14  ;;  %s42_s11 = int_to_ptr.vmem [resolvable:$true] %s41_s11 }
  0x25   :  { %p246_p3 = scmp.lt.u32.totalorder %s242_s14, %s390_s2 }
  0x27   :  { %p248_p4 = pnand %p246_p3, %p243_p2 }
  0x29   :  { %251 = shalt.err (!%p248_p4)
}
  0x2a   :  { %s252_s20 = scalar_lea.vmem %s42_s11, 16  ;;  %s256_s0 = scalar_lea.vmem %s42_s11, 32 }
  0x2b   :  { %p253_p5 = scmp.ne.s32.totalorder %s42_s11, %s252_s20  ;;  %p257_p6 = scmp.lt.s32.totalorder %s42_s11, %s42_s11 }
  0x2c   :  { %p258_p7 = scmp.lt.s32.totalorder %s256_s0, %s252_s20 }
  0x2e   :  { %p259_p8 = por %p258_p7, %p257_p6 }
  0x30   :  { %p260_p9 = pnand %p259_p8, %p253_p5 }
  0x32   :  { %263 = shalt.err (!%p260_p9)
}
  0x33   :  { %44 = dma.hbm_to_vmem [thread:$0]  %s390_s2, 16, %s42_s11, [#allocation7]  }
  0x34   :  { %286 = dma.done.wait [#allocation4], 128  }
  0x35   :  { %287 = vsyncadd [#allocation4], 4294967168 }
  0x36   :  { %288 = dma.done.wait [#allocation7], 144  }
  0x37   :  { %289 = vsyncadd [#allocation7], 4294967152  ;;  %vm59_vm0 = vcmask 261120   ;;  %v297_v0 = vmov 0.0   ;;  %vm298_vm1 = vmmov 0   ;;  %v196_v1 = vld [vmem:[#allocation6] sm:$0xff]  }
  0x38   :  { %60 = vst.msk [vmem:[#allocation2] sm:$0xff] %vm59_vm0, %v297_v0  ;;  %61 = vst.msk [vmem:[#allocation2 + $0x8] sm:$0xff] %vm59_vm0, %v297_v0  ;;  %182 = vmatprep.subr.bf16.mxu0 %v297_v0  ;;  %184 = vmatprep.mubr.msk.bf16.mxu0 %vm298_vm1, %v297_v0  ;;  %v197_v2 = vld [vmem:[#allocation3] sm:$0xff]   ;;  %vm79_vm2 = vcmask 130048   ;;  %v175_v11 = vld [vmem:[#allocation8] ss:$0 sm:$0xff] }
  0x39   :  { %183 = vmatpush3.bf16.msra.mxu0 %v196_v1  ;;  %vm151_vm3 = vcmask 257024   ;;  %s299_s2 = smov [#allocation9]  }
  0x3a   :  { %s159_s22 = sshll.u32 %s299_s2, 4  ;;  %s160_s22 = int_to_ptr.vmem [resolvable:$true] %s159_s22 }
  0x3b   :  { %s264_s23 = scalar_lea.vmem %s160_s22, 128  ;;  %p269_p11 = scmp.lt.s32.totalorder %s160_s22, %s160_s22 }
  0x3c   :  { %185 = vmatmul.mubr.msk.bf16.vlgmr.msra.gmra.mrb[0].mxu0 %vm79_vm2, %v197_v2  ;;  %p265_p10 = scmp.ne.s32.totalorder %s160_s22, %s264_s23  ;;  %p270_p12 = scmp.lt.s32.totalorder %s264_s23, %s264_s23 }
  0x3e   :  { %p271_p13 = por %p270_p12, %p269_p11 }
  0x3f   :  { %v62_v3 = vld [vmem:[#allocation2] sm:$0xff]  ;;  %v63_v5 = vld [vmem:[#allocation2 + $0x8] sm:$0xff] }
  0x40   :  { %p272_p0 = pnand %p271_p13, %p265_p10 }
 0x10f   :  { %v117_v4 = vpop.f32.mrb[0].mxu0 }
 0x110   :  { %v124_v6 = vadd.f32 %v117_v4, %v62_v3  ;;  %v186_v7 = vpop.f32.mrb[1].mxu0 }
 0x111   :  { %v120_v8 = vpop.f32.mrb[2].mxu0 }
 0x112   :  { %127 = vst.msk [vmem:[#allocation2] sm:$0xff] %vm59_vm0, %v124_v6  ;;  %v125_v9 = vadd.f32 %v120_v8, %v63_v5  ;;  %v187_v10 = vpop.f32.mrb[3].mxu0 }
 0x114   :  { %128 = vst.msk [vmem:[#allocation2 + $0x8] sm:$0xff] %vm59_vm0, %v125_v9 }
 0x119   :  { %v132_v12 = vld [vmem:[#allocation2] sm:$0xff] }
 0x11a   :  { %v141_v13 = vadd.f32 %v175_v11, %v132_v12 }
 0x11b   :  { %v133_v14 = vld [vmem:[#allocation2 + $0x8] sm:$0xff] }
 0x11c   :  { %v142_v15 = vadd.f32 %v175_v11, %v133_v14  ;;  %v178_v16 = vpack.c.bf16 %v141_v13, %v141_v13 }
 0x11e   :  { %v179_v17 = vpack.c.bf16 %v142_v15, %v142_v15  ;;  %152 = vst.msk [vmem:[#allocation9] sm:$0xf] %vm151_vm3, %v178_v16 }
 0x120   :  { %153 = vst.msk [vmem:[#allocation9 + $0x4] sm:$0xf] %vm151_vm3, %v179_v17 }
 0x121   :  { %275 = shalt.err (!%p272_p0)
}
 0x122   :  { %s276_s28 = scalar_lea.hbm %s391_s3, 128 }
 0x123   :  { %p277_p1 = scmp.ne.s32.totalorder %s391_s3, %s276_s28  ;;  %p280_p2 = scmp.lt.u32.totalorder %s276_s28, %s391_s3 }
 0x125   :  { %p282_p3 = pnand %p280_p2, %p277_p1 }
 0x127   :  { %285 = shalt.err (!%p282_p3)
}
 0x128   :  { %165 = dma.vmem_to_hbm [thread:$0]  %s160_s22, 128, %s391_s3, [#allocation5], %s294_s24, %s294_s24, %s295_s25  }
 0x129   :  { %290 = dma.done.wait [#allocation5], 128  }
 0x12a   :  { %291 = vsyncadd [#allocation5], 4294967168 }
 0x12b   :  { %169 = vsyncpa [#allocation4], 1 }
 0x12c   :  { %170 = vsyncpa [#allocation7], 1 }
 0x12d   :  { %171 = vsyncpa [#allocation5], 1 }

// kernel: encoder_forward.2
= control target key start
LH: loop header
LB: loop body
LE: loop exit
PB: predicated region body
PF: predicated region fallthrough
CT: control target
= control target key end

     0   :  { %8 = vsyncpa [#allocation3], 0  ;;  %s328_s0 = inlined_call_operand.hbm [shape: f32[16,16], index: 0, kind: input, shape index: {}]   ;;  %s329_s1 = inlined_call_operand.hbm [shape: f32[1,16], index: 1, kind: input, shape index: {}]   ;;  %s330_s2 = inlined_call_operand.hbm [shape: f32[1,16], index: 2, kind: input, shape index: {}]   ;;  %s331_s3 = inlined_call_operand.hbm [shape: bf16[16,16], index: 3, kind: output, shape index: {}]  }
   0x1   :  { %9 = vsyncpa [#allocation6], 0 }
   0x2   :  { %10 = vsyncpa [#allocation4], 0  ;;  %s241_s12 = smov [#allocation5]   ;;  %s242_s14 = smov [#allocation2]  }
   0x3   :  { %s29_s13 = sshll.u32 %s241_s12, 4  ;;  %s16_s15 = sshll.u32 %s242_s14, 4  ;;  %s30_s13 = int_to_ptr.vmem [resolvable:$true] %s29_s13  ;;  %s269_s15 = int_to_ptr.vmem [resolvable:$true] %s16_s15 }
   0x4   :  { %s147_s18 = scalar_lea.hbm %s329_s1, 16 }
   0x5   :  { %p148_p0 = scmp.ne.s32.totalorder %s329_s1, %s147_s18  ;;  %p151_p1 = scmp.lt.u32.totalorder %s147_s18, %s329_s1 }
   0x7   :  { %p153_p2 = pnand %p151_p1, %p148_p0 }
   0x9   :  { %156 = shalt.err (!%p153_p2)
}
   0xa   :  { %s157_s23 = scalar_lea.vmem %s30_s13, 16  ;;  %s161_s24 = scalar_lea.vmem %s30_s13, 32 }
   0xb   :  { %p158_p3 = scmp.ne.s32.totalorder %s30_s13, %s157_s23  ;;  %p162_p4 = scmp.lt.s32.totalorder %s30_s13, %s30_s13 }
   0xc   :  { %p163_p5 = scmp.lt.s32.totalorder %s161_s24, %s157_s23 }
   0xe   :  { %p164_p6 = por %p163_p5, %p162_p4 }
  0x10   :  { %p165_p7 = pnand %p164_p6, %p158_p3 }
  0x12   :  { %168 = shalt.err (!%p165_p7)
}
  0x13   :  { %32 = dma.hbm_to_vmem [thread:$0]  %s329_s1, 16, %s30_s13, [#allocation6]  }
  0x14   :  { %s169_s29 = scalar_lea.hbm %s328_s0, 256 }
  0x15   :  { %p170_p8 = scmp.ne.s32.totalorder %s328_s0, %s169_s29  ;;  %p173_p9 = scmp.lt.u32.totalorder %s169_s29, %s328_s0 }
  0x17   :  { %p175_p10 = pnand %p173_p9, %p170_p8 }
  0x19   :  { %178 = shalt.err (!%p175_p10)
}
  0x1a   :  { %s179_s7 = scalar_lea.vmem %s269_s15, 256  ;;  %p184_p12 = scmp.lt.s32.totalorder %s269_s15, %s269_s15 }
  0x1b   :  { %p180_p11 = scmp.ne.s32.totalorder %s269_s15, %s179_s7  ;;  %p185_p13 = scmp.lt.s32.totalorder %s179_s7, %s179_s7 }
  0x1d   :  { %p186_p0 = por %p185_p13, %p184_p12 }
  0x1f   :  { %p187_p1 = pnand %p186_p0, %p180_p11 }
  0x21   :  { %190 = shalt.err (!%p187_p1)
}
  0x22   :  { %s243_s1 = smov 128   ;;  %s244_s8 = smov 8  }
  0x23   :  { %22 = dma.hbm_to_vmem [thread:$0]  %s328_s0, 256, %s269_s15, [#allocation3], %s243_s1, %s243_s1, %s244_s8  }
  0x24   :  { %s245_s11 = smov [#allocation7]   ;;  %s191_s16 = scalar_lea.hbm %s330_s2, 16 }
  0x25   :  { %s39_s12 = sshll.u32 %s245_s11, 4  ;;  %p192_p2 = scmp.ne.s32.totalorder %s330_s2, %s191_s16  ;;  %s40_s12 = int_to_ptr.vmem [resolvable:$true] %s39_s12 }
  0x26   :  { %p195_p3 = scmp.lt.u32.totalorder %s191_s16, %s330_s2 }
  0x28   :  { %p197_p4 = pnand %p195_p3, %p192_p2 }
  0x2a   :  { %200 = shalt.err (!%p197_p4)
}
  0x2b   :  { %s201_s21 = scalar_lea.vmem %s40_s12, 16  ;;  %s205_s0 = scalar_lea.vmem %s40_s12, 32 }
  0x2c   :  { %p202_p5 = scmp.ne.s32.totalorder %s40_s12, %s201_s21  ;;  %p206_p6 = scmp.lt.s32.totalorder %s40_s12, %s40_s12 }
  0x2d   :  { %p207_p7 = scmp.lt.s32.totalorder %s205_s0, %s201_s21 }
  0x2f   :  { %p208_p8 = por %p207_p7, %p206_p6 }
  0x31   :  { %p209_p9 = pnand %p208_p8, %p202_p5 }
  0x33   :  { %212 = shalt.err (!%p209_p9)
}
  0x34   :  { %42 = dma.hbm_to_vmem [thread:$0]  %s330_s2, 16, %s40_s12, [#allocation6]  }
  0x35   :  { %235 = dma.done.wait [#allocation3], 256  }
  0x36   :  { %236 = vsyncadd [#allocation3], 4294967040 }
  0x37   :  { %237 = dma.done.wait [#allocation6], 32  }
  0x38   :  { %238 = vsyncadd [#allocation6], 4294967264  ;;  %vm54_vm0 = vcmask 130048   ;;  %v52_v0 = vld [vmem:[#allocation2] sm:$0xff]  ;;  %v53_v1 = vld [vmem:[#allocation2 + $0x8] sm:$0xff]  ;;  %vm108_vm1 = vcmask 125952  }
  0x39   :  { %v55_v2 = vsel %vm54_vm0, %v52_v0, 0.0  ;;  %v58_v3 = vsel %vm54_vm0, %v53_v1, 0.0  ;;  %v129_v21 = vld [vmem:[#allocation5] ss:$0 sm:$0xff]  ;;  %v130_v23 = vld [vmem:[#allocation7] ss:$0 sm:$0xff] }
  0x3a   :  { %56 = vadd.xlane.f32.xlu0 %v55_v2  ;;  %s246_s2 = smov [#allocation8]  }
  0x3b   :  { %s116_s23 = sshll.u32 %s246_s2, 4  ;;  %s117_s23 = int_to_ptr.vmem [resolvable:$true] %s116_s23 }
  0x3c   :  { %s213_s24 = scalar_lea.vmem %s117_s23, 128  ;;  %p218_p11 = scmp.lt.s32.totalorder %s117_s23, %s117_s23 }
  0x3d   :  { %p214_p10 = scmp.ne.s32.totalorder %s117_s23, %s213_s24  ;;  %p219_p12 = scmp.lt.s32.totalorder %s213_s24, %s213_s24 }
  0x3e   :  { %59 = vadd.xlane.f32.xlu0 %v58_v3 }
  0x3f   :  { %p220_p13 = por %p219_p12, %p218_p11 }
  0x41   :  { %p221_p0 = pnand %p220_p13, %p214_p10 }
  0xc7   :  { %v57_v4 = vpop.xlane.xlu0 %56 }
  0xc8   :  { %v62_v5 = vmul.f32 0.0625, %v57_v4 }
  0xca   :  { %v64_v6 = vsub.f32 %v52_v0, %v62_v5 }
  0xcb   :  { %v60_v7 = vpop.xlane.xlu0 %59 }
  0xcc   :  { %v63_v8 = vmul.f32 0.0625, %v60_v7  ;;  %v66_v9 = vmul.f32 %v64_v6, %v64_v6 }
  0xce   :  { %v65_v10 = vsub.f32 %v53_v1, %v63_v8  ;;  %v68_v11 = vsel %vm54_vm0, %v66_v9, 0.0 }
  0xcf   :  { %69 = vadd.xlane.f32.xlu1 %v68_v11 }
  0xd0   :  { %v67_v12 = vmul.f32 %v65_v10, %v65_v10 }
  0xd2   :  { %v71_v13 = vsel %vm54_vm0, %v67_v12, 0.0 }
  0xd3   :  { %72 = vadd.xlane.f32.xlu1 %v71_v13 }
 0x15c   :  { %v70_v14 = vpop.xlane.xlu1 %69 }
 0x15d   :  { %v74_v15 = vmul.f32 0.0625, %v70_v14 }
 0x15f   :  { %v76_v16 = vadd.f32 1e-12, %v74_v15 }
 0x160   :  { %v73_v17 = vpop.xlane.xlu1 %72 }
 0x161   :  { %143 = vrsqrt.f32 %v76_v16  ;;  %v75_v18 = vmul.f32 0.0625, %v73_v17 }
 0x163   :  { %v77_v19 = vadd.f32 1e-12, %v75_v18 }
 0x165   :  { %145 = vrsqrt.f32 %v77_v19 }
 0x16b   :  { %v144_v20 = vpop.eup %143 }
 0x16c   :  { %v80_v22 = vmul.f32 %v144_v20, %v64_v6 }
 0x16e   :  { %v89_v24 = vmul.f32 %v129_v21, %v80_v22 }
 0x16f   :  { %v146_v25 = vpop.eup %145 }
 0x170   :  { %v81_v26 = vmul.f32 %v146_v25, %v65_v10  ;;  %v98_v27 = vadd.f32 %v130_v23, %v89_v24 }
 0x172   :  { %v90_v28 = vmul.f32 %v129_v21, %v81_v26  ;;  %v133_v29 = vpack.c.bf16 %v98_v27, %v98_v27 }
 0x174   :  { %v99_v30 = vadd.f32 %v130_v23, %v90_v28  ;;  %109 = vst.msk [vmem:[#allocation8] sm:$0xf] %vm108_vm1, %v133_v29 }
 0x176   :  { %v134_v31 = vpack.c.bf16 %v99_v30, %v99_v30 }
 0x178   :  { %110 = vst.msk [vmem:[#allocation8 + $0x4] sm:$0xf] %vm108_vm1, %v134_v31 }
 0x179   :  { %224 = shalt.err (!%p221_p0)
}
 0x17a   :  { %s225_s27 = scalar_lea.hbm %s331_s3, 128 }
 0x17b   :  { %p226_p1 = scmp.ne.s32.totalorder %s331_s3, %s225_s27  ;;  %p229_p2 = scmp.lt.u32.totalorder %s225_s27, %s331_s3 }
 0x17d   :  { %p231_p3 = pnand %p229_p2, %p226_p1 }
 0x17f   :  { %234 = shalt.err (!%p231_p3)
}
 0x180   :  { %s247_s5 = smov 64   ;;  %s248_s6 = smov 4  }
 0x181   :  { %122 = dma.vmem_to_hbm [thread:$0]  %s117_s23, 128, %s331_s3, [#allocation4], %s247_s5, %s247_s5, %s248_s6  }
 0x182   :  { %239 = dma.done.wait [#allocation4], 128  }
 0x183   :  { %240 = vsyncadd [#allocation4], 4294967168 }
 0x184   :  { %126 = vsyncpa [#allocation3], 1 }
 0x185   :  { %127 = vsyncpa [#allocation6], 1 }
 0x186   :  { %128 = vsyncpa [#allocation4], 1 }

// kernel: closed_call.26
= control target key start
LH: loop header
LB: loop body
LE: loop exit
PB: predicated region body
PF: predicated region fallthrough
CT: control target
= control target key end

     0   :  { %13 = vsyncpa [#allocation6], 0  ;;  %s896_s0 = inlined_call_operand.hbm [shape: bf16[16,32], index: 0, kind: input, shape index: {}]   ;;  %s897_s1 = inlined_call_operand.hbm [shape: bf16[32,32], index: 1, kind: input, shape index: {}]   ;;  %s898_s2 = inlined_call_operand.hbm [shape: bf16[32,32], index: 2, kind: input, shape index: {}]   ;;  %s899_s3 = inlined_call_operand.hbm [shape: bf16[32,32], index: 3, kind: input, shape index: {}]   ;;  %s900_s4 = inlined_call_operand.hbm [shape: f32[3,32], index: 4, kind: input, shape index: {}]   ;;  %s901_s5 = inlined_call_operand.hbm [shape: bf16[16,32], index: 5, kind: output, shape index: {0}]   ;;  %s902_s6 = inlined_call_operand.hbm [shape: bf16[16,32], index: 6, kind: output, shape index: {1}]   ;;  %s903_s7 = inlined_call_operand.hbm [shape: bf16[16,32], index: 7, kind: output, shape index: {2}]  }
   0x1   :  { %14 = vsyncpa [#allocation9], 0 }
   0x2   :  { %15 = vsyncpa [#allocation12], 0 }
   0x3   :  { %16 = vsyncpa [#allocation7], 0 }
   0x4   :  { %17 = vsyncpa [#allocation16], 0  ;;  %s679_s24 = smov [#allocation8]   ;;  %s680_s26 = smov [#allocation11]  }
   0x5   :  { %s35_s25 = sshll.u32 %s679_s24, 4  ;;  %s59_s27 = sshll.u32 %s680_s26, 4  ;;  %s36_s25 = int_to_ptr.vmem [resolvable:$true] %s35_s25  ;;  %s731_s27 = int_to_ptr.vmem [resolvable:$true] %s59_s27 }
   0x6   :  { %s493_s30 = scalar_lea.hbm %s897_s1, 256 }
   0x7   :  { %p494_p0 = scmp.ne.s32.totalorder %s897_s1, %s493_s30  ;;  %p497_p1 = scmp.lt.u32.totalorder %s493_s30, %s897_s1 }
   0x9   :  { %p499_p2 = pnand %p497_p1, %p494_p0 }
   0xb   :  { %502 = shalt.err (!%p499_p2)
}
   0xc   :  { %s503_s12 = scalar_lea.vmem %s36_s25, 256  ;;  %p508_p4 = scmp.lt.s32.totalorder %s36_s25, %s36_s25 }
   0xd   :  { %p504_p3 = scmp.ne.s32.totalorder %s36_s25, %s503_s12  ;;  %p509_p5 = scmp.lt.s32.totalorder %s503_s12, %s503_s12 }
   0xf   :  { %p510_p6 = por %p509_p5, %p508_p4 }
  0x11   :  { %p511_p7 = pnand %p510_p6, %p504_p3 }
  0x13   :  { %514 = shalt.err (!%p511_p7)
}
  0x14   :  { %s681_s13 = smov 64   ;;  %s682_s14 = smov 4  }
  0x15   :  { %41 = dma.hbm_to_vmem [thread:$0]  %s897_s1, 256, %s36_s25, [#allocation9], %s681_s13, %s681_s13, %s682_s14  }
  0x16   :  { %s515_s19 = scalar_lea.hbm %s899_s3, 256 }
  0x17   :  { %p516_p8 = scmp.ne.s32.totalorder %s899_s3, %s515_s19  ;;  %p519_p9 = scmp.lt.u32.totalorder %s515_s19, %s899_s3 }
  0x19   :  { %p521_p10 = pnand %p519_p9, %p516_p8 }
  0x1b   :  { %524 = shalt.err (!%p521_p10)
}
  0x1c   :  { %s525_s24 = scalar_lea.vmem %s731_s27, 256  ;;  %p530_p12 = scmp.lt.s32.totalorder %s731_s27, %s731_s27 }
  0x1d   :  { %p526_p11 = scmp.ne.s32.totalorder %s731_s27, %s525_s24  ;;  %p531_p13 = scmp.lt.s32.totalorder %s525_s24, %s525_s24 }
  0x1f   :  { %p532_p0 = por %p531_p13, %p530_p12 }
  0x21   :  { %p533_p1 = pnand %p532_p0, %p526_p11 }
  0x23   :  { %536 = shalt.err (!%p533_p1)
}
  0x24   :  { %65 = dma.hbm_to_vmem [thread:$0]  %s899_s3, 256, %s731_s27, [#allocation12], %s681_s13, %s681_s13, %s682_s14  }
  0x25   :  { %s683_s26 = smov [#allocation5]   ;;  %s684_s29 = smov [#allocation10]  }
  0x26   :  { %s23_s28 = sshll.u32 %s683_s26, 4  ;;  %s47_s30 = sshll.u32 %s684_s29, 4  ;;  %s24_s28 = int_to_ptr.vmem [resolvable:$true] %s23_s28  ;;  %s768_s30 = int_to_ptr.vmem [resolvable:$true] %s47_s30 }
  0x27   :  { %s537_s10 = scalar_lea.hbm %s896_s0, 128 }
  0x28   :  { %p538_p2 = scmp.ne.s32.totalorder %s896_s0, %s537_s10  ;;  %p541_p3 = scmp.lt.u32.totalorder %s537_s10, %s896_s0 }
  0x2a   :  { %p543_p4 = pnand %p541_p3, %p538_p2 }
  0x2c   :  { %546 = shalt.err (!%p543_p4)
}
  0x2d   :  { %s547_s3 = scalar_lea.vmem %s24_s28, 128  ;;  %p552_p6 = scmp.lt.s32.totalorder %s24_s28, %s24_s28 }
  0x2e   :  { %p548_p5 = scmp.ne.s32.totalorder %s24_s28, %s547_s3  ;;  %p553_p7 = scmp.lt.s32.totalorder %s547_s3, %s547_s3 }
  0x30   :  { %p554_p8 = por %p553_p7, %p552_p6 }
  0x32   :  { %p555_p9 = pnand %p554_p8, %p548_p5 }
  0x34   :  { %558 = shalt.err (!%p555_p9)
}
  0x35   :  { %29 = dma.hbm_to_vmem [thread:$0]  %s896_s0, 128, %s24_s28, [#allocation6], %s681_s13, %s681_s13, %s682_s14  }
  0x36   :  { %s559_s20 = scalar_lea.hbm %s898_s2, 256 }
  0x37   :  { %p560_p10 = scmp.ne.s32.totalorder %s898_s2, %s559_s20  ;;  %p563_p11 = scmp.lt.u32.totalorder %s559_s20, %s898_s2 }
  0x39   :  { %p565_p12 = pnand %p563_p11, %p560_p10 }
  0x3b   :  { %568 = shalt.err (!%p565_p12)
}
  0x3c   :  { %s569_s1 = scalar_lea.vmem %s768_s30, 256  ;;  %p574_p0 = scmp.lt.s32.totalorder %s768_s30, %s768_s30 }
  0x3d   :  { %p570_p13 = scmp.ne.s32.totalorder %s768_s30, %s569_s1  ;;  %p575_p1 = scmp.lt.s32.totalorder %s569_s1, %s569_s1 }
  0x3f   :  { %p576_p2 = por %p575_p1, %p574_p0 }
  0x41   :  { %p577_p3 = pnand %p576_p2, %p570_p13 }
  0x43   :  { %580 = shalt.err (!%p577_p3)
}
  0x44   :  { %53 = dma.hbm_to_vmem [thread:$0]  %s898_s2, 256, %s768_s30, [#allocation9], %s681_s13, %s681_s13, %s682_s14  }
  0x45   :  { %s685_s26 = smov [#allocation13]   ;;  %s581_s9 = scalar_lea.hbm %s900_s4, 64 }
  0x46   :  { %s72_s28 = sshll.u32 %s685_s26, 4  ;;  %p582_p4 = scmp.ne.s32.totalorder %s900_s4, %s581_s9  ;;  %s73_s28 = int_to_ptr.vmem [resolvable:$true] %s72_s28 }
  0x47   :  { %p585_p5 = scmp.lt.u32.totalorder %s581_s9, %s900_s4 }
  0x49   :  { %p587_p6 = pnand %p585_p5, %p582_p4 }
  0x4b   :  { %590 = shalt.err (!%p587_p6)
}
  0x4c   :  { %s591_s16 = scalar_lea.vmem %s73_s28, 64  ;;  %p596_p8 = scmp.lt.s32.totalorder %s73_s28, %s73_s28 }
  0x4d   :  { %p592_p7 = scmp.ne.s32.totalorder %s73_s28, %s591_s16  ;;  %p597_p9 = scmp.lt.s32.totalorder %s591_s16, %s591_s16 }
  0x4f   :  { %p598_p10 = por %p597_p9, %p596_p8 }
  0x51   :  { %p599_p11 = pnand %p598_p10, %p592_p7 }
  0x53   :  { %602 = shalt.err (!%p599_p11)
}
  0x54   :  { %75 = dma.hbm_to_vmem [thread:$0]  %s900_s4, 64, %s73_s28, [#allocation12]  }
  0x55   :  { %669 = dma.done.wait [#allocation6], 128  }
  0x56   :  { %670 = vsyncadd [#allocation6], 4294967168 }
  0x57   :  { %671 = dma.done.wait [#allocation9], 512  }
  0x58   :  { %672 = vsyncadd [#allocation9], 4294966784 }
  0x59   :  { %673 = dma.done.wait [#allocation12], 320  }
  0x5a   :  { %674 = vsyncadd [#allocation12], 4294966976  ;;  %vm96_vm0 = vcmask 261120   ;;  %v686_v0 = vmov 0.0   ;;  %vm687_vm1 = vmmov 0   ;;  %v486_v1 = vld [vmem:[#allocation8] sm:$0xff]  }
  0x5b   :  { %450 = vmatprep.subr.bf16.mxu0 %v686_v0  ;;  %458 = vmatprep.subr.bf16.mxu1 %v686_v0  ;;  %97 = vst.msk [vmem:[#allocation2] sm:$0xff] %vm96_vm0, %v686_v0  ;;  %98 = vst.msk [vmem:[#allocation2 + $0x8] sm:$0xff] %vm96_vm0, %v686_v0  ;;  %v487_v2 = vld [vmem:[#allocation8 + $0x8] sm:$0xff]   ;;  %v488_v3 = vld [vmem:[#allocation10] sm:$0xff]   ;;  %vm325_vm2 = vcmask 257024   ;;  %s688_s4 = smov [#allocation15]  }
  0x5c   :  { %99 = vst.msk [vmem:[#allocation3] sm:$0xff] %vm96_vm0, %v686_v0  ;;  %100 = vst.msk [vmem:[#allocation3 + $0x8] sm:$0xff] %vm96_vm0, %v686_v0  ;;  %454 = vmatprep.mubr.msk.bf16.mxu0 %vm687_vm1, %v686_v0  ;;  %462 = vmatprep.mubr.msk.bf16.mxu1 %vm687_vm1, %v686_v0  ;;  %v489_v4 = vld [vmem:[#allocation5] sm:$0xff]   ;;  %v490_v6 = vld [vmem:[#allocation11] sm:$0xff]   ;;  %s383_s3 = sshll.u32 %s688_s4, 4  ;;  %s689_s27 = smov [#allocation14]   ;;  %s384_s3 = int_to_ptr.vmem [resolvable:$true] %s383_s3 }
  0x5d   :  { %101 = vst.msk [vmem:[#allocation4] sm:$0xff] %vm96_vm0, %v686_v0  ;;  %102 = vst.msk [vmem:[#allocation4 + $0x8] sm:$0xff] %vm96_vm0, %v686_v0  ;;  %451 = vmatpush3.bf16.msra.mxu0 %v486_v1  ;;  %459 = vmatpush3.bf16.msra.mxu1 %v488_v3  ;;  %v491_v5 = vld [vmem:[#allocation10 + $0x8] sm:$0xff]   ;;  %v492_v7 = vld [vmem:[#allocation11 + $0x8] sm:$0xff]   ;;  %s371_s17 = sshll.u32 %s689_s27, 4  ;;  %s690_s18 = smov [#allocation17]   ;;  %s837_s17 = int_to_ptr.vmem [resolvable:$true] %s371_s17 }
  0x5e   :  { %452 = vmatprep.subr.bf16.mxu0 %v686_v0  ;;  %460 = vmatprep.subr.bf16.mxu1 %v686_v0  ;;  %v426_v27 = vld [vmem:[#allocation13] ss:$0 sm:$0xff]  ;;  %v429_v31 = vld [vmem:[#allocation13 + $0x1] ss:$0 sm:$0xff]  ;;  %v432_v46 = vld [vmem:[#allocation13 + $0x2] ss:$0 sm:$0xff]  ;;  %p608_p13 = scmp.lt.s32.totalorder %s384_s3, %s384_s3 }
  0x5f   :  { %s841_s19 = sshll.u32 %s690_s18, 4  ;;  %s603_s20 = scalar_lea.vmem %s384_s3, 128  ;;  %s396_s19 = int_to_ptr.vmem [resolvable:$true] %s841_s19 }
  0x60   :  { %p604_p12 = scmp.ne.s32.totalorder %s384_s3, %s603_s20  ;;  %p609_p0 = scmp.lt.s32.totalorder %s603_s20, %s603_s20 }
  0x61   :  { %453 = vmatpush3.bf16.msra.mxu0 %v487_v2  ;;  %461 = vmatpush3.bf16.msra.mxu1 %v491_v5 }
  0x62   :  { %466 = vmatprep.subr.bf16.mxu0 %v686_v0  ;;  %v105_v8 = vld [vmem:[#allocation2] sm:$0xff]  ;;  %v106_v10 = vld [vmem:[#allocation2 + $0x8] sm:$0xff]  ;;  %p610_p1 = por %p609_p0, %p608_p13 }
  0x63   :  { %v177_v11 = vld [vmem:[#allocation3] sm:$0xff]  ;;  %v178_v16 = vld [vmem:[#allocation3 + $0x8] sm:$0xff] }
  0x64   :  { %455 = vmatmul.mubr.msk.bf16.vlgmr.msra.gmra.mrb[0].mxu0 %vm96_vm0, %v489_v4  ;;  %463 = vmatmul.mubr.msk.bf16.vlgmr.msra.gmra.mrb[0].mxu1 %vm96_vm0, %v489_v4  ;;  %v240_v24 = vld [vmem:[#allocation4] sm:$0xff]  ;;  %v241_v26 = vld [vmem:[#allocation4 + $0x8] sm:$0xff]  ;;  %p611_p2 = pnand %p610_p1, %p604_p12 }
  0x65   :  { %467 = vmatpush3.bf16.msra.mxu0 %v490_v6  ;;  %470 = vmatprep.mubr.msk.bf16.mxu0 %vm687_vm1, %v686_v0 }
  0x66   :  { %468 = vmatprep.subr.bf16.mxu0 %v686_v0 }
  0x69   :  { %469 = vmatpush3.bf16.msra.mxu0 %v492_v7 }
  0x6c   :  { %471 = vmatmul.mubr.msk.bf16.vlgmr.msra.gmra.mrb[4].mxu0 %vm96_vm0, %v489_v4 }
 0x137   :  { %v166_v9 = vpop.f32.mrb[0].mxu0  ;;  %v229_v15 = vpop.f32.mrb[0].mxu1 }
 0x138   :  { %v173_v12 = vadd.f32 %v166_v9, %v105_v8  ;;  %v456_v13 = vpop.f32.mrb[1].mxu0  ;;  %v236_v19 = vadd.f32 %v229_v15, %v177_v11  ;;  %v464_v20 = vpop.f32.mrb[1].mxu1 }
 0x139   :  { %v169_v14 = vpop.f32.mrb[2].mxu0  ;;  %v232_v21 = vpop.f32.mrb[2].mxu1 }
 0x13a   :  { %175 = vst.msk [vmem:[#allocation2] sm:$0xff] %vm96_vm0, %v173_v12  ;;  %v174_v17 = vadd.f32 %v169_v14, %v106_v10  ;;  %v457_v18 = vpop.f32.mrb[3].mxu0  ;;  %238 = vst.msk [vmem:[#allocation3] sm:$0xff] %vm96_vm0, %v236_v19  ;;  %v237_v22 = vadd.f32 %v232_v21, %v178_v16  ;;  %v465_v23 = vpop.f32.mrb[3].mxu1 }
 0x13c   :  { %176 = vst.msk [vmem:[#allocation2 + $0x8] sm:$0xff] %vm96_vm0, %v174_v17  ;;  %239 = vst.msk [vmem:[#allocation3 + $0x8] sm:$0xff] %vm96_vm0, %v237_v22 }
 0x13f   :  { %v292_v25 = vpop.f32.mrb[4].mxu0 }
 0x140   :  { %v299_v28 = vadd.f32 %v292_v25, %v240_v24  ;;  %v472_v29 = vpop.f32.mrb[5].mxu0 }
 0x141   :  { %v295_v30 = vpop.f32.mrb[6].mxu0  ;;  %v306_v32 = vld [vmem:[#allocation2] sm:$0xff]  ;;  %v328_v36 = vld [vmem:[#allocation3] sm:$0xff] }
 0x142   :  { %301 = vst.msk [vmem:[#allocation4] sm:$0xff] %vm96_vm0, %v299_v28  ;;  %v300_v33 = vadd.f32 %v295_v30, %v241_v26  ;;  %v473_v34 = vpop.f32.mrb[7].mxu0  ;;  %v313_v35 = vadd.f32 %v426_v27, %v306_v32  ;;  %v335_v38 = vadd.f32 %v429_v31, %v328_v36 }
 0x143   :  { %v307_v37 = vld [vmem:[#allocation2 + $0x8] sm:$0xff]  ;;  %v329_v41 = vld [vmem:[#allocation3 + $0x8] sm:$0xff] }
 0x144   :  { %302 = vst.msk [vmem:[#allocation4 + $0x8] sm:$0xff] %vm96_vm0, %v300_v33  ;;  %v314_v39 = vadd.f32 %v426_v27, %v307_v37  ;;  %v315_v40 = vmul.f32 0.35355338, %v313_v35  ;;  %v336_v42 = vadd.f32 %v429_v31, %v329_v41  ;;  %v437_v43 = vpack.c.bf16 %v335_v38, %v335_v38 }
 0x146   :  { %v316_v44 = vmul.f32 0.35355338, %v314_v39  ;;  %v435_v45 = vpack.c.bf16 %v315_v40, %v315_v40  ;;  %v438_v47 = vpack.c.bf16 %v336_v42, %v336_v42  ;;  %345 = vst.msk [vmem:[#allocation15] sm:$0xf] %vm325_vm2, %v437_v43 }
 0x148   :  { %v436_v48 = vpack.c.bf16 %v316_v44, %v316_v44  ;;  %326 = vst.msk [vmem:[#allocation14] sm:$0xf] %vm325_vm2, %v435_v45  ;;  %346 = vst.msk [vmem:[#allocation15 + $0x4] sm:$0xf] %vm325_vm2, %v438_v47 }
 0x149   :  { %v347_v49 = vld [vmem:[#allocation4] sm:$0xff] }
 0x14a   :  { %327 = vst.msk [vmem:[#allocation14 + $0x4] sm:$0xf] %vm325_vm2, %v436_v48  ;;  %v354_v50 = vadd.f32 %v432_v46, %v347_v49 }
 0x14b   :  { %614 = shalt.err (!%p611_p2)
}
 0x14c   :  { %s615_s23 = scalar_lea.hbm %s902_s6, 128 }
 0x14d   :  { %p616_p3 = scmp.ne.s32.totalorder %s902_s6, %s615_s23  ;;  %p619_p4 = scmp.lt.u32.totalorder %s615_s23, %s902_s6 }
 0x14f   :  { %p621_p5 = pnand %p619_p4, %p616_p3 }
 0x151   :  { %624 = shalt.err (!%p621_p5)
}
 0x152   :  { %389 = dma.vmem_to_hbm [thread:$0]  %s384_s3, 128, %s902_s6, [#allocation16], %s681_s13, %s681_s13, %s682_s14   ;;  %v348_v51 = vld [vmem:[#allocation4 + $0x8] sm:$0xff] }
 0x153   :  { %s625_s29 = scalar_lea.vmem %s837_s17, 128  ;;  %p630_p7 = scmp.lt.s32.totalorder %s837_s17, %s837_s17 }
 0x154   :  { %p626_p6 = scmp.ne.s32.totalorder %s837_s17, %s625_s29  ;;  %p631_p8 = scmp.lt.s32.totalorder %s625_s29, %s625_s29 }
 0x156   :  { %p632_p9 = por %p631_p8, %p630_p7 }
 0x158   :  { %p633_p10 = pnand %p632_p9, %p626_p6 }
 0x15a   :  { %636 = shalt.err (!%p633_p10)
}
 0x15b   :  { %s637_s10 = scalar_lea.hbm %s901_s5, 128 }
 0x15c   :  { %p638_p11 = scmp.ne.s32.totalorder %s901_s5, %s637_s10  ;;  %p641_p12 = scmp.lt.u32.totalorder %s637_s10, %s901_s5 }
 0x15e   :  { %p643_p13 = pnand %p641_p12, %p638_p11 }
 0x160   :  { %646 = shalt.err (!%p643_p13)
}
 0x161   :  { %377 = dma.vmem_to_hbm [thread:$0]  %s837_s17, 128, %s901_s5, [#allocation7], %s681_s13, %s681_s13, %s682_s14   ;;  %v355_v52 = vadd.f32 %v432_v46, %v348_v51  ;;  %v439_v53 = vpack.c.bf16 %v354_v50, %v354_v50 }
 0x162   :  { %s647_s30 = scalar_lea.vmem %s396_s19, 128  ;;  %p652_p1 = scmp.lt.s32.totalorder %s396_s19, %s396_s19 }
 0x163   :  { %v440_v54 = vpack.c.bf16 %v355_v52, %v355_v52  ;;  %364 = vst.msk [vmem:[#allocation17] sm:$0xf] %vm325_vm2, %v439_v53  ;;  %p648_p0 = scmp.ne.s32.totalorder %s396_s19, %s647_s30  ;;  %p653_p2 = scmp.lt.s32.totalorder %s647_s30, %s647_s30 }
 0x165   :  { %365 = vst.msk [vmem:[#allocation17 + $0x4] sm:$0xf] %vm325_vm2, %v440_v54  ;;  %p654_p3 = por %p653_p2, %p652_p1 }
 0x167   :  { %p655_p4 = pnand %p654_p3, %p648_p0 }
 0x169   :  { %658 = shalt.err (!%p655_p4)
}
 0x16a   :  { %s659_s27 = scalar_lea.hbm %s903_s7, 128 }
 0x16b   :  { %p660_p5 = scmp.ne.s32.totalorder %s903_s7, %s659_s27  ;;  %p663_p6 = scmp.lt.u32.totalorder %s659_s27, %s903_s7 }
 0x16d   :  { %p665_p7 = pnand %p663_p6, %p660_p5 }
 0x16f   :  { %668 = shalt.err (!%p665_p7)
}
 0x170   :  { %401 = dma.vmem_to_hbm [thread:$0]  %s396_s19, 128, %s903_s7, [#allocation16], %s681_s13, %s681_s13, %s682_s14  }
 0x171   :  { %675 = dma.done.wait [#allocation7], 128  }
 0x172   :  { %676 = vsyncadd [#allocation7], 4294967168 }
 0x173   :  { %677 = dma.done.wait [#allocation16], 256  }
 0x174   :  { %678 = vsyncadd [#allocation16], 4294967040 }
 0x175   :  { %411 = vsyncpa [#allocation6], 1 }
 0x176   :  { %412 = vsyncpa [#allocation9], 1 }
 0x177   :  { %413 = vsyncpa [#allocation12], 1 }
 0x178   :  { %414 = vsyncpa [#allocation7], 1 }
 0x179   :  { %415 = vsyncpa [#allocation16], 1 }

// kernel: closed_call.27
= control target key start
LH: loop header
LB: loop body
LE: loop exit
PB: predicated region body
PF: predicated region fallthrough
CT: control target
= control target key end

     0   :  { %s1790_s0 = inlined_call_operand.hbm [shape: f32[2,1,8], index: 0, kind: input, shape index: {}]   ;;  %s1791_s1 = inlined_call_operand.hbm [shape: bf16[16,32], index: 1, kind: input, shape index: {}]   ;;  %s1792_s2 = inlined_call_operand.hbm [shape: bf16[16,32], index: 2, kind: input, shape index: {}]   ;;  %s1793_s3 = inlined_call_operand.hbm [shape: bf16[16,32], index: 3, kind: input, shape index: {}]   ;;  %s1794_s4 = inlined_call_operand.hbm [shape: bf16[16,32], index: 4, kind: output, shape index: {}]  }
   0x1   :  { %1802 = sst [smem:[#allocation19_spill]] %s1791_s1 }
   0x2   :  { %9 = vsyncpa [#allocation3], 0 }
   0x3   :  { %11 = vsyncpa [#allocation3 + $0x1], 0 }
   0x4   :  { %12 = vsyncpa [#allocation6], 0 }
   0x5   :  { %14 = vsyncpa [#allocation6 + $0x1], 0 }
   0x6   :  { %15 = vsyncpa [#allocation9], 0 }
   0x7   :  { %17 = vsyncpa [#allocation9 + $0x1], 0 }
   0x8   :  { %18 = vsyncpa [#allocation4], 0 }
   0x9   :  { %20 = vsyncpa [#allocation4 + $0x1], 0  ;;  %s1427_s15 = smov 0   ;;  %s1429_s16 = smov 0  }
   0xa   :  { %s1431_s17 = smov 0   ;;  %s1433_s18 = smov 0  }
   0xb   :  { %s1435_s19 = smov 0   ;;  %s1437_s20 = smov 0  }
   0xc LB: > { %1803 = sst [smem:[#allocation15_spill]] %s1375_s17  ;;  %s1458_s21 = sadd.s32 4294967295, %s1387_s20   ;;  %s1387_s20 = sphi %s1437_s20, %s26_s20   ;;  %s1383_s19 = sphi %s1435_s19, %s1828_s19   ;;  %s1379_s18 = sphi %s1433_s18, %s1827_s18   ;;  %s1375_s17 = sphi %s1431_s17, %s1826_s17   ;;  %s1371_s16 = sphi %s1429_s16, %s1830_s16   ;;  %s1367_s15 = sphi %s1427_s15, %s1829_s15  }
   0xd   : > { %1804 = sst [smem:[#allocation16_spill]] %s1383_s19  ;;  %s978_s22 = sadd.s32 4294967294, %s1387_s20  }
   0xe   : > { %s38_s23 = sadd.s32 1, %s1383_s19  ;;  %s45_s24 = sadd.s32 1, %s1375_s17 }
   0xf   : > { %p40_p0 = scmp.ge.s32.totalorder %s38_s23, 2  ;;  %p52_p1 = scmp.ne.s32.totalorder %s1375_s17, %s1371_s16 }
  0x10   : > { %p53_p2 = scmp.eq.s32.totalorder %s1387_s20, 0  ;;  %p58_p3 = scmp.ne.s32.totalorder %s1371_s16, %s1367_s15 }
  0x11   : > { %s1832_s23 = smov (%p40_p0, %s38_s23), 0  ;;  %p59_p5 = scmp.eq.s32.totalorder %s1458_s21, 0 }
  0x12   : > { %1805 = sst [smem:[#allocation17_spill]] %s1832_s23  ;;  %p1470_p4 = por %p53_p2, %p52_p1 }
  0x13   : > { %s42_s26 = ssub.s32 %s1383_s19, %s1832_s23  ;;  %p168_p6 = scmp.eq.s32.totalorder %s1458_s21, 1 }
  0x14   : > { %p43_p7 = scmp.eq.s32.totalorder %s42_s26, 0  ;;  %p1478_p8 = por %p59_p5, %p58_p3 }
  0x15   : > { %p1482_p9 = por %p168_p6, %p52_p1  ;;  %p174_p10 = scmp.eq.s32.totalorder %s978_s22, 1 }
  0x16   : > { %s1807_s27 = scalar_select %p1478_p8, 1, 0 }
  0x17   : > { %s1808_s28 = scalar_select %p1482_p9, 1, 0 }
  0x18   : > { %s1487_s29 = scalar_select %p43_p7, %s1375_s17, %s45_s24  }
  0x19   : > { %p1489_p11 = por %p174_p10, %p58_p3  ;;  %p1100_p13 = scmp.lt.s32.totalorder %s1387_s20, 2 }
  0x1a   : > { %1809 = sst [smem:[#allocation18_spill]] %s1487_s29  ;;  %s1496_s5 = sand.u32 1, %s1375_s17  }
  0x1b   : > { %s1810_s30 = scalar_select %p1489_p11, 1, 0 }
  0x1c   : > { %s211_s6 = sand.u32 1, %s1387_s20   ;;  %s1500_s7 = sshll.u32 %s1496_s5, 2 }
  0x1d   : > { %p1504_p0 = pnand %p1100_p13, %p1470_p4  ;;  %s1509_s9 = sshll.u32 %s1383_s19, 6 }
  0x1e   : > { %s1812_s1 = sld [smem:[#allocation19_spill]]  ;;  %s215_s13 = scalar_lea.vmem [#allocation5], %s1500_s7 }
  0x1f   : > { %s1811_s8 = scalar_select %p1504_p0, 1, 0 }
  0x20   : > { %s223_s14 = sshll.u32 %s215_s13, 4  ;;  %s1522_s22 = scalar_lea.sflag [#allocation6], %s211_s6  ;;  %s1519_s14 = int_to_ptr.vmem [resolvable:$true] %s223_s14 }
  0x21   : > { %p1528_p4 = pneg %p1504_p0 }
  0x24   : > { %s1515_s12 = scalar_lea.hbm %s1812_s1, %s1509_s9  ;;  %s1182_s11 = scalar_lea.hbm %s1812_s1, 128 }
  0x25   : > { %s1177_s24 = scalar_lea.hbm %s1515_s12, 64  ;;  %p1183_p7 = scmp.lt.u32.totalorder %s1515_s12, %s1812_s1 }
  0x26   : > { %p1178_p3 = scmp.ne.s32.totalorder %s1515_s12, %s1177_s24  ;;  %p1184_p10 = scmp.lt.u32.totalorder %s1182_s11, %s1177_s24 }
  0x27   : > { %p1186_p12 = scmp.lt.u32.totalorder %s1177_s24, %s1515_s12 }
  0x28   : > { %p1180_p5 = pnand %p1528_p4, %p1178_p3  ;;  %p1185_p13 = por %p1184_p10, %p1183_p7 }
  0x2a   : > { %p1181_p6 = pneg %p1180_p5  ;;  %p1187_p1 = por %p1186_p12, %p1185_p13 }
  0x2c   : > { %p1188_p2 = pnand %p1187_p1, %p1181_p6 }
  0x2e   : > { %1191 = shalt.err (!%p1188_p2)
}
  0x2f   : > { %s1192_s6 = scalar_lea.vmem %s1519_s14, 64  ;;  %s1389_s26 = smov [#allocation5]  }
  0x30   : > { %p1193_p3 = scmp.ne.s32.totalorder %s1519_s14, %s1192_s6  ;;  %s1197_s10 = sshll.u32 %s1389_s26, 4  ;;  %s1198_s10 = int_to_ptr.vmem [resolvable:$false] %s1197_s10 }
  0x31   : > { %s1199_s23 = scalar_lea.vmem %s1198_s10, 128  ;;  %p1200_p9 = scmp.lt.s32.totalorder %s1519_s14, %s1198_s10 }
  0x32   : > { %p1195_p5 = pnand %p1193_p3, %p1528_p4  ;;  %p1201_p8 = scmp.lt.s32.totalorder %s1199_s23, %s1192_s6 }
  0x34   : > { %p1196_p11 = pneg %p1195_p5  ;;  %p1202_p7 = por %p1201_p8, %p1200_p9 }
  0x36   : > { %p1203_p10 = pnand %p1202_p7, %p1196_p11 }
  0x38   : > { %1206 = shalt.err (!%p1203_p10)
}
  0x39   : > { %1089 = dma.hbm_to_vmem [thread:$0]  (!%p1504_p0), %s1515_s12, 64, %s1519_s14, %s1522_s22  }
  0x3a   : > { %p1814_p12 = scmp.lt.s32.totalorder %s1387_s20, 3  ;;  %p1815_p1 = scmp.ge.s32.totalorder %s1387_s20, 1 }
  0x3b   : > { %s981_s11 = sshll.u32 %s1383_s19, 4  ;;  %s197_s10 = scalar_lea.vmem [#allocation2], %s1496_s5 }
  0x3c   : > { %p1556_p2 = pnand %p1815_p1, %p1814_p12  ;;  %s1564_s26 = scalar_lea.hbm %s1790_s0, %s981_s11 }
  0x3d   : > { %s204_s23 = sshll.u32 %s197_s10, 4  ;;  %s195_s12 = scalar_lea.sflag [#allocation3], %s1496_s5  ;;  %s205_s23 = int_to_ptr.vmem [resolvable:$true] %s204_s23 }
  0x3e   : > { %s1816_s24 = scalar_select %p1556_p2, 1, 0 }
  0x3f   : > { %s1207_s14 = scalar_lea.hbm %s1564_s26, 16  ;;  %s1212_s29 = scalar_lea.hbm %s1790_s0, 32 }
  0x40   : > { %p1208_p8 = scmp.ne.s32.totalorder %s1564_s26, %s1207_s14  ;;  %p1213_p6 = scmp.lt.u32.totalorder %s1564_s26, %s1790_s0 }
  0x41   : > { %p1214_p13 = scmp.lt.u32.totalorder %s1212_s29, %s1207_s14  ;;  %p1216_p5 = scmp.lt.u32.totalorder %s1207_s14, %s1564_s26 }
  0x42   : > { %p1210_p9 = pnand %p1208_p8, %p1528_p4 }
  0x43   : > { %p1215_p3 = por %p1214_p13, %p1213_p6 }
  0x44   : > { %p1211_p11 = pneg %p1210_p9 }
  0x45   : > { %p1217_p7 = por %p1216_p5, %p1215_p3 }
  0x47   : > { %p1218_p10 = pnand %p1217_p7, %p1211_p11 }
  0x49   : > { %1221 = shalt.err (!%p1218_p10)
}
  0x4a   : > { %s1222_s6 = scalar_lea.vmem %s205_s23, 16  ;;  %s1390_s10 = smov [#allocation2]  }
  0x4b   : > { %p1223_p12 = scmp.ne.s32.totalorder %s205_s23, %s1222_s6  ;;  %s1227_s17 = sshll.u32 %s1390_s10, 4  ;;  %s1228_s17 = int_to_ptr.vmem [resolvable:$false] %s1227_s17 }
  0x4c   : > { %s1229_s1 = scalar_lea.vmem %s1228_s17, 32  ;;  %p1230_p9 = scmp.lt.s32.totalorder %s205_s23, %s1228_s17 }
  0x4d   : > { %p1225_p1 = pnand %p1223_p12, %p1528_p4  ;;  %p1231_p2 = scmp.lt.s32.totalorder %s1229_s1, %s1222_s6 }
  0x4f   : > { %p1226_p8 = pneg %p1225_p1  ;;  %p1232_p0 = por %p1231_p2, %p1230_p9 }
  0x51   : > { %p1233_p6 = pnand %p1232_p0, %p1226_p8 }
  0x53   : > { %1236 = shalt.err (!%p1233_p6)
}
  0x54   : > { %p1817_p13 = scmp.ne.s32.totalorder %s1811_s8, 0  ;;  %s1589_s14 = scalar_lea.hbm %s1792_s2, %s1509_s9 }
  0x55   : > { %s234_s17 = scalar_lea.vmem [#allocation7], %s1500_s7  ;;  %s1237_s11 = scalar_lea.hbm %s1589_s14, 64 }
  0x56   : > { %1086 = dma.hbm_to_vmem [thread:$0]  (!%p1817_p13), %s1564_s26, 16, %s205_s23, %s195_s12  }
  0x57   : > { %s242_s13 = sshll.u32 %s234_s17, 4  ;;  %p1238_p0 = scmp.ne.s32.totalorder %s1589_s14, %s1237_s11  ;;  %s243_s13 = int_to_ptr.vmem [resolvable:$true] %s242_s13 }
  0x58   : > { %s1242_s26 = scalar_lea.hbm %s1792_s2, 128  ;;  %p1243_p3 = scmp.lt.u32.totalorder %s1589_s14, %s1792_s2 }
  0x59   : > { %p1240_p2 = pnand %p1238_p0, %p1528_p4  ;;  %p1244_p5 = scmp.lt.u32.totalorder %s1242_s26, %s1237_s11 }
  0x5a   : > { %p1246_p10 = scmp.lt.u32.totalorder %s1237_s11, %s1589_s14 }
  0x5b   : > { %p1241_p11 = pneg %p1240_p2  ;;  %p1245_p7 = por %p1244_p5, %p1243_p3 }
  0x5d   : > { %p1247_p12 = por %p1246_p10, %p1245_p7 }
  0x5f   : > { %p1248_p1 = pnand %p1247_p12, %p1241_p11 }
  0x61   : > { %1251 = shalt.err (!%p1248_p1)
}
  0x62   : > { %s1252_s1 = scalar_lea.vmem %s243_s13, 64  ;;  %s1391_s19 = smov [#allocation7]  }
  0x63   : > { %p1253_p8 = scmp.ne.s32.totalorder %s243_s13, %s1252_s1  ;;  %s1257_s29 = sshll.u32 %s1391_s19, 4  ;;  %s1258_s29 = int_to_ptr.vmem [resolvable:$false] %s1257_s29 }
  0x64   : > { %s1259_s17 = scalar_lea.vmem %s1258_s29, 128  ;;  %p1260_p0 = scmp.lt.s32.totalorder %s243_s13, %s1258_s29 }
  0x65   : > { %p1255_p9 = pnand %p1253_p8, %p1528_p4  ;;  %p1261_p2 = scmp.lt.s32.totalorder %s1259_s17, %s1252_s1 }
  0x67   : > { %p1256_p6 = pneg %p1255_p9  ;;  %p1262_p13 = por %p1261_p2, %p1260_p0 }
  0x69   : > { %p1263_p3 = pnand %p1262_p13, %p1256_p6 }
  0x6b   : > { %1266 = shalt.err (!%p1263_p3)
}
  0x6c   : > { %p1818_p5 = scmp.ne.s32.totalorder %s1811_s8, 0  ;;  %s1614_s10 = scalar_lea.hbm %s1793_s3, %s1509_s9 }
  0x6d   : > { %s253_s26 = scalar_lea.vmem [#allocation8], %s1500_s7  ;;  %s250_s12 = scalar_lea.sflag [#allocation9], %s1496_s5 }
  0x6e   : > { %1092 = dma.hbm_to_vmem [thread:$0]  (!%p1818_p5), %s1589_s14, 64, %s243_s13, %s1522_s22  }
  0x6f   : > { %s261_s23 = sshll.u32 %s253_s26, 4  ;;  %s1267_s1 = scalar_lea.hbm %s1614_s10, 64  ;;  %s262_s23 = int_to_ptr.vmem [resolvable:$true] %s261_s23 }
  0x70   : > { %p1268_p13 = scmp.ne.s32.totalorder %s1614_s10, %s1267_s1  ;;  %s1272_s14 = scalar_lea.hbm %s1793_s3, 128 }
  0x71   : > { %p1273_p10 = scmp.lt.u32.totalorder %s1614_s10, %s1793_s3  ;;  %p1274_p12 = scmp.lt.u32.totalorder %s1272_s14, %s1267_s1 }
  0x72   : > { %p1270_p11 = pnand %p1268_p13, %p1528_p4  ;;  %p1276_p8 = scmp.lt.u32.totalorder %s1267_s1, %s1614_s10 }
  0x73   : > { %p1275_p1 = por %p1274_p12, %p1273_p10 }
  0x74   : > { %p1271_p7 = pneg %p1270_p11 }
  0x75   : > { %p1277_p9 = por %p1276_p8, %p1275_p1 }
  0x77   : > { %p1278_p6 = pnand %p1277_p9, %p1271_p7 }
  0x79   : > { %1281 = shalt.err (!%p1278_p6)
}
  0x7a   : > { %s1282_s5 = scalar_lea.vmem %s262_s23, 64  ;;  %s1392_s7 = smov [#allocation8]  }
  0x7b   : > { %p1283_p0 = scmp.ne.s32.totalorder %s262_s23, %s1282_s5  ;;  %s1287_s29 = sshll.u32 %s1392_s7, 4  ;;  %s1288_s29 = int_to_ptr.vmem [resolvable:$false] %s1287_s29 }
  0x7c   : > { %s1289_s17 = scalar_lea.vmem %s1288_s29, 128  ;;  %p1290_p13 = scmp.lt.s32.totalorder %s262_s23, %s1288_s29 }
  0x7d   : > { %p1285_p2 = pnand %p1283_p0, %p1528_p4  ;;  %p1291_p11 = scmp.lt.s32.totalorder %s1289_s17, %s1282_s5 }
  0x7f   : > { %p1286_p3 = pneg %p1285_p2  ;;  %p1292_p5 = por %p1291_p11, %p1290_p13 }
  0x81   : > { %p1293_p10 = pnand %p1292_p5, %p1286_p3 }
  0x83   : > { %1296 = shalt.err (!%p1293_p10)
}
  0x84   : > { %p1819_p12 = scmp.ne.s32.totalorder %s1811_s8, 0  ;;  %p1820_p7 = scmp.ne.s32.totalorder %s1816_s24, 0 }
  0x85   : > { %s1638_s25 = sand.u32 (!%p1820_p7), 1, %s1371_s16   ;;  %p1821_p4 = scmp.ne.s32.totalorder (!%p1820_p7), %s1807_s27, 0 }
  0x86   : > { %1095 = dma.hbm_to_vmem [thread:$0]  (!%p1819_p12), %s1614_s10, 64, %s262_s23, %s250_s12  }
  0x87   : > { %270 = sbr.rel (%p1820_p7) target bundleno = 1624 (0x658), region = 36  ;;  %s273_s11 = scalar_lea.sflag (!%p1820_p7), [#allocation3], %s1638_s25 }
  0x88   : > { %s275_s6 = scalar_lea.vmem (!%p1820_p7), [#allocation2], %s1638_s25 }
  0x8e   : > { %1350 = dma.done.wait (%p1821_p4), %s273_s11, 16  }
  0x8f   : > { %1352 = vsyncadd (%p1821_p4), %s273_s11, 4294967280  ;;  %s280_s8 = sand.u32 1, %s1458_s21   ;;  %s1648_s10 = sshll.u32 %s1638_s25, 2 }
  0x90   : > { %s281_s24 = scalar_lea.sflag [#allocation6], %s280_s8  ;;  %s284_s26 = scalar_lea.vmem [#allocation5], %s1648_s10 }
  0x91   : > { %1354 = dma.done.wait (%p1821_p4), %s281_s24, 128  }
  0x92   : > { %1356 = vsyncadd (%p1821_p4), %s281_s24, 4294967168  ;;  %s293_s23 = scalar_lea.vmem [#allocation7], %s1648_s10  ;;  %s299_s12 = scalar_lea.sflag [#allocation9], %s1638_s25 }
  0x93   : > { %s302_s1 = scalar_lea.vmem [#allocation8], %s1648_s10 }
  0x94   : > { %1358 = dma.done.wait (%p1821_p4), %s299_s12, 64  }
  0x95   : > { %1360 = vsyncadd (%p1821_p4), %s299_s12, 4294967232  ;;  %v1393_v0 = vmov 0.0   ;;  %vm1394_vm0 = vmmov 0   ;;  %vm352_vm1 = vcmask 64512   ;;  %v344_v1 = vld [vmem:[%s293_s23] sm:$0xf] }
  0x96   : > { %1025 = vmatprep.subr.bf16.mxu0 %v1393_v0  ;;  %1027 = vmatprep.mubr.msk.bf16.mxu0 %vm1394_vm0, %v1393_v0  ;;  %v357_v2 = vsel %vm352_vm1, %v344_v1, 0  ;;  %v343_v3 = vld [vmem:[%s284_s26] sm:$0xf]  ;;  %v1673_v4 = vld [vmem:[%s275_s6] ss:$0 sm:$0xff]  ;;  %v997_v11 = vcombine.low %v344_v1, %v344_v1  ;;  %s1395_s21 = smov 120  }
  0x97   : > { %1031 = vmatprep.subr.bf16.mxu1 %v1393_v0  ;;  %1033 = vmatprep.mubr.msk.bf16.mxu1 %vm1394_vm0, %v1393_v0  ;;  %v996_v12 = vcombine.low %v343_v3, %v343_v3  ;;  %s1396_s27 = smov 112   ;;  %s1397_s19 = smov 104   ;;  %v1685_v18 = vld [vmem:[%s302_s1] sm:$0xf]  ;;  %vm414_vm2 = vcmask 1043456   ;;  %vm810_vm3 = vcmask 130048  }
  0x98   : > { %1026 = vmatpush3.bf16.xpose.msra.mxu0 %v357_v2  ;;  %466 = vrot.lane.b32.xlu1 %v997_v11, %s1395_s21  ;;  %v416_v19 = vsel %vm414_vm2, %v1685_v18, 0  ;;  %v999_v2 = vcombine.low %v1685_v18, %v1685_v18  ;;  %s1398_s22 = smov 8   ;;  %s1399_s14 = smov 16   ;;  %vm812_vm4 = vcmask 195584   ;;  %vm815_vm5 = vcmask 257024  }
  0x99   : > { %1043 = vmatprep.subr.bf16.mxu0 %v1393_v0  ;;  %1032 = vmatpush3.bf16.msra.mxu1 %v416_v19  ;;  %s1400_s13 = smov 24   ;;  %s1006_s9 = sshll.u32 %s1379_s18, 6 }
  0x9a   : > { %1037 = vmatprep.subr.bf16.mxu1 %v1393_v0  ;;  %s340_s5 = scalar_lea.vmem [#allocation10], %s1648_s10  ;;  %s1741_s11 = scalar_lea.hbm %s1794_s4, %s1006_s9 }
  0x9b   : > { %s832_s7 = sshll.u32 %s340_s5, 4  ;;  %s818_s6 = scalar_lea.sflag [#allocation4], %s1638_s25  ;;  %s1743_s7 = int_to_ptr.vmem [resolvable:$true] %s832_s7 }
  0x9c   : > { %461 = vrot.lane.b32.xlu1 %v996_v12, %s1395_s21  ;;  %s1297_s18 = scalar_lea.vmem %s1743_s7, 64  ;;  %p1822_p1 = scmp.ne.s32.totalorder %s1808_s28, 0 }
  0x9d   : > { %p1298_p5 = scmp.ne.s32.totalorder %s1743_s7, %s1297_s18  ;;  %s1401_s8 = smov [#allocation10]  }
  0x9e   : > { %s1301_s10 = sshll.u32 %s1401_s8, 4  ;;  %s1302_s10 = int_to_ptr.vmem [resolvable:$false] %s1301_s10 }
  0x9f   : > { %1028 = vmatmul.mubr.msk.bf16.vlgmr.msra.gmra.mrb[0].mxu0 %vm352_vm1, %v343_v3  ;;  %p1299_p8 = pnand %p1298_p5, %p1822_p1  ;;  %s1303_s24 = scalar_lea.vmem %s1302_s10, 128 }
  0xa0   : > { %1045 = vmatprep.mubr.msk.bf16.mxu0 %vm1394_vm0, %v1393_v0  ;;  %577 = vrot.lane.b32.xlu1 %v996_v12, %s1396_s27  ;;  %p1304_p6 = scmp.lt.s32.totalorder %s1743_s7, %s1302_s10  ;;  %p1305_p0 = scmp.lt.s32.totalorder %s1303_s24, %s1297_s18 }
  0xa1   : > { %p1300_p9 = pneg %p1299_p8 }
  0xa2   : > { %p1306_p2 = por %p1305_p0, %p1304_p6 }
  0xa4   : > { %689 = vrot.lane.b32.xlu1 %v997_v11, %s1397_s19  ;;  %p1307_p3 = pnand %p1306_p2, %p1300_p9 }
  0xa8   : > { %687 = vrot.lane.b32.xlu1 %v996_v12, %s1397_s19 }
 0x10a   : > { %v467_v22 = vpop.permute.xlu1 %466 }
 0x10b   : > { %v472_v24 = vsel %vm352_vm1, %v467_v22, 0 }
 0x10e   : > { %v462_v26 = vpop.permute.xlu1 %461 }
 0x112   : > { %v578_v28 = vpop.permute.xlu1 %577 }
 0x116   : > { %v690_v30 = vpop.permute.xlu1 %689 }
 0x117   : > { %v695_v31 = vsel %vm352_vm1, %v690_v30, 0 }
 0x11a   : > { %v688_v32 = vpop.permute.xlu1 %687 }
 0x172   : > { %v393_v5 = vpop.f32.mrb[0].mxu0 }
 0x173   : > { %v394_v6 = vadd.f32 %v1673_v4, %v393_v5  ;;  %v1029_v7 = vpop.f32.mrb[1].mxu0 }
 0x174   : > { %v396_v8 = vpop.f32.mrb[2].mxu0 }
 0x175   : > { %v1030_v9 = vpop.f32.mrb[3].mxu0  ;;  %v399_v10 = vsel %vm352_vm1, %v394_v6, -inf }
 0x176   : > { %400 = vmax.xlane.f32.xlu0 %v399_v10 }
 0x203   : > { %v401_v13 = vpop.xlane.xlu0 %400 }
 0x204   : > { %v402_v14 = vsub.f32 %v394_v6, %v401_v13 }
 0x206   : > { %v403_v15 = vmul.f32 1.442695, %v402_v14 }
 0x208   : > { %1161 = vpow2.f32 %v403_v15 }
 0x212   : > { %v1162_v16 = vpop.eup %1161 }
 0x213   : > { %v405_v17 = vsel %vm352_vm1, %v1162_v16, 0.0 }
 0x214   : > { %406 = vadd.xlane.f32.xlu0 %v405_v17 }
 0x22a   : > { %579 = vrot.lane.b32.xlu0 %v997_v11, %s1396_s27 }
 0x2a1   : > { %v407_v20 = vpop.xlane.xlu0 %406 }
 0x2a2   : > { %1163 = vrcp.f32 %v407_v20 }
 0x2a5   : > { %v580_v27 = vpop.permute.xlu0 %579 }
 0x2a6   : > { %v585_v29 = vsel %vm352_vm1, %v580_v27, 0 }
 0x2ac   : > { %v1164_v21 = vpop.eup %1163 }
 0x2ad   : > { %v409_v23 = vmul.f32 %v1164_v21, %v1162_v16 }
 0x2af   : > { %v410_v25 = vpack.c.bf16 %v409_v23, %v409_v23 }
 0x2b1   : > { %1034 = vmatmul.mubr.msk.bf16.vlgmr.msra.gmra.mrb[0].mxu1 %vm352_vm1, %v410_v25 }
 0x2b2   : > { %1038 = vmatpush3.bf16.xpose.msra.mxu1 %v472_v24  ;;  %1039 = vmatprep.mubr.msk.bf16.mxu1 %vm1394_vm0, %v1393_v0 }
 0x2b3   : > { %1049 = vmatprep.subr.bf16.mxu1 %v1393_v0 }
 0x2b9   : > { %1040 = vmatmul.mubr.msk.bf16.vlgmr.msra.gmra.mrb[4].mxu1 %vm352_vm1, %v462_v26 }
 0x2ba   : > { %1050 = vmatpush3.bf16.xpose.msra.mxu1 %v585_v29  ;;  %1051 = vmatprep.mubr.msk.bf16.mxu1 %vm1394_vm0, %v1393_v0 }
 0x2bb   : > { %1061 = vmatprep.subr.bf16.mxu1 %v1393_v0 }
 0x2c1   : > { %1052 = vmatmul.mubr.msk.bf16.vlgmr.msra.gmra.mrb[8].mxu1 %vm352_vm1, %v578_v28 }
 0x2c2   : > { %1062 = vmatpush3.bf16.xpose.msra.mxu1 %v695_v31  ;;  %1063 = vmatprep.mubr.msk.bf16.mxu1 %vm1394_vm0, %v1393_v0 }
 0x2c9   : > { %1064 = vmatmul.mubr.msk.bf16.vlgmr.msra.gmra.mrb[12].mxu1 %vm352_vm1, %v688_v32 }
 0x384   : > { %v1706_v33 = vpop.f32.mrb[0].mxu1 }
 0x385   : > { %v1035_v34 = vpop.f32.mrb[1].mxu1 }
 0x386   : > { %v455_v35 = vpop.f32.mrb[2].mxu1 }
 0x387   : > { %v1036_v36 = vpop.f32.mrb[3].mxu1 }
 0x38c   : > { %v508_v37 = vpop.f32.mrb[4].mxu1 }
 0x38d   : > { %v509_v38 = vadd.f32 %v1673_v4, %v508_v37  ;;  %v1041_v39 = vpop.f32.mrb[5].mxu1 }
 0x38e   : > { %v511_v40 = vpop.f32.mrb[6].mxu1 }
 0x38f   : > { %v1042_v41 = vpop.f32.mrb[7].mxu1  ;;  %v514_v42 = vsel %vm352_vm1, %v509_v38, -inf }
 0x390   : > { %515 = vmax.xlane.f32.xlu1 %v514_v42 }
 0x394   : > { %v621_v43 = vpop.f32.mrb[8].mxu1 }
 0x395   : > { %v622_v44 = vadd.f32 %v1673_v4, %v621_v43  ;;  %v1053_v45 = vpop.f32.mrb[9].mxu1 }
 0x396   : > { %v624_v46 = vpop.f32.mrb[10].mxu1 }
 0x397   : > { %v627_v47 = vsel %vm352_vm1, %v622_v44, -inf  ;;  %v1054_v48 = vpop.f32.mrb[11].mxu1 }
 0x398   : > { %628 = vmax.xlane.f32.xlu0 %v627_v47 }
 0x39c   : > { %v731_v49 = vpop.f32.mrb[12].mxu1 }
 0x39d   : > { %v732_v50 = vadd.f32 %v1673_v4, %v731_v49  ;;  %v1065_v51 = vpop.f32.mrb[13].mxu1 }
 0x39e   : > { %v734_v52 = vpop.f32.mrb[14].mxu1 }
 0x39f   : > { %v737_v53 = vsel %vm352_vm1, %v732_v50, -inf  ;;  %v1066_v54 = vpop.f32.mrb[15].mxu1 }
 0x3a0   : > { %738 = vmax.xlane.f32.xlu1 %v737_v53 }
 0x41d   : > { %v516_v55 = vpop.xlane.xlu1 %515 }
 0x41e   : > { %v517_v56 = vsub.f32 %v509_v38, %v516_v55 }
 0x420   : > { %v518_v57 = vmul.f32 1.442695, %v517_v56 }
 0x422   : > { %1165 = vpow2.f32 %v518_v57 }
 0x425   : > { %v629_v58 = vpop.xlane.xlu0 %628 }
 0x426   : > { %v630_v59 = vsub.f32 %v622_v44, %v629_v58 }
 0x428   : > { %v631_v60 = vmul.f32 1.442695, %v630_v59 }
 0x42a   : > { %1167 = vpow2.f32 %v631_v60 }
 0x42c   : > { %v1166_v61 = vpop.eup %1165 }
 0x42d   : > { %v520_v62 = vsel %vm352_vm1, %v1166_v61, 0.0  ;;  %v739_v3 = vpop.xlane.xlu1 %738 }
 0x42e   : > { %521 = vadd.xlane.f32.xlu1 %v520_v62  ;;  %v740_v4 = vsub.f32 %v732_v50, %v739_v3 }
 0x430   : > { %v741_v5 = vmul.f32 1.442695, %v740_v4 }
 0x432   : > { %1169 = vpow2.f32 %v741_v5 }
 0x434   : > { %v1168_v63 = vpop.eup %1167 }
 0x435   : > { %v633_v1 = vsel %vm352_vm1, %v1168_v63, 0.0 }
 0x436   : > { %634 = vadd.xlane.f32.xlu0 %v633_v1 }
 0x43c   : > { %v1170_v6 = vpop.eup %1169 }
 0x43d   : > { %v743_v7 = vsel %vm352_vm1, %v1170_v6, 0.0 }
 0x43f   : > { %639 = vrot.lane.b32.xlu1 %v999_v2, %s1396_s27 }
 0x44c   : > { %529 = vrot.lane.b32.xlu0 %v999_v2, %s1395_s21 }
 0x463   : > { %744 = vadd.xlane.f32.xlu1 %v743_v7 }
 0x474   : > { %749 = vrot.lane.b32.xlu1 %v999_v2, %s1397_s19 }
 0x4bb   : > { %v522_v8 = vpop.xlane.xlu1 %521 }
 0x4bc   : > { %1171 = vrcp.f32 %v522_v8 }
 0x4bf   : > { %v640_v14 = vpop.permute.xlu1 %639 }
 0x4c0   : > { %v645_v16 = vsel %vm414_vm2, %v640_v14, 0 }
 0x4c3   : > { %v635_v9 = vpop.xlane.xlu0 %634 }
 0x4c4   : > { %1173 = vrcp.f32 %v635_v9 }
 0x4c6   : > { %v1172_v10 = vpop.eup %1171 }
 0x4c7   : > { %v524_v11 = vmul.f32 %v1172_v10, %v1166_v61  ;;  %v530_v12 = vpop.permute.xlu0 %529 }
 0x4c8   : > { %v535_v13 = vsel %vm414_vm2, %v530_v12, 0 }
 0x4c9   : > { %1044 = vmatpush3.bf16.msra.mxu0 %v535_v13  ;;  %v525_v15 = vpack.c.bf16 %v524_v11, %v524_v11 }
 0x4ca   : > { %1055 = vmatprep.subr.bf16.mxu0 %v1393_v0 }
 0x4cc   : > { %1046 = vmatmul.mubr.msk.bf16.vlgmr.msra.gmra.mrb[4].mxu0 %vm352_vm1, %v525_v15 }
 0x4cd   : > { %1056 = vmatpush3.bf16.msra.mxu0 %v645_v16  ;;  %1057 = vmatprep.mubr.msk.bf16.mxu0 %vm1394_vm0, %v1393_v0 }
 0x4ce   : > { %v1174_v17 = vpop.eup %1173  ;;  %1067 = vmatprep.subr.bf16.mxu0 %v1393_v0 }
 0x4cf   : > { %v637_v18 = vmul.f32 %v1174_v17, %v1168_v63 }
 0x4d1   : > { %v638_v19 = vpack.c.bf16 %v637_v18, %v637_v18 }
 0x4d4   : > { %1058 = vmatmul.mubr.msk.bf16.vlgmr.msra.gmra.mrb[8].mxu0 %vm352_vm1, %v638_v19 }
 0x4d5   : > { %1069 = vmatprep.mubr.msk.bf16.mxu0 %vm1394_vm0, %v1393_v0 }
 0x4f0   : > { %v745_v20 = vpop.xlane.xlu1 %744 }
 0x4f1   : > { %1175 = vrcp.f32 %v745_v20 }
 0x4f4   : > { %v750_v21 = vpop.permute.xlu1 %749 }
 0x4f5   : > { %v755_v22 = vsel %vm414_vm2, %v750_v21, 0 }
 0x4f6   : > { %1068 = vmatpush3.bf16.msra.mxu0 %v755_v22 }
 0x4fb   : > { %v1176_v23 = vpop.eup %1175 }
 0x4fc   : > { %v747_v24 = vmul.f32 %v1176_v23, %v1170_v6 }
 0x4fe   : > { %v748_v25 = vpack.c.bf16 %v747_v24, %v747_v24 }
 0x500   : > { %1070 = vmatmul.mubr.msk.bf16.vlgmr.msra.gmra.mrb[12].mxu0 %vm352_vm1, %v748_v25 }
 0x59f   : > { %v571_v26 = vpop.f32.mrb[4].mxu0 }
 0x5a0   : > { %798 = vrot.lane.b32.xlu0 %v571_v26, %s1398_s22  ;;  %v1047_v27 = vpop.f32.mrb[5].mxu0 }
 0x5a1   : > { %v574_v28 = vpop.f32.mrb[6].mxu0 }
 0x5a2   : > { %v1048_v29 = vpop.f32.mrb[7].mxu0 }
 0x5a7   : > { %v681_v30 = vpop.f32.mrb[8].mxu0 }
 0x5a8   : > { %802 = vrot.lane.b32.xlu1 %v681_v30, %s1399_s14  ;;  %v1059_v0 = vpop.f32.mrb[9].mxu0 }
 0x5a9   : > { %v684_v31 = vpop.f32.mrb[10].mxu0 }
 0x5aa   : > { %v1060_v32 = vpop.f32.mrb[11].mxu0 }
 0x5d3   : > { %v791_v34 = vpop.f32.mrb[12].mxu0 }
 0x5d4   : > { %806 = vrot.lane.b32.xlu0 %v791_v34, %s1400_s13  ;;  %v1071_v35 = vpop.f32.mrb[13].mxu0 }
 0x5d5   : > { %v794_v36 = vpop.f32.mrb[14].mxu0 }
 0x5d6   : > { %v1072_v37 = vpop.f32.mrb[15].mxu0 }
 0x612   : > { %v799_v38 = vpop.permute.xlu0 %798 }
 0x613   : > { %v809_v40 = vsel %vm352_vm1, %v1706_v33, %v799_v38 }
 0x61a   : > { %v803_v39 = vpop.permute.xlu1 %802 }
 0x61b   : > { %v811_v41 = vsel %vm810_vm3, %v809_v40, %v803_v39 }
 0x646   : > { %v807_v42 = vpop.permute.xlu0 %806 }
 0x647   : > { %v813_v43 = vsel %vm812_vm4, %v811_v41, %v807_v42 }
 0x648   : > { %v814_v44 = vpack.c.bf16 %v813_v43, %v813_v43 }
 0x64a   : > { %816 = vst.msk [vmem:[%s340_s5] sm:$0xf] %vm815_vm5, %v814_v44 }
 0x64b   : > { %1310 = shalt.err (!%p1307_p3)
}
 0x64c   : > { %s1311_s25 = scalar_lea.hbm %s1741_s11, 64  ;;  %s1315_s12 = scalar_lea.hbm %s1794_s4, 128 }
 0x64d   : > { %p1312_p13 = scmp.ne.s32.totalorder %s1741_s11, %s1311_s25  ;;  %p1316_p12 = scmp.lt.u32.totalorder %s1741_s11, %s1794_s4 }
 0x64e   : > { %p1317_p7 = scmp.lt.u32.totalorder %s1315_s12, %s1311_s25  ;;  %p1319_p5 = scmp.lt.u32.totalorder %s1311_s25, %s1741_s11 }
 0x64f   : > { %p1313_p11 = pnand %p1312_p13, %p1822_p1 }
 0x650   : > { %p1318_p4 = por %p1317_p7, %p1316_p12 }
 0x651   : > { %p1314_p10 = pneg %p1313_p11 }
 0x652   : > { %p1320_p8 = por %p1319_p5, %p1318_p4 }
 0x654   : > { %p1321_p9 = pnand %p1320_p8, %p1314_p10 }
 0x656   : > { %1324 = shalt.err (!%p1321_p9)
}
 0x657   : > { %1081 = dma.vmem_to_hbm [thread:$0]  (%p1822_p1), %s1743_s7, 64, %s1741_s11, %s818_s6  }
 0x658 PF: > { %s844_s27 = sand.u32 1, %s1367_s15   ;;  %p1823_p6 = scmp.ne.s32.totalorder %s1810_s30, 0 }
 0x659   : > { %p1824_p0 = scmp.ge.s32.totalorder %s1387_s20, 2  ;;  %s845_s19 = scalar_lea.sflag [#allocation4], %s844_s27 }
 0x65b   : > { %p1097_p2 = pnand %p1824_p0, %p1823_p6 }
 0x65d   : > { %1362 = dma.done.wait (!%p1097_p2), %s845_s19, 64  }
 0x65e   : > { %1364 = vsyncadd (!%p1097_p2), %s845_s19, 4294967232  ;;  %s26_s20 = sadd.s32 1, %s1387_s20   ;;  %s1825_s22 = sld [smem:[#allocation15_spill]] }
 0x65f   : > { %p23_p3 = scmp.ge.s32.totalorder %s26_s20, 4   ;;  %s1826_s17 = sld [smem:[#allocation18_spill]] }
 0x660   : > { %s1827_s18 = sld [smem:[#allocation16_spill]]  ;;  %s1828_s19 = sld [smem:[#allocation17_spill]] }
 0x661   : > { %s1829_s15 = smov %s1371_s16  ;;  %25 = sbr.rel (!%p23_p3) target bundleno = 12 (0xc), region = 118 }
 0x664   : > { %s1830_s16 = smov %s1825_s22 }
 0x668   :  { %850 = vsyncpa [#allocation3], 1 }
 0x669   :  { %852 = vsyncpa [#allocation3 + $0x1], 1 }
 0x66a   :  { %853 = vsyncpa [#allocation6], 1 }
 0x66b   :  { %855 = vsyncpa [#allocation6 + $0x1], 1 }
 0x66c   :  { %856 = vsyncpa [#allocation9], 1 }
 0x66d   :  { %858 = vsyncpa [#allocation9 + $0x1], 1 }
 0x66e   :  { %859 = vsyncpa [#allocation4], 1 }
 0x66f   :  { %861 = vsyncpa [#allocation4 + $0x1], 1 }

// kernel: closed_call.29
= control target key start
LH: loop header
LB: loop body
LE: loop exit
PB: predicated region body
PF: predicated region fallthrough
CT: control target
= control target key end

     0   :  { %8 = vsyncpa [#allocation4], 0  ;;  %s423_s0 = inlined_call_operand.hbm [shape: bf16[16,32], index: 0, kind: input, shape index: {}]   ;;  %s424_s1 = inlined_call_operand.hbm [shape: bf16[32,64], index: 1, kind: input, shape index: {}]   ;;  %s425_s2 = inlined_call_operand.hbm [shape: f32[1,64], index: 2, kind: input, shape index: {}]   ;;  %s426_s3 = inlined_call_operand.hbm [shape: bf16[16,64], index: 3, kind: output, shape index: {}]  }
   0x1   :  { %9 = vsyncpa [#allocation7], 0 }
   0x2   :  { %10 = vsyncpa [#allocation5], 0  ;;  %s327_s12 = smov [#allocation6]   ;;  %s328_s14 = smov [#allocation3]  }
   0x3   :  { %s28_s13 = sshll.u32 %s327_s12, 4  ;;  %s16_s15 = sshll.u32 %s328_s14, 4  ;;  %s29_s13 = int_to_ptr.vmem [resolvable:$true] %s28_s13  ;;  %s355_s15 = int_to_ptr.vmem [resolvable:$true] %s16_s15 }
   0x4   :  { %s233_s18 = scalar_lea.hbm %s424_s1, 256 }
   0x5   :  { %p234_p0 = scmp.ne.s32.totalorder %s424_s1, %s233_s18  ;;  %p237_p1 = scmp.lt.u32.totalorder %s233_s18, %s424_s1 }
   0x7   :  { %p239_p2 = pnand %p237_p1, %p234_p0 }
   0x9   :  { %242 = shalt.err (!%p239_p2)
}
   0xa   :  { %s243_s23 = scalar_lea.vmem %s29_s13, 256  ;;  %p248_p4 = scmp.lt.s32.totalorder %s29_s13, %s29_s13 }
   0xb   :  { %p244_p3 = scmp.ne.s32.totalorder %s29_s13, %s243_s23  ;;  %p249_p5 = scmp.lt.s32.totalorder %s243_s23, %s243_s23 }
   0xd   :  { %p250_p6 = por %p249_p5, %p248_p4 }
   0xf   :  { %p251_p7 = pnand %p250_p6, %p244_p3 }
  0x11   :  { %254 = shalt.err (!%p251_p7)
}
  0x12   :  { %s329_s24 = smov 64   ;;  %s330_s25 = smov 4  }
  0x13   :  { %34 = dma.hbm_to_vmem [thread:$0]  %s424_s1, 256, %s29_s13, [#allocation7], %s329_s24, %s329_s24, %s330_s25  }
  0x14   :  { %s255_s30 = scalar_lea.hbm %s423_s0, 128 }
  0x15   :  { %p256_p8 = scmp.ne.s32.totalorder %s423_s0, %s255_s30  ;;  %p259_p9 = scmp.lt.u32.totalorder %s255_s30, %s423_s0 }
  0x17   :  { %p261_p10 = pnand %p259_p9, %p256_p8 }
  0x19   :  { %264 = shalt.err (!%p261_p10)
}
  0x1a   :  { %s265_s8 = scalar_lea.vmem %s355_s15, 128  ;;  %p270_p12 = scmp.lt.s32.totalorder %s355_s15, %s355_s15 }
  0x1b   :  { %p266_p11 = scmp.ne.s32.totalorder %s355_s15, %s265_s8  ;;  %p271_p13 = scmp.lt.s32.totalorder %s265_s8, %s265_s8 }
  0x1d   :  { %p272_p0 = por %p271_p13, %p270_p12 }
  0x1f   :  { %p273_p1 = pnand %p272_p0, %p266_p11 }
  0x21   :  { %276 = shalt.err (!%p273_p1)
}
  0x22   :  { %22 = dma.hbm_to_vmem [thread:$0]  %s423_s0, 128, %s355_s15, [#allocation4], %s329_s24, %s329_s24, %s330_s25  }
  0x23   :  { %s331_s10 = smov [#allocation8]   ;;  %s277_s14 = scalar_lea.hbm %s425_s2, 16 }
  0x24   :  { %s41_s11 = sshll.u32 %s331_s10, 4  ;;  %p278_p2 = scmp.ne.s32.totalorder %s425_s2, %s277_s14  ;;  %s42_s11 = int_to_ptr.vmem [resolvable:$true] %s41_s11 }
  0x25   :  { %p281_p3 = scmp.lt.u32.totalorder %s277_s14, %s425_s2 }
  0x27   :  { %p283_p4 = pnand %p281_p3, %p278_p2 }
  0x29   :  { %286 = shalt.err (!%p283_p4)
}
  0x2a   :  { %s287_s20 = scalar_lea.vmem %s42_s11, 16  ;;  %s291_s0 = scalar_lea.vmem %s42_s11, 32 }
  0x2b   :  { %p288_p5 = scmp.ne.s32.totalorder %s42_s11, %s287_s20  ;;  %p292_p6 = scmp.lt.s32.totalorder %s42_s11, %s42_s11 }
  0x2c   :  { %p293_p7 = scmp.lt.s32.totalorder %s291_s0, %s287_s20 }
  0x2e   :  { %p294_p8 = por %p293_p7, %p292_p6 }
  0x30   :  { %p295_p9 = pnand %p294_p8, %p288_p5 }
  0x32   :  { %298 = shalt.err (!%p295_p9)
}
  0x33   :  { %44 = dma.hbm_to_vmem [thread:$0]  %s425_s2, 16, %s42_s11, [#allocation7]  }
  0x34   :  { %321 = dma.done.wait [#allocation4], 128  }
  0x35   :  { %322 = vsyncadd [#allocation4], 4294967168 }
  0x36   :  { %323 = dma.done.wait [#allocation7], 272  }
  0x37   :  { %324 = vsyncadd [#allocation7], 4294967024  ;;  %vm59_vm0 = vcmask 523264   ;;  %v332_v0 = vmov 0.0   ;;  %vm333_vm1 = vmmov 0   ;;  %v226_v1 = vld [vmem:[#allocation6] sm:$0xff]  }
  0x38   :  { %60 = vst.msk [vmem:[#allocation2] sm:$0xff] %vm59_vm0, %v332_v0  ;;  %61 = vst.msk [vmem:[#allocation2 + $0x8] sm:$0xff] %vm59_vm0, %v332_v0  ;;  %210 = vmatprep.subr.bf16.mxu0 %v332_v0  ;;  %214 = vmatprep.mubr.msk.bf16.mxu0 %vm333_vm1, %v332_v0  ;;  %v227_v2 = vld [vmem:[#allocation6 + $0x8] sm:$0xff]   ;;  %v228_v3 = vld [vmem:[#allocation3] sm:$0xff]   ;;  %vm87_vm2 = vcmask 261120   ;;  %vm177_vm3 = vcmask 519168  }
  0x39   :  { %211 = vmatpush3.bf16.msra.mxu0 %v226_v1  ;;  %v202_v12 = vld [vmem:[#allocation8] ss:$0 sm:$0xff]  ;;  %s334_s2 = smov [#allocation9]  }
  0x3a   :  { %212 = vmatprep.subr.bf16.mxu0 %v332_v0  ;;  %s185_s22 = sshll.u32 %s334_s2, 4  ;;  %s186_s22 = int_to_ptr.vmem [resolvable:$true] %s185_s22 }
  0x3b   :  { %s299_s23 = scalar_lea.vmem %s186_s22, 128  ;;  %p304_p11 = scmp.lt.s32.totalorder %s186_s22, %s186_s22 }
  0x3c   :  { %p300_p10 = scmp.ne.s32.totalorder %s186_s22, %s299_s23  ;;  %p305_p12 = scmp.lt.s32.totalorder %s299_s23, %s299_s23 }
  0x3d   :  { %213 = vmatpush3.bf16.msra.mxu0 %v227_v2 }
  0x3e   :  { %p306_p13 = por %p305_p12, %p304_p11 }
  0x3f   :  { %v62_v4 = vld [vmem:[#allocation2] sm:$0xff]  ;;  %v63_v6 = vld [vmem:[#allocation2 + $0x8] sm:$0xff] }
  0x40   :  { %215 = vmatmul.mubr.msk.bf16.vlgmr.msra.gmra.mrb[0].mxu0 %vm87_vm2, %v228_v3  ;;  %p307_p0 = pnand %p306_p13, %p300_p10 }
 0x113   :  { %v125_v5 = vpop.f32.mrb[0].mxu0 }
 0x114   :  { %v132_v7 = vadd.f32 %v125_v5, %v62_v4  ;;  %v216_v8 = vpop.f32.mrb[1].mxu0 }
 0x115   :  { %v128_v9 = vpop.f32.mrb[2].mxu0 }
 0x116   :  { %135 = vst.msk [vmem:[#allocation2] sm:$0xff] %vm59_vm0, %v132_v7  ;;  %v133_v10 = vadd.f32 %v128_v9, %v63_v6  ;;  %v217_v11 = vpop.f32.mrb[3].mxu0 }
 0x118   :  { %136 = vst.msk [vmem:[#allocation2 + $0x8] sm:$0xff] %vm59_vm0, %v133_v10 }
 0x11d   :  { %v140_v13 = vld [vmem:[#allocation2] sm:$0xff] }
 0x11e   :  { %v149_v14 = vadd.f32 %v202_v12, %v140_v13 }
 0x11f   :  { %v141_v15 = vld [vmem:[#allocation2 + $0x8] sm:$0xff] }
 0x120   :  { %v150_v16 = vadd.f32 %v202_v12, %v141_v15  ;;  %v153_v17 = vmul.f32 0.044715, %v149_v14  ;;  %v151_v28 = vmul.f32 0.5, %v149_v14 }
 0x122   :  { %v154_v18 = vmul.f32 0.044715, %v150_v16  ;;  %v155_v19 = vmul.f32 %v153_v17, %v149_v14  ;;  %v152_v31 = vmul.f32 0.5, %v150_v16 }
 0x124   :  { %v156_v20 = vmul.f32 %v154_v18, %v150_v16  ;;  %v157_v21 = vmul.f32 %v155_v19, %v149_v14 }
 0x126   :  { %v158_v22 = vmul.f32 %v156_v20, %v150_v16  ;;  %v159_v23 = vadd.f32 %v157_v21, %v149_v14 }
 0x128   :  { %v160_v24 = vadd.f32 %v158_v22, %v150_v16  ;;  %v161_v25 = vmul.f32 0.7978846, %v159_v23 }
 0x12a   :  { %v162_v26 = vmul.f32 0.7978846, %v160_v24  ;;  %229 = vtanh.f32 %v161_v25 }
 0x12c   :  { %231 = vtanh.f32 %v162_v26 }
 0x134   :  { %v230_v27 = vpop.eup %229 }
 0x135   :  { %v165_v29 = vadd.f32 1.0, %v230_v27 }
 0x136   :  { %v232_v30 = vpop.eup %231 }
 0x137   :  { %v166_v32 = vadd.f32 1.0, %v232_v30  ;;  %v167_v33 = vmul.f32 %v165_v29, %v151_v28 }
 0x139   :  { %v168_v34 = vmul.f32 %v166_v32, %v152_v31  ;;  %v205_v35 = vpack.c.bf16 %v167_v33, %v167_v33 }
 0x13b   :  { %v206_v36 = vpack.c.bf16 %v168_v34, %v168_v34  ;;  %178 = vst.msk [vmem:[#allocation9] sm:$0xf] %vm177_vm3, %v205_v35 }
 0x13d   :  { %179 = vst.msk [vmem:[#allocation9 + $0x4] sm:$0xf] %vm177_vm3, %v206_v36 }
 0x13e   :  { %310 = shalt.err (!%p307_p0)
}
 0x13f   :  { %s311_s28 = scalar_lea.hbm %s426_s3, 128 }
 0x140   :  { %p312_p1 = scmp.ne.s32.totalorder %s426_s3, %s311_s28  ;;  %p315_p2 = scmp.lt.u32.totalorder %s311_s28, %s426_s3 }
 0x142   :  { %p317_p3 = pnand %p315_p2, %p312_p1 }
 0x144   :  { %320 = shalt.err (!%p317_p3)
}
 0x145   :  { %191 = dma.vmem_to_hbm [thread:$0]  %s186_s22, 128, %s426_s3, [#allocation5], %s329_s24, %s329_s24, %s330_s25  }
 0x146   :  { %325 = dma.done.wait [#allocation5], 128  }
 0x147   :  { %326 = vsyncadd [#allocation5], 4294967168 }
 0x148   :  { %195 = vsyncpa [#allocation4], 1 }
 0x149   :  { %196 = vsyncpa [#allocation7], 1 }
 0x14a   :  { %197 = vsyncpa [#allocation5], 1 }

// kernel: closed_call.28
= control target key start
LH: loop header
LB: loop body
LE: loop exit
PB: predicated region body
PF: predicated region fallthrough
CT: control target
= control target key end

     0   :  { %11 = vsyncpa [#allocation4], 0  ;;  %s644_s0 = inlined_call_operand.hbm [shape: bf16[16,32], index: 0, kind: input, shape index: {}]   ;;  %s645_s1 = inlined_call_operand.hbm [shape: bf16[32,32], index: 1, kind: input, shape index: {}]   ;;  %s646_s2 = inlined_call_operand.hbm [shape: f32[1,32], index: 2, kind: input, shape index: {}]   ;;  %s647_s3 = inlined_call_operand.hbm [shape: bf16[16,32], index: 3, kind: input, shape index: {}]   ;;  %s648_s4 = inlined_call_operand.hbm [shape: f32[1,32], index: 4, kind: input, shape index: {}]   ;;  %s649_s5 = inlined_call_operand.hbm [shape: f32[1,32], index: 5, kind: input, shape index: {}]   ;;  %s650_s6 = inlined_call_operand.hbm [shape: bf16[16,32], index: 6, kind: output, shape index: {}]  }
   0x1   :  { %12 = vsyncpa [#allocation7], 0 }
   0x2   :  { %13 = vsyncpa [#allocation10], 0 }
   0x3   :  { %14 = vsyncpa [#allocation13], 0 }
   0x4   :  { %15 = vsyncpa [#allocation5], 0  ;;  %s486_s21 = smov [#allocation6]   ;;  %s487_s23 = smov [#allocation9]  }
   0x5   :  { %s33_s22 = sshll.u32 %s486_s21, 4  ;;  %s55_s24 = sshll.u32 %s487_s23, 4  ;;  %s34_s22 = int_to_ptr.vmem [resolvable:$true] %s33_s22  ;;  %s532_s24 = int_to_ptr.vmem [resolvable:$true] %s55_s24 }
   0x6   :  { %s322_s27 = scalar_lea.hbm %s645_s1, 256 }
   0x7   :  { %p323_p0 = scmp.ne.s32.totalorder %s645_s1, %s322_s27  ;;  %p326_p1 = scmp.lt.u32.totalorder %s322_s27, %s645_s1 }
   0x9   :  { %p328_p2 = pnand %p326_p1, %p323_p0 }
   0xb   :  { %331 = shalt.err (!%p328_p2)
}
   0xc   :  { %s332_s8 = scalar_lea.vmem %s34_s22, 256  ;;  %p337_p4 = scmp.lt.s32.totalorder %s34_s22, %s34_s22 }
   0xd   :  { %p333_p3 = scmp.ne.s32.totalorder %s34_s22, %s332_s8  ;;  %p338_p5 = scmp.lt.s32.totalorder %s332_s8, %s332_s8 }
   0xf   :  { %p339_p6 = por %p338_p5, %p337_p4 }
  0x11   :  { %p340_p7 = pnand %p339_p6, %p333_p3 }
  0x13   :  { %343 = shalt.err (!%p340_p7)
}
  0x14   :  { %s488_s9 = smov 64   ;;  %s489_s10 = smov 4  }
  0x15   :  { %39 = dma.hbm_to_vmem [thread:$0]  %s645_s1, 256, %s34_s22, [#allocation7], %s488_s9, %s488_s9, %s489_s10  }
  0x16   :  { %s344_s15 = scalar_lea.hbm %s647_s3, 128 }
  0x17   :  { %p345_p8 = scmp.ne.s32.totalorder %s647_s3, %s344_s15  ;;  %p348_p9 = scmp.lt.u32.totalorder %s344_s15, %s647_s3 }
  0x19   :  { %p350_p10 = pnand %p348_p9, %p345_p8 }
  0x1b   :  { %353 = shalt.err (!%p350_p10)
}
  0x1c   :  { %s354_s20 = scalar_lea.vmem %s532_s24, 128  ;;  %p359_p12 = scmp.lt.s32.totalorder %s532_s24, %s532_s24 }
  0x1d   :  { %p355_p11 = scmp.ne.s32.totalorder %s532_s24, %s354_s20  ;;  %p360_p13 = scmp.lt.s32.totalorder %s354_s20, %s354_s20 }
  0x1f   :  { %p361_p0 = por %p360_p13, %p359_p12 }
  0x21   :  { %p362_p1 = pnand %p361_p0, %p355_p11 }
  0x23   :  { %365 = shalt.err (!%p362_p1)
}
  0x24   :  { %61 = dma.hbm_to_vmem [thread:$0]  %s647_s3, 128, %s532_s24, [#allocation10], %s488_s9, %s488_s9, %s489_s10  }
  0x25   :  { %s490_s22 = smov [#allocation3]   ;;  %s491_s25 = smov [#allocation8]  }
  0x26   :  { %s21_s23 = sshll.u32 %s490_s22, 4  ;;  %s46_s26 = sshll.u32 %s491_s25, 4  ;;  %s22_s23 = int_to_ptr.vmem [resolvable:$true] %s21_s23  ;;  %s47_s26 = int_to_ptr.vmem [resolvable:$true] %s46_s26 }
  0x27   :  { %s366_s29 = scalar_lea.hbm %s644_s0, 128 }
  0x28   :  { %p367_p2 = scmp.ne.s32.totalorder %s644_s0, %s366_s29  ;;  %p370_p3 = scmp.lt.u32.totalorder %s366_s29, %s644_s0 }
  0x2a   :  { %p372_p4 = pnand %p370_p3, %p367_p2 }
  0x2c   :  { %375 = shalt.err (!%p372_p4)
}
  0x2d   :  { %s376_s3 = scalar_lea.vmem %s22_s23, 128  ;;  %p381_p6 = scmp.lt.s32.totalorder %s22_s23, %s22_s23 }
  0x2e   :  { %p377_p5 = scmp.ne.s32.totalorder %s22_s23, %s376_s3  ;;  %p382_p7 = scmp.lt.s32.totalorder %s376_s3, %s376_s3 }
  0x30   :  { %p383_p8 = por %p382_p7, %p381_p6 }
  0x32   :  { %p384_p9 = pnand %p383_p8, %p377_p5 }
  0x34   :  { %387 = shalt.err (!%p384_p9)
}
  0x35   :  { %27 = dma.hbm_to_vmem [thread:$0]  %s644_s0, 128, %s22_s23, [#allocation4], %s488_s9, %s488_s9, %s489_s10  }
  0x36   :  { %s388_s15 = scalar_lea.hbm %s646_s2, 16 }
  0x37   :  { %p389_p10 = scmp.ne.s32.totalorder %s646_s2, %s388_s15  ;;  %p392_p11 = scmp.lt.u32.totalorder %s388_s15, %s646_s2 }
  0x39   :  { %p394_p12 = pnand %p392_p11, %p389_p10 }
  0x3b   :  { %397 = shalt.err (!%p394_p12)
}
  0x3c   :  { %s398_s20 = scalar_lea.vmem %s47_s26, 16  ;;  %s402_s1 = scalar_lea.vmem %s47_s26, 32 }
  0x3d   :  { %p399_p13 = scmp.ne.s32.totalorder %s47_s26, %s398_s20  ;;  %p403_p0 = scmp.lt.s32.totalorder %s47_s26, %s47_s26 }
  0x3e   :  { %p404_p1 = scmp.lt.s32.totalorder %s402_s1, %s398_s20 }
  0x40   :  { %p405_p2 = por %p404_p1, %p403_p0 }
  0x42   :  { %p406_p3 = pnand %p405_p2, %p399_p13 }
  0x44   :  { %409 = shalt.err (!%p406_p3)
}
  0x45   :  { %49 = dma.hbm_to_vmem [thread:$0]  %s646_s2, 16, %s47_s26, [#allocation7]  }
  0x46   :  { %s492_s22 = smov [#allocation11]   ;;  %s493_s25 = smov [#allocation12]  }
  0x47   :  { %s68_s23 = sshll.u32 %s492_s22, 4  ;;  %s78_s27 = sshll.u32 %s493_s25, 4  ;;  %s69_s23 = int_to_ptr.vmem [resolvable:$true] %s68_s23  ;;  %s79_s27 = int_to_ptr.vmem [resolvable:$true] %s78_s27 }
  0x48   :  { %s410_s30 = scalar_lea.hbm %s648_s4, 16 }
  0x49   :  { %p411_p4 = scmp.ne.s32.totalorder %s648_s4, %s410_s30  ;;  %p414_p5 = scmp.lt.u32.totalorder %s410_s30, %s648_s4 }
  0x4b   :  { %p416_p6 = pnand %p414_p5, %p411_p4 }
  0x4d   :  { %419 = shalt.err (!%p416_p6)
}
  0x4e   :  { %s420_s2 = scalar_lea.vmem %s69_s23, 16  ;;  %s424_s26 = scalar_lea.vmem %s69_s23, 32 }
  0x4f   :  { %p421_p7 = scmp.ne.s32.totalorder %s69_s23, %s420_s2  ;;  %p425_p8 = scmp.lt.s32.totalorder %s69_s23, %s69_s23 }
  0x50   :  { %p426_p9 = scmp.lt.s32.totalorder %s424_s26, %s420_s2 }
  0x52   :  { %p427_p10 = por %p426_p9, %p425_p8 }
  0x54   :  { %p428_p11 = pnand %p427_p10, %p421_p7 }
  0x56   :  { %431 = shalt.err (!%p428_p11)
}
  0x57   :  { %71 = dma.hbm_to_vmem [thread:$0]  %s648_s4, 16, %s69_s23, [#allocation10]  }
  0x58   :  { %s432_s15 = scalar_lea.hbm %s649_s5, 16 }
  0x59   :  { %p433_p12 = scmp.ne.s32.totalorder %s649_s5, %s432_s15  ;;  %p436_p13 = scmp.lt.u32.totalorder %s432_s15, %s649_s5 }
  0x5b   :  { %p438_p0 = pnand %p436_p13, %p433_p12 }
  0x5d   :  { %441 = shalt.err (!%p438_p0)
}
  0x5e   :  { %s442_s20 = scalar_lea.vmem %s79_s27, 16  ;;  %s446_s1 = scalar_lea.vmem %s79_s27, 32 }
  0x5f   :  { %p443_p1 = scmp.ne.s32.totalorder %s79_s27, %s442_s20  ;;  %p447_p2 = scmp.lt.s32.totalorder %s79_s27, %s79_s27 }
  0x60   :  { %p448_p3 = scmp.lt.s32.totalorder %s446_s1, %s442_s20 }
  0x62   :  { %p449_p4 = por %p448_p3, %p447_p2 }
  0x64   :  { %p450_p5 = pnand %p449_p4, %p443_p1 }
  0x66   :  { %453 = shalt.err (!%p450_p5)
}
  0x67   :  { %81 = dma.hbm_to_vmem [thread:$0]  %s649_s5, 16, %s79_s27, [#allocation13]  }
  0x68   :  { %476 = dma.done.wait [#allocation4], 128  }
  0x69   :  { %477 = vsyncadd [#allocation4], 4294967168 }
  0x6a   :  { %478 = dma.done.wait [#allocation7], 272  }
  0x6b   :  { %479 = vsyncadd [#allocation7], 4294967024 }
  0x6c   :  { %480 = dma.done.wait [#allocation10], 144  }
  0x6d   :  { %481 = vsyncadd [#allocation10], 4294967152 }
  0x6e   :  { %482 = dma.done.wait [#allocation13], 16  }
  0x6f   :  { %483 = vsyncadd [#allocation13], 4294967280  ;;  %vm105_vm0 = vcmask 261120   ;;  %v494_v0 = vmov 0.0   ;;  %vm495_vm1 = vmmov 0   ;;  %v315_v1 = vld [vmem:[#allocation6] sm:$0xff]  }
  0x70   :  { %106 = vst.msk [vmem:[#allocation2] sm:$0xff] %vm105_vm0, %v494_v0  ;;  %107 = vst.msk [vmem:[#allocation2 + $0x8] sm:$0xff] %vm105_vm0, %v494_v0  ;;  %296 = vmatprep.subr.bf16.mxu0 %v494_v0  ;;  %300 = vmatprep.mubr.msk.bf16.mxu0 %vm495_vm1, %v494_v0  ;;  %v316_v2 = vld [vmem:[#allocation6 + $0x8] sm:$0xff]   ;;  %v317_v3 = vld [vmem:[#allocation3] sm:$0xff]   ;;  %vm255_vm2 = vcmask 257024   ;;  %s496_s5 = smov [#allocation14]  }
  0x71   :  { %297 = vmatpush3.bf16.msra.mxu0 %v315_v1  ;;  %v290_v12 = vld [vmem:[#allocation9] sm:$0xff]   ;;  %v282_v13 = vld [vmem:[#allocation8] ss:$0 sm:$0xff]  ;;  %v283_v41 = vld [vmem:[#allocation11] ss:$0 sm:$0xff]  ;;  %s263_s21 = sshll.u32 %s496_s5, 4  ;;  %s264_s21 = int_to_ptr.vmem [resolvable:$true] %s263_s21 }
  0x72   :  { %298 = vmatprep.subr.bf16.mxu0 %v494_v0  ;;  %v291_v14 = vunpack.c.l.bf16 %v290_v12  ;;  %v292_v17 = vunpack.c.h.bf16 %v290_v12  ;;  %v284_v43 = vld [vmem:[#allocation12] ss:$0 sm:$0xff]  ;;  %s454_s22 = scalar_lea.vmem %s264_s21, 128  ;;  %p459_p7 = scmp.lt.s32.totalorder %s264_s21, %s264_s21 }
  0x73   :  { %p455_p6 = scmp.ne.s32.totalorder %s264_s21, %s454_s22  ;;  %p460_p8 = scmp.lt.s32.totalorder %s454_s22, %s454_s22 }
  0x75   :  { %299 = vmatpush3.bf16.msra.mxu0 %v316_v2  ;;  %p461_p9 = por %p460_p8, %p459_p7 }
  0x77   :  { %v108_v4 = vld [vmem:[#allocation2] sm:$0xff]  ;;  %v109_v6 = vld [vmem:[#allocation2 + $0x8] sm:$0xff]  ;;  %p462_p10 = pnand %p461_p9, %p455_p6 }
  0x78   :  { %301 = vmatmul.mubr.msk.bf16.vlgmr.msra.gmra.mrb[0].mxu0 %vm105_vm0, %v317_v3 }
 0x14b   :  { %v171_v5 = vpop.f32.mrb[0].mxu0 }
 0x14c   :  { %v178_v7 = vadd.f32 %v171_v5, %v108_v4  ;;  %v302_v8 = vpop.f32.mrb[1].mxu0 }
 0x14d   :  { %v174_v9 = vpop.f32.mrb[2].mxu0 }
 0x14e   :  { %180 = vst.msk [vmem:[#allocation2] sm:$0xff] %vm105_vm0, %v178_v7  ;;  %v179_v10 = vadd.f32 %v174_v9, %v109_v6  ;;  %v303_v11 = vpop.f32.mrb[3].mxu0 }
 0x150   :  { %181 = vst.msk [vmem:[#allocation2 + $0x8] sm:$0xff] %vm105_vm0, %v179_v10 }
 0x155   :  { %v185_v15 = vld [vmem:[#allocation2] sm:$0xff] }
 0x156   :  { %v194_v16 = vadd.f32 %v282_v13, %v185_v15 }
 0x157   :  { %v186_v18 = vld [vmem:[#allocation2 + $0x8] sm:$0xff] }
 0x158   :  { %v200_v19 = vadd.f32 %v291_v14, %v194_v16  ;;  %v195_v20 = vadd.f32 %v282_v13, %v186_v18 }
 0x15a   :  { %v202_v21 = vsel %vm105_vm0, %v200_v19, 0.0  ;;  %v201_v22 = vadd.f32 %v292_v17, %v195_v20 }
 0x15b   :  { %203 = vadd.xlane.f32.xlu0 %v202_v21 }
 0x15c   :  { %v205_v23 = vsel %vm105_vm0, %v201_v22, 0.0 }
 0x15f   :  { %206 = vadd.xlane.f32.xlu0 %v205_v23 }
 0x1e8   :  { %v204_v24 = vpop.xlane.xlu0 %203 }
 0x1e9   :  { %v209_v25 = vmul.f32 0.03125, %v204_v24 }
 0x1eb   :  { %v211_v26 = vsub.f32 %v200_v19, %v209_v25 }
 0x1ec   :  { %v207_v27 = vpop.xlane.xlu0 %206 }
 0x1ed   :  { %v210_v28 = vmul.f32 0.03125, %v207_v27  ;;  %v213_v29 = vmul.f32 %v211_v26, %v211_v26 }
 0x1ef   :  { %v212_v30 = vsub.f32 %v201_v22, %v210_v28  ;;  %v215_v31 = vsel %vm105_vm0, %v213_v29, 0.0 }
 0x1f0   :  { %216 = vadd.xlane.f32.xlu1 %v215_v31 }
 0x1f1   :  { %v214_v32 = vmul.f32 %v212_v30, %v212_v30 }
 0x1f3   :  { %v218_v33 = vsel %vm105_vm0, %v214_v32, 0.0 }
 0x1f4   :  { %219 = vadd.xlane.f32.xlu1 %v218_v33 }
 0x27d   :  { %v217_v34 = vpop.xlane.xlu1 %216 }
 0x27e   :  { %v221_v35 = vmul.f32 0.03125, %v217_v34 }
 0x280   :  { %v223_v36 = vadd.f32 1e-12, %v221_v35 }
 0x281   :  { %v220_v37 = vpop.xlane.xlu1 %219 }
 0x282   :  { %318 = vrsqrt.f32 %v223_v36  ;;  %v222_v38 = vmul.f32 0.03125, %v220_v37 }
 0x284   :  { %v224_v39 = vadd.f32 1e-12, %v222_v38 }
 0x286   :  { %320 = vrsqrt.f32 %v224_v39 }
 0x28c   :  { %v319_v40 = vpop.eup %318 }
 0x28d   :  { %v227_v42 = vmul.f32 %v319_v40, %v211_v26 }
 0x28f   :  { %v236_v44 = vmul.f32 %v283_v41, %v227_v42 }
 0x290   :  { %v321_v45 = vpop.eup %320 }
 0x291   :  { %v228_v46 = vmul.f32 %v321_v45, %v212_v30  ;;  %v245_v47 = vadd.f32 %v284_v43, %v236_v44 }
 0x293   :  { %v237_v48 = vmul.f32 %v283_v41, %v228_v46  ;;  %v287_v49 = vpack.c.bf16 %v245_v47, %v245_v47 }
 0x295   :  { %v246_v50 = vadd.f32 %v284_v43, %v237_v48  ;;  %256 = vst.msk [vmem:[#allocation14] sm:$0xf] %vm255_vm2, %v287_v49 }
 0x297   :  { %v288_v51 = vpack.c.bf16 %v246_v50, %v246_v50 }
 0x299   :  { %257 = vst.msk [vmem:[#allocation14 + $0x4] sm:$0xf] %vm255_vm2, %v288_v51 }
 0x29a   :  { %465 = shalt.err (!%p462_p10)
}
 0x29b   :  { %s466_s27 = scalar_lea.hbm %s650_s6, 128 }
 0x29c   :  { %p467_p11 = scmp.ne.s32.totalorder %s650_s6, %s466_s27  ;;  %p470_p12 = scmp.lt.u32.totalorder %s466_s27, %s650_s6 }
 0x29e   :  { %p472_p13 = pnand %p470_p12, %p467_p11 }
 0x2a0   :  { %475 = shalt.err (!%p472_p13)
}
 0x2a1   :  { %269 = dma.vmem_to_hbm [thread:$0]  %s264_s21, 128, %s650_s6, [#allocation5], %s488_s9, %s488_s9, %s489_s10  }
 0x2a2   :  { %484 = dma.done.wait [#allocation5], 128  }
 0x2a3   :  { %485 = vsyncadd [#allocation5], 4294967168 }
 0x2a4   :  { %273 = vsyncpa [#allocation4], 1 }
 0x2a5   :  { %274 = vsyncpa [#allocation7], 1 }
 0x2a6   :  { %275 = vsyncpa [#allocation10], 1 }
 0x2a7   :  { %276 = vsyncpa [#allocation13], 1 }
 0x2a8   :  { %277 = vsyncpa [#allocation5], 1 }

// kernel: closed_call.30
= control target key start
LH: loop header
LB: loop body
LE: loop exit
PB: predicated region body
PF: predicated region fallthrough
CT: control target
= control target key end

     0   :  { %11 = vsyncpa [#allocation4], 0  ;;  %s670_s0 = inlined_call_operand.hbm [shape: bf16[16,64], index: 0, kind: input, shape index: {}]   ;;  %s671_s1 = inlined_call_operand.hbm [shape: bf16[64,32], index: 1, kind: input, shape index: {}]   ;;  %s672_s2 = inlined_call_operand.hbm [shape: f32[1,32], index: 2, kind: input, shape index: {}]   ;;  %s673_s3 = inlined_call_operand.hbm [shape: bf16[16,32], index: 3, kind: input, shape index: {}]   ;;  %s674_s4 = inlined_call_operand.hbm [shape: f32[1,32], index: 4, kind: input, shape index: {}]   ;;  %s675_s5 = inlined_call_operand.hbm [shape: f32[1,32], index: 5, kind: input, shape index: {}]   ;;  %s676_s6 = inlined_call_operand.hbm [shape: bf16[16,32], index: 6, kind: output, shape index: {}]  }
   0x1   :  { %12 = vsyncpa [#allocation7], 0 }
   0x2   :  { %13 = vsyncpa [#allocation10], 0 }
   0x3   :  { %14 = vsyncpa [#allocation13], 0 }
   0x4   :  { %15 = vsyncpa [#allocation5], 0  ;;  %s513_s21 = smov [#allocation6]   ;;  %s514_s23 = smov [#allocation9]  }
   0x5   :  { %s33_s22 = sshll.u32 %s513_s21, 4  ;;  %s55_s24 = sshll.u32 %s514_s23, 4  ;;  %s34_s22 = int_to_ptr.vmem [resolvable:$true] %s33_s22  ;;  %s559_s24 = int_to_ptr.vmem [resolvable:$true] %s55_s24 }
   0x6   :  { %s349_s27 = scalar_lea.hbm %s671_s1, 512 }
   0x7   :  { %p350_p0 = scmp.ne.s32.totalorder %s671_s1, %s349_s27  ;;  %p353_p1 = scmp.lt.u32.totalorder %s349_s27, %s671_s1 }
   0x9   :  { %p355_p2 = pnand %p353_p1, %p350_p0 }
   0xb   :  { %358 = shalt.err (!%p355_p2)
}
   0xc   :  { %s359_s8 = scalar_lea.vmem %s34_s22, 512  ;;  %p364_p4 = scmp.lt.s32.totalorder %s34_s22, %s34_s22 }
   0xd   :  { %p360_p3 = scmp.ne.s32.totalorder %s34_s22, %s359_s8  ;;  %p365_p5 = scmp.lt.s32.totalorder %s359_s8, %s359_s8 }
   0xf   :  { %p366_p6 = por %p365_p5, %p364_p4 }
  0x11   :  { %p367_p7 = pnand %p366_p6, %p360_p3 }
  0x13   :  { %370 = shalt.err (!%p367_p7)
}
  0x14   :  { %s515_s9 = smov 64   ;;  %s516_s10 = smov 4  }
  0x15   :  { %39 = dma.hbm_to_vmem [thread:$0]  %s671_s1, 512, %s34_s22, [#allocation7], %s515_s9, %s515_s9, %s516_s10  }
  0x16   :  { %s371_s15 = scalar_lea.hbm %s673_s3, 128 }
  0x17   :  { %p372_p8 = scmp.ne.s32.totalorder %s673_s3, %s371_s15  ;;  %p375_p9 = scmp.lt.u32.totalorder %s371_s15, %s673_s3 }
  0x19   :  { %p377_p10 = pnand %p375_p9, %p372_p8 }
  0x1b   :  { %380 = shalt.err (!%p377_p10)
}
  0x1c   :  { %s381_s20 = scalar_lea.vmem %s559_s24, 128  ;;  %p386_p12 = scmp.lt.s32.totalorder %s559_s24, %s559_s24 }
  0x1d   :  { %p382_p11 = scmp.ne.s32.totalorder %s559_s24, %s381_s20  ;;  %p387_p13 = scmp.lt.s32.totalorder %s381_s20, %s381_s20 }
  0x1f   :  { %p388_p0 = por %p387_p13, %p386_p12 }
  0x21   :  { %p389_p1 = pnand %p388_p0, %p382_p11 }
  0x23   :  { %392 = shalt.err (!%p389_p1)
}
  0x24   :  { %61 = dma.hbm_to_vmem [thread:$0]  %s673_s3, 128, %s559_s24, [#allocation10], %s515_s9, %s515_s9, %s516_s10  }
  0x25   :  { %s517_s22 = smov [#allocation3]   ;;  %s518_s25 = smov [#allocation8]  }
  0x26   :  { %s21_s23 = sshll.u32 %s517_s22, 4  ;;  %s46_s26 = sshll.u32 %s518_s25, 4  ;;  %s22_s23 = int_to_ptr.vmem [resolvable:$true] %s21_s23  ;;  %s47_s26 = int_to_ptr.vmem [resolvable:$true] %s46_s26 }
  0x27   :  { %s393_s29 = scalar_lea.hbm %s670_s0, 128 }
  0x28   :  { %p394_p2 = scmp.ne.s32.totalorder %s670_s0, %s393_s29  ;;  %p397_p3 = scmp.lt.u32.totalorder %s393_s29, %s670_s0 }
  0x2a   :  { %p399_p4 = pnand %p397_p3, %p394_p2 }
  0x2c   :  { %402 = shalt.err (!%p399_p4)
}
  0x2d   :  { %s403_s3 = scalar_lea.vmem %s22_s23, 128  ;;  %p408_p6 = scmp.lt.s32.totalorder %s22_s23, %s22_s23 }
  0x2e   :  { %p404_p5 = scmp.ne.s32.totalorder %s22_s23, %s403_s3  ;;  %p409_p7 = scmp.lt.s32.totalorder %s403_s3, %s403_s3 }
  0x30   :  { %p410_p8 = por %p409_p7, %p408_p6 }
  0x32   :  { %p411_p9 = pnand %p410_p8, %p404_p5 }
  0x34   :  { %414 = shalt.err (!%p411_p9)
}
  0x35   :  { %27 = dma.hbm_to_vmem [thread:$0]  %s670_s0, 128, %s22_s23, [#allocation4], %s515_s9, %s515_s9, %s516_s10  }
  0x36   :  { %s415_s15 = scalar_lea.hbm %s672_s2, 16 }
  0x37   :  { %p416_p10 = scmp.ne.s32.totalorder %s672_s2, %s415_s15  ;;  %p419_p11 = scmp.lt.u32.totalorder %s415_s15, %s672_s2 }
  0x39   :  { %p421_p12 = pnand %p419_p11, %p416_p10 }
  0x3b   :  { %424 = shalt.err (!%p421_p12)
}
  0x3c   :  { %s425_s20 = scalar_lea.vmem %s47_s26, 16  ;;  %s429_s1 = scalar_lea.vmem %s47_s26, 32 }
  0x3d   :  { %p426_p13 = scmp.ne.s32.totalorder %s47_s26, %s425_s20  ;;  %p430_p0 = scmp.lt.s32.totalorder %s47_s26, %s47_s26 }
  0x3e   :  { %p431_p1 = scmp.lt.s32.totalorder %s429_s1, %s425_s20 }
  0x40   :  { %p432_p2 = por %p431_p1, %p430_p0 }
  0x42   :  { %p433_p3 = pnand %p432_p2, %p426_p13 }
  0x44   :  { %436 = shalt.err (!%p433_p3)
}
  0x45   :  { %49 = dma.hbm_to_vmem [thread:$0]  %s672_s2, 16, %s47_s26, [#allocation7]  }
  0x46   :  { %s519_s22 = smov [#allocation11]   ;;  %s520_s25 = smov [#allocation12]  }
  0x47   :  { %s68_s23 = sshll.u32 %s519_s22, 4  ;;  %s78_s27 = sshll.u32 %s520_s25, 4  ;;  %s69_s23 = int_to_ptr.vmem [resolvable:$true] %s68_s23  ;;  %s79_s27 = int_to_ptr.vmem [resolvable:$true] %s78_s27 }
  0x48   :  { %s437_s30 = scalar_lea.hbm %s674_s4, 16 }
  0x49   :  { %p438_p4 = scmp.ne.s32.totalorder %s674_s4, %s437_s30  ;;  %p441_p5 = scmp.lt.u32.totalorder %s437_s30, %s674_s4 }
  0x4b   :  { %p443_p6 = pnand %p441_p5, %p438_p4 }
  0x4d   :  { %446 = shalt.err (!%p443_p6)
}
  0x4e   :  { %s447_s2 = scalar_lea.vmem %s69_s23, 16  ;;  %s451_s26 = scalar_lea.vmem %s69_s23, 32 }
  0x4f   :  { %p448_p7 = scmp.ne.s32.totalorder %s69_s23, %s447_s2  ;;  %p452_p8 = scmp.lt.s32.totalorder %s69_s23, %s69_s23 }
  0x50   :  { %p453_p9 = scmp.lt.s32.totalorder %s451_s26, %s447_s2 }
  0x52   :  { %p454_p10 = por %p453_p9, %p452_p8 }
  0x54   :  { %p455_p11 = pnand %p454_p10, %p448_p7 }
  0x56   :  { %458 = shalt.err (!%p455_p11)
}
  0x57   :  { %71 = dma.hbm_to_vmem [thread:$0]  %s674_s4, 16, %s69_s23, [#allocation10]  }
  0x58   :  { %s459_s15 = scalar_lea.hbm %s675_s5, 16 }
  0x59   :  { %p460_p12 = scmp.ne.s32.totalorder %s675_s5, %s459_s15  ;;  %p463_p13 = scmp.lt.u32.totalorder %s459_s15, %s675_s5 }
  0x5b   :  { %p465_p0 = pnand %p463_p13, %p460_p12 }
  0x5d   :  { %468 = shalt.err (!%p465_p0)
}
  0x5e   :  { %s469_s20 = scalar_lea.vmem %s79_s27, 16  ;;  %s473_s1 = scalar_lea.vmem %s79_s27, 32 }
  0x5f   :  { %p470_p1 = scmp.ne.s32.totalorder %s79_s27, %s469_s20  ;;  %p474_p2 = scmp.lt.s32.totalorder %s79_s27, %s79_s27 }
  0x60   :  { %p475_p3 = scmp.lt.s32.totalorder %s473_s1, %s469_s20 }
  0x62   :  { %p476_p4 = por %p475_p3, %p474_p2 }
  0x64   :  { %p477_p5 = pnand %p476_p4, %p470_p1 }
  0x66   :  { %480 = shalt.err (!%p477_p5)
}
  0x67   :  { %81 = dma.hbm_to_vmem [thread:$0]  %s675_s5, 16, %s79_s27, [#allocation13]  }
  0x68   :  { %503 = dma.done.wait [#allocation4], 128  }
  0x69   :  { %504 = vsyncadd [#allocation4], 4294967168 }
  0x6a   :  { %505 = dma.done.wait [#allocation7], 528  }
  0x6b   :  { %506 = vsyncadd [#allocation7], 4294966768 }
  0x6c   :  { %507 = dma.done.wait [#allocation10], 144  }
  0x6d   :  { %508 = vsyncadd [#allocation10], 4294967152 }
  0x6e   :  { %509 = dma.done.wait [#allocation13], 16  }
  0x6f   :  { %510 = vsyncadd [#allocation13], 4294967280  ;;  %vm105_vm0 = vcmask 261120   ;;  %v521_v0 = vmov 0.0   ;;  %vm522_vm1 = vmmov 0   ;;  %v340_v1 = vld [vmem:[#allocation6] sm:$0xff]  }
  0x70   :  { %317 = vmatprep.subr.bf16.mxu0 %v521_v0  ;;  %325 = vmatprep.mubr.msk.bf16.mxu0 %vm522_vm1, %v521_v0  ;;  %106 = vst.msk [vmem:[#allocation2] sm:$0xff] %vm105_vm0, %v521_v0  ;;  %107 = vst.msk [vmem:[#allocation2 + $0x8] sm:$0xff] %vm105_vm0, %v521_v0  ;;  %v341_v2 = vld [vmem:[#allocation6 + $0x8] sm:$0xff]   ;;  %v342_v3 = vld [vmem:[#allocation6 + $0x10] sm:$0xff]   ;;  %vm149_vm2 = vcmask 523264   ;;  %vm272_vm3 = vcmask 257024  }
  0x71   :  { %318 = vmatpush3.bf16.msra.mxu0 %v340_v1  ;;  %v343_v4 = vld [vmem:[#allocation6 + $0x18] sm:$0xff]   ;;  %v309_v14 = vld [vmem:[#allocation9] sm:$0xff]   ;;  %v301_v15 = vld [vmem:[#allocation8] ss:$0 sm:$0xff]  ;;  %s523_s5 = smov [#allocation14]  }
  0x72   :  { %319 = vmatprep.subr.bf16.mxu0 %v521_v0  ;;  %v344_v5 = vld [vmem:[#allocation3] sm:$0xff]   ;;  %v310_v16 = vunpack.c.l.bf16 %v309_v14  ;;  %v311_v19 = vunpack.c.h.bf16 %v309_v14  ;;  %v302_v43 = vld [vmem:[#allocation11] ss:$0 sm:$0xff]  ;;  %v303_v45 = vld [vmem:[#allocation12] ss:$0 sm:$0xff]  ;;  %s280_s21 = sshll.u32 %s523_s5, 4  ;;  %s281_s21 = int_to_ptr.vmem [resolvable:$true] %s280_s21 }
  0x73   :  { %s481_s22 = scalar_lea.vmem %s281_s21, 128  ;;  %p486_p7 = scmp.lt.s32.totalorder %s281_s21, %s281_s21 }
  0x74   :  { %p482_p6 = scmp.ne.s32.totalorder %s281_s21, %s481_s22  ;;  %p487_p8 = scmp.lt.s32.totalorder %s481_s22, %s481_s22 }
  0x75   :  { %320 = vmatpush3.bf16.msra.mxu0 %v341_v2 }
  0x76   :  { %321 = vmatprep.subr.bf16.mxu0 %v521_v0  ;;  %p488_p9 = por %p487_p8, %p486_p7 }
  0x77   :  { %v108_v6 = vld [vmem:[#allocation2] sm:$0xff]  ;;  %v109_v8 = vld [vmem:[#allocation2 + $0x8] sm:$0xff] }
  0x78   :  { %p489_p10 = pnand %p488_p9, %p482_p6 }
  0x79   :  { %322 = vmatpush3.bf16.msra.mxu0 %v342_v3 }
  0x7a   :  { %323 = vmatprep.subr.bf16.mxu0 %v521_v0 }
  0x7d   :  { %324 = vmatpush3.bf16.msra.mxu0 %v343_v4 }
  0x80   :  { %326 = vmatmul.mubr.msk.bf16.vlgmr.msra.gmra.mrb[0].mxu0 %vm149_vm2, %v344_v5 }
 0x153   :  { %v187_v7 = vpop.f32.mrb[0].mxu0 }
 0x154   :  { %v194_v9 = vadd.f32 %v187_v7, %v108_v6  ;;  %v327_v10 = vpop.f32.mrb[1].mxu0 }
 0x155   :  { %v190_v11 = vpop.f32.mrb[2].mxu0 }
 0x156   :  { %197 = vst.msk [vmem:[#allocation2] sm:$0xff] %vm105_vm0, %v194_v9  ;;  %v195_v12 = vadd.f32 %v190_v11, %v109_v8  ;;  %v328_v13 = vpop.f32.mrb[3].mxu0 }
 0x158   :  { %198 = vst.msk [vmem:[#allocation2 + $0x8] sm:$0xff] %vm105_vm0, %v195_v12 }
 0x15d   :  { %v202_v17 = vld [vmem:[#allocation2] sm:$0xff] }
 0x15e   :  { %v211_v18 = vadd.f32 %v301_v15, %v202_v17 }
 0x15f   :  { %v203_v20 = vld [vmem:[#allocation2 + $0x8] sm:$0xff] }
 0x160   :  { %v217_v21 = vadd.f32 %v310_v16, %v211_v18  ;;  %v212_v22 = vadd.f32 %v301_v15, %v203_v20 }
 0x162   :  { %v219_v23 = vsel %vm105_vm0, %v217_v21, 0.0  ;;  %v218_v24 = vadd.f32 %v311_v19, %v212_v22 }
 0x163   :  { %220 = vadd.xlane.f32.xlu0 %v219_v23 }
 0x164   :  { %v222_v25 = vsel %vm105_vm0, %v218_v24, 0.0 }
 0x167   :  { %223 = vadd.xlane.f32.xlu0 %v222_v25 }
 0x1f0   :  { %v221_v26 = vpop.xlane.xlu0 %220 }
 0x1f1   :  { %v226_v27 = vmul.f32 0.03125, %v221_v26 }
 0x1f3   :  { %v228_v28 = vsub.f32 %v217_v21, %v226_v27 }
 0x1f4   :  { %v224_v29 = vpop.xlane.xlu0 %223 }
 0x1f5   :  { %v227_v30 = vmul.f32 0.03125, %v224_v29  ;;  %v230_v31 = vmul.f32 %v228_v28, %v228_v28 }
 0x1f7   :  { %v229_v32 = vsub.f32 %v218_v24, %v227_v30  ;;  %v232_v33 = vsel %vm105_vm0, %v230_v31, 0.0 }
 0x1f8   :  { %233 = vadd.xlane.f32.xlu1 %v232_v33 }
 0x1f9   :  { %v231_v34 = vmul.f32 %v229_v32, %v229_v32 }
 0x1fb   :  { %v235_v35 = vsel %vm105_vm0, %v231_v34, 0.0 }
 0x1fc   :  { %236 = vadd.xlane.f32.xlu1 %v235_v35 }
 0x285   :  { %v234_v36 = vpop.xlane.xlu1 %233 }
 0x286   :  { %v238_v37 = vmul.f32 0.03125, %v234_v36 }
 0x288   :  { %v240_v38 = vadd.f32 1e-12, %v238_v37 }
 0x289   :  { %v237_v39 = vpop.xlane.xlu1 %236 }
 0x28a   :  { %345 = vrsqrt.f32 %v240_v38  ;;  %v239_v40 = vmul.f32 0.03125, %v237_v39 }
 0x28c   :  { %v241_v41 = vadd.f32 1e-12, %v239_v40 }
 0x28e   :  { %347 = vrsqrt.f32 %v241_v41 }
 0x294   :  { %v346_v42 = vpop.eup %345 }
 0x295   :  { %v244_v44 = vmul.f32 %v346_v42, %v228_v28 }
 0x297   :  { %v253_v46 = vmul.f32 %v302_v43, %v244_v44 }
 0x298   :  { %v348_v47 = vpop.eup %347 }
 0x299   :  { %v245_v48 = vmul.f32 %v348_v47, %v229_v32  ;;  %v262_v49 = vadd.f32 %v303_v45, %v253_v46 }
 0x29b   :  { %v254_v50 = vmul.f32 %v302_v43, %v245_v48  ;;  %v306_v51 = vpack.c.bf16 %v262_v49, %v262_v49 }
 0x29d   :  { %v263_v52 = vadd.f32 %v303_v45, %v254_v50  ;;  %273 = vst.msk [vmem:[#allocation14] sm:$0xf] %vm272_vm3, %v306_v51 }
 0x29f   :  { %v307_v53 = vpack.c.bf16 %v263_v52, %v263_v52 }
 0x2a1   :  { %274 = vst.msk [vmem:[#allocation14 + $0x4] sm:$0xf] %vm272_vm3, %v307_v53 }
 0x2a2   :  { %492 = shalt.err (!%p489_p10)
}
 0x2a3   :  { %s493_s27 = scalar_lea.hbm %s676_s6, 128 }
 0x2a4   :  { %p494_p11 = scmp.ne.s32.totalorder %s676_s6, %s493_s27  ;;  %p497_p12 = scmp.lt.u32.totalorder %s493_s27, %s676_s6 }
 0x2a6   :  { %p499_p13 = pnand %p497_p12, %p494_p11 }
 0x2a8   :  { %502 = shalt.err (!%p499_p13)
}
 0x2a9   :  { %286 = dma.vmem_to_hbm [thread:$0]  %s281_s21, 128, %s676_s6, [#allocation5], %s515_s9, %s515_s9, %s516_s10  }
 0x2aa   :  { %511 = dma.done.wait [#allocation5], 128  }
 0x2ab   :  { %512 = vsyncadd [#allocation5], 4294967168 }
 0x2ac   :  { %290 = vsyncpa [#allocation4], 1 }
 0x2ad   :  { %291 = vsyncpa [#allocation7], 1 }
 0x2ae   :  { %292 = vsyncpa [#allocation10], 1 }
 0x2af   :  { %293 = vsyncpa [#allocation13], 1 }
 0x2b0   :  { %294 = vsyncpa [#allocation5], 1 }

</bundles_post_ra>
